<compile_context>
chip_gen: v5e
topology: v5e:2x2
jax: 0.10.0
libtpu: 0.0.40
codegen_flags: <defaults>
</compile_context>

<pallas_src>
import math
import functools

import jax
import jax.numpy as jnp
from jax.experimental import pallas as pl
from jax.experimental.pallas import tpu as pltpu


UNROLL_MAX_L = 64          # <= this: fully unrolled, register-resident scan


def _softplus(z):
    # numerically-stable softplus from exp/log/max/abs (all Mosaic-supported)
    return jnp.maximum(z, 0.0) + jnp.log(1.0 + jnp.exp(-jnp.abs(z)))


def _ssm_kernel(x_ref, w_ref, dt_bias_ref, a_t_ref, d_ref, gamma_ref, beta_ref,
                o_ref, *scratch, eps: float, n_state: int, unrolled: bool):
    # Per grid step (= one batch block of `bt` sequences):
    #   x_ref       (bt, L, D)    tokens
    #   w_ref       (D, D + 2N)   fused [W_xdt@W_dt | W_B | W_C]
    #   dt_bias_ref (1, D)
    #   a_t_ref     (N, D)        A^T = (-exp(A_log))^T
    #   d_ref / gamma_ref / beta_ref (1, D)
    #   o_ref       (bt, L, D)
    # scratch (only when not unrolled):
    #   da_ref  (bt*L, N*D)  exp(delta*A), lane-packed
    #   dbu_ref (bt*L, N*D)  delta*B*u,    lane-packed
    #   c_ref   (bt*L, N*D)  C broadcast over channel lanes
    #   y_ref   (bt*L, D)    per-token y accumulator
    bt, L, D = x_ref.shape
    N = n_state
    ND = N * D
    rows = bt * L

    xf = x_ref[...].astype(jnp.float32).reshape(rows, D)

    # ---- single fused MXU pass: [delta_pre | B | C] = x @ W_fused -------------
    proj = jnp.dot(xf, w_ref[...], preferred_element_type=jnp.float32)   # (rows, D+2N)
    delta = _softplus(proj[:, :D] + dt_bias_ref[...])                    # (rows, D)
    bmat = proj[:, D:D + N]                                              # (rows, N)
    cmat = proj[:, D + N:D + 2 * N]                                      # (rows, N)
    du = delta * xf                                                      # (rows, D)
    y_skip = xf * d_ref[...]                                             # (rows, D)

    # ---- lane-packed scan coefficients (vectorized over all tokens) -----------
    # segment n of the N*D lane axis holds state n for all D channels.
    dA = jnp.concatenate(
        [jnp.exp(delta * a_t_ref[n:n + 1, :]) for n in range(N)], axis=1)   # (rows, ND)
    dBu = jnp.concatenate(
        [du * bmat[:, n:n + 1] for n in range(N)], axis=1)                  # (rows, ND)
    c_exp = jnp.concatenate(
        [jnp.broadcast_to(cmat[:, n:n + 1], (rows, D)) for n in range(N)],
        axis=1)                                                             # (rows, ND)

    # ---- sequential recurrence: h[l] = dA[l]*h[l-1] + dBu[l]; y accumulated in-loop
    if unrolled:
        # Everything stays as traced values (vreg-resident); no VMEM round trip.
        zero = jnp.zeros((1, ND), jnp.float32)
        y_rows = []
        for b in range(bt):
            h = zero
            for l in range(L):
                r = b * L + l
                h = dA[r:r + 1, :] * h + dBu[r:r + 1, :]
                hc = h * c_exp[r:r + 1, :]
                yl = y_skip[r:r + 1, :] + hc[:, 0:D]
                for n in range(1, N):
                    yl = yl + hc[:, n * D:(n + 1) * D]
                y_rows.append(yl)
        y = jnp.concatenate(y_rows, axis=0)                                 # (rows, D)
    else:
        da_ref, dbu_ref, c_ref, y_ref = scratch
        da_ref[...] = dA
        dbu_ref[...] = dBu
        c_ref[...] = c_exp

        for b in range(bt):
            base = b * L

            def step(l, h, base=base):
                r = base + l
                h = da_ref[pl.ds(r, 1), :] * h + dbu_ref[pl.ds(r, 1), :]
                hc = h * c_ref[pl.ds(r, 1), :]
                yl = hc[:, 0:D]
                for n in range(1, N):
                    yl = yl + hc[:, n * D:(n + 1) * D]
                y_ref[pl.ds(r, 1), :] = yl           # single (1, D) store per step
                return h

            jax.lax.fori_loop(0, L, step, jnp.zeros((1, ND), jnp.float32),
                              unroll=8)
        y = y_ref[...] + y_skip                                             # (rows, D)

    # ---- LayerNorm over D, write out ------------------------------------------
    mean = jnp.mean(y, axis=-1, keepdims=True)
    yc = y - mean
    var = jnp.mean(yc * yc, axis=-1, keepdims=True)
    out = yc * jax.lax.rsqrt(var + eps) * gamma_ref[...] + beta_ref[...]
    o_ref[...] = out.reshape(bt, L, D).astype(o_ref.dtype)


def ssm_forward(x, params, *, eps=1e-5, batch_block=None, interpret=False):
    """x: (B, L, d_inner). Returns LayerNorm(selective_scan(...)), shape (B, L, d_inner)."""
    B, L, D = x.shape
    x_proj_w = params["x_proj_w"]            # (R + 2N, D)
    dt_proj_w = params["dt_proj_w"]          # (D, R)
    dt_proj_b = params["dt_proj_b"]          # (D,)
    A_log = params["A_log"]                  # (D, N)
    Dskip = params["D"]                      # (D,)
    ln_w, ln_b = params["ln_w"], params["ln_b"]

    N = A_log.shape[1]
    R = dt_proj_w.shape[1]
    f32 = jnp.float32

    # ---- host-side weight prep: fold dt_proj into x_proj, fuse all projections ----
    wdt_x = x_proj_w[:R, :].T.astype(f32)               # (D, R)
    wdt = dt_proj_w.T.astype(f32)                       # (R, D)
    w_dt = wdt_x @ wdt                                  # (D, D)  x @ w_dt == (x @ wdt_x) @ wdt
    wb = x_proj_w[R:R + N, :].T.astype(f32)             # (D, N)
    wc = x_proj_w[R + N:, :].T.astype(f32)              # (D, N)
    w_fused = jnp.concatenate([w_dt, wb, wc], axis=1)   # (D, D + 2N)

    dt_bias = dt_proj_b.reshape(1, D).astype(f32)
    a_t = (-jnp.exp(A_log.astype(f32))).T               # (N, D)   A = -exp(A_log)
    d_row = Dskip.reshape(1, D).astype(f32)
    gamma = ln_w.reshape(1, D).astype(f32)
    beta = ln_b.reshape(1, D).astype(f32)

    # ---- batch-block size: bigger blocks amortize per-step overhead, but keep
    # >= 2 grid steps so both v7x TensorCores get work -----------------------------
    if batch_block is None:
        bt = 1
        if B > 2 and L % 8 == 0:
            for cand in range(B // 2, 1, -1):
                if B % cand == 0 and cand * L <= 1024:
                    bt = cand
                    break
    else:
        bt = int(batch_block)
    if B % bt != 0:
        raise ValueError(f"batch_block={bt} must divide B={B}")

    unrolled = L <= UNROLL_MAX_L
    rows = bt * L
    ND = N * D
    if unrolled:
        scratch_shapes = []
    else:
        scratch_shapes = [
            pltpu.VMEM((rows, ND), f32),   # exp(delta*A) lane-packed
            pltpu.VMEM((rows, ND), f32),   # delta*B*u    lane-packed
            pltpu.VMEM((rows, ND), f32),   # C broadcast over channel lanes
            pltpu.VMEM((rows, D), f32),    # y accumulator
        ]

    kernel = functools.partial(_ssm_kernel, eps=eps, n_state=N, unrolled=unrolled)

    # advisory cost hint for the XLA scheduler
    flops = int(B * L * (2 * D * (D + 2 * N) + D * (8 + 6 * N)))
    transcendentals = int(B * L * D * (N + 2))
    bytes_accessed = int(4 * (2 * B * L * D + D * (D + 2 * N) + N * D + 4 * D))

    def _call(single_buffer_weights: bool):
        def wspec(shape):
            kw = {}
            if single_buffer_weights:
                # constant index map -> double-buffering is pure VMEM waste
                kw["pipeline_mode"] = pl.Buffered(1)
            return pl.BlockSpec(shape, lambda g: (0, 0), **kw)

        grid_spec = pltpu.PrefetchScalarGridSpec(
            num_scalar_prefetch=0,
            grid=(B // bt,),
            in_specs=[
                pl.BlockSpec((bt, L, D), lambda g: (g, 0, 0)),   # x
                wspec((D, D + 2 * N)),                           # fused projection
                wspec((1, D)),                                   # dt bias
                wspec((N, D)),                                   # A^T
                wspec((1, D)),                                   # D skip
                wspec((1, D)),                                   # LayerNorm gamma
                wspec((1, D)),                                   # LayerNorm beta
            ],
            out_specs=pl.BlockSpec((bt, L, D), lambda g: (g, 0, 0)),
            scratch_shapes=scratch_shapes,
        )
        return pl.pallas_call(
            kernel,
            out_shape=jax.ShapeDtypeStruct((B, L, D), x.dtype),
            grid_spec=grid_spec,
            compiler_params=pltpu.CompilerParams(
                dimension_semantics=("parallel",)),
            cost_estimate=pl.CostEstimate(
                flops=flops, transcendentals=transcendentals,
                bytes_accessed=bytes_accessed),
            interpret=interpret,
        )(x, w_fused, dt_bias, a_t, d_row, gamma, beta)

    try:
        return _call(True)
    except Exception:
        # pipeline_mode=pl.Buffered(1) not supported on this jax version;
        # fall back to default double-buffered weights (correctness unchanged).
        return _call(False)


def init_ssm_params(key, d_model=64, d_state=4, ssm_ratio=2, dt_rank="auto",
                    dt_min=0.001, dt_max=0.1, dt_init="random", dt_scale=1.0,
                    dt_init_floor=1e-4, dtype=jnp.float32):
    """Mirror of the PyTorch SSM.__init__ parameter construction (JAX RNG)."""
    d_inner = int(ssm_ratio * d_model)
    R = math.ceil(d_model / 16) if dt_rank == "auto" else dt_rank
    N = math.ceil(d_model / 6) if d_state == "auto" else d_state

    k_xproj, k_dtw, k_dt = jax.random.split(key, 3)

    # x_proj: Linear(d_inner -> R + 2N, bias=False)
    bound = 1.0 / math.sqrt(d_inner)
    x_proj_w = jax.random.uniform(k_xproj, (R + 2 * N, d_inner), dtype, -bound, bound)

    # dt_proj: Linear(R -> d_inner); bias = inverse-softplus of random dt
    dt_init_std = (R ** -0.5) * dt_scale
    if dt_init == "random":
        dt_proj_w = jax.random.uniform(k_dtw, (d_inner, R), dtype,
                                       -dt_init_std, dt_init_std)
    else:
        dt_proj_w = jnp.full((d_inner, R), dt_init_std, dtype)
    dt = jnp.exp(jax.random.uniform(k_dt, (d_inner,), jnp.float32)
                 * (math.log(dt_max) - math.log(dt_min)) + math.log(dt_min))
    dt = jnp.maximum(dt, dt_init_floor)
    dt_proj_b = (dt + jnp.log(-jnp.expm1(-dt))).astype(dtype)

    # A_log = log([1..N]) per channel; D = ones; LayerNorm affine = identity
    A_log = jnp.log(jnp.broadcast_to(
        jnp.arange(1, N + 1, dtype=jnp.float32), (d_inner, N)))
    D = jnp.ones((d_inner,), jnp.float32)
    ln_w = jnp.ones((d_inner,), dtype)
    ln_b = jnp.zeros((d_inner,), dtype)

    return dict(x_proj_w=x_proj_w, dt_proj_w=dt_proj_w, dt_proj_b=dt_proj_b,
                A_log=A_log, D=D, ln_w=ln_w, ln_b=ln_b)


def ssm_reference(x, params, eps=1e-5):
    """Pure-JAX reference of the PyTorch forward math (token-major selective scan)."""
    x_proj_w = params["x_proj_w"].astype(jnp.float32)
    dt_proj_w = params["dt_proj_w"].astype(jnp.float32)
    dt_proj_b = params["dt_proj_b"].astype(jnp.float32)
    A = -jnp.exp(params["A_log"].astype(jnp.float32))        # (D, N)
    Dskip = params["D"].astype(jnp.float32)
    ln_w = params["ln_w"].astype(jnp.float32)
    ln_b = params["ln_b"].astype(jnp.float32)

    xf = x.astype(jnp.float32)
    Bb, L, Dm = xf.shape
    N = A.shape[1]
    R = dt_proj_w.shape[1]

    x_dbl = jnp.einsum("bld,kd->blk", xf, x_proj_w)           # (B, L, R+2N)
    dt_low = x_dbl[..., :R]
    Bm = x_dbl[..., R:R + N]
    Cm = x_dbl[..., R + N:]
    delta = _softplus(jnp.einsum("blr,dr->bld", dt_low, dt_proj_w) + dt_proj_b)

    dA = jnp.exp(delta[..., None] * A[None, None, :, :])      # (B, L, D, N)
    dBu = (delta * xf)[..., None] * Bm[:, :, None, :]         # (B, L, D, N)

    def step(h, ab):
        a, b = ab
        h = a * h + b
        return h, h

    _, hs = jax.lax.scan(step, jnp.zeros((Bb, Dm, N), jnp.float32),
                         (jnp.moveaxis(dA, 1, 0), jnp.moveaxis(dBu, 1, 0)))
    hs = jnp.moveaxis(hs, 0, 1)                               # (B, L, D, N)

    y = jnp.einsum("bldn,bln->bld", hs, Cm) + xf * Dskip
    mean = y.mean(axis=-1, keepdims=True)
    var = ((y - mean) ** 2).mean(axis=-1, keepdims=True)
    y = (y - mean) * jax.lax.rsqrt(var + eps)
    return (y * ln_w + ln_b).astype(x.dtype)


if __name__ == "__main__":
    key = jax.random.PRNGKey(0)
    k_x, k_x2, k_p = jax.random.split(key, 3)

    # Lane-friendly demo shapes: d_model=64 -> d_inner=128 (one full lane tile),
    # dt_rank=ceil(64/16)=4, d_state=4; B=2 so the batch grid feeds both v7x TCs.
    B, L, d_model, d_state, ssm_ratio = 2, 16, 64, 4, 2
    d_inner = ssm_ratio * d_model

    params = init_ssm_params(k_p, d_model=d_model, d_state=d_state, ssm_ratio=ssm_ratio)

    def check(xin):
        out = jax.block_until_ready(ssm_forward(xin, params))
        assert out.shape == xin.shape
        ref = ssm_reference(xin, params)
        err = float(jnp.max(jnp.abs(out - ref)))
        assert err < 5e-4, f"max abs err = {err}"

    # Path 1: small L -> fully unrolled, register-resident scan (no VMEM scratch)
    x = jax.random.normal(k_x, (B, L, d_inner), dtype=jnp.float32)
    check(x)

    # Path 2: long L -> packed VMEM slabs + fori_loop(unroll=8) scan
    x_long = jax.random.normal(k_x2, (B, 128, d_inner), dtype=jnp.float32)
    check(x_long)

    print("KERNEL_OK")
</pallas_src>

<mosaic_0001>
module attributes {stable_mosaic.version = 11 : i64} {
  func.func @_ssm_kernel(%arg0: i32, %arg1: memref<1x16x128xf32, #tpu.memory_space<vmem>>, %arg2: memref<128x136xf32, #tpu.memory_space<vmem>>, %arg3: memref<1x128xf32, #tpu.memory_space<vmem>>, %arg4: memref<4x128xf32, #tpu.memory_space<vmem>>, %arg5: memref<1x128xf32, #tpu.memory_space<vmem>>, %arg6: memref<1x128xf32, #tpu.memory_space<vmem>>, %arg7: memref<1x128xf32, #tpu.memory_space<vmem>>, %arg8: memref<1x16x128xf32, #tpu.memory_space<vmem>>) attributes {dimension_semantics = [#tpu.dimension_semantics<parallel>], iteration_bounds = array<i64: 2>, scalar_prefetch = 0 : i64, scratch_operands = 0 : i64, tpu.core_type = #tpu.core_type<tc>, window_params = [{transform_indices = @transform_0, window_bounds = array<i64: 1, 16, 128>}, {pipeline_mode = #tpu.pipeline_mode<synchronous>, transform_indices = @transform_1, window_bounds = array<i64: 128, 136>}, {pipeline_mode = #tpu.pipeline_mode<synchronous>, transform_indices = @transform_2, window_bounds = array<i64: 1, 128>}, {pipeline_mode = #tpu.pipeline_mode<synchronous>, transform_indices = @transform_3, window_bounds = array<i64: 4, 128>}, {pipeline_mode = #tpu.pipeline_mode<synchronous>, transform_indices = @transform_4, window_bounds = array<i64: 1, 128>}, {pipeline_mode = #tpu.pipeline_mode<synchronous>, transform_indices = @transform_5, window_bounds = array<i64: 1, 128>}, {pipeline_mode = #tpu.pipeline_mode<synchronous>, transform_indices = @transform_6, window_bounds = array<i64: 1, 128>}, {transform_indices = @transform_7, window_bounds = array<i64: 1, 16, 128>}]} {
    %c0 = arith.constant 0 : index
    %c0_0 = arith.constant 0 : index
    %c0_1 = arith.constant 0 : index
    %0 = vector.load %arg1[%c0, %c0_0, %c0_1] : memref<1x16x128xf32, #tpu.memory_space<vmem>>, vector<1x16x128xf32>
    %1 = vector.shape_cast %0 : vector<1x16x128xf32> to vector<16x128xf32>
    %c0_2 = arith.constant 0 : index
    %c0_3 = arith.constant 0 : index
    %2 = vector.load %arg2[%c0_2, %c0_3] : memref<128x136xf32, #tpu.memory_space<vmem>>, vector<128x136xf32>
    %cst = arith.constant dense<0.000000e+00> : vector<16x136xf32>
    %3 = tpu.matmul %1, %2, %cst {dimension_numbers = #tpu.dot_dimension_numbers<[1], [0], [0], [1], [0, 0, 1, 1], [], []>} : vector<16x128xf32>, vector<128x136xf32>, vector<16x136xf32> -> vector<16x136xf32>
    %4 = vector.extract_strided_slice %3 {offsets = [0, 0], sizes = [16, 128], strides = [1, 1]} : vector<16x136xf32> to vector<16x128xf32>
    %c0_4 = arith.constant 0 : index
    %c0_5 = arith.constant 0 : index
    %5 = vector.load %arg3[%c0_4, %c0_5] : memref<1x128xf32, #tpu.memory_space<vmem>>, vector<1x128xf32>
    %6 = vector.broadcast %5 : vector<1x128xf32> to vector<16x128xf32>
    %7 = arith.addf %4, %6 : vector<16x128xf32>
    %cst_6 = arith.constant 0.000000e+00 : f32
    %8 = vector.broadcast %cst_6 : f32 to vector<16x128xf32>
    %9 = arith.maximumf %7, %8 : vector<16x128xf32>
    %10 = math.absf %7 : vector<16x128xf32>
    %cst_7 = arith.constant 0.000000e+00 : f32
    %11 = vector.broadcast %cst_7 : f32 to vector<16x128xf32>
    %12 = arith.subf %11, %10 : vector<16x128xf32>
    %13 = math.exp %12 : vector<16x128xf32>
    %cst_8 = arith.constant 1.000000e+00 : f32
    %14 = vector.broadcast %cst_8 : f32 to vector<16x128xf32>
    %15 = arith.addf %14, %13 : vector<16x128xf32>
    %16 = math.log %15 : vector<16x128xf32>
    %17 = arith.addf %9, %16 : vector<16x128xf32>
    %18 = vector.extract_strided_slice %3 {offsets = [0, 128], sizes = [16, 4], strides = [1, 1]} : vector<16x136xf32> to vector<16x4xf32>
    %19 = vector.extract_strided_slice %3 {offsets = [0, 132], sizes = [16, 4], strides = [1, 1]} : vector<16x136xf32> to vector<16x4xf32>
    %20 = arith.mulf %17, %1 : vector<16x128xf32>
    %c0_9 = arith.constant 0 : index
    %c0_10 = arith.constant 0 : index
    %21 = vector.load %arg5[%c0_9, %c0_10] : memref<1x128xf32, #tpu.memory_space<vmem>>, vector<1x128xf32>
    %22 = vector.broadcast %21 : vector<1x128xf32> to vector<16x128xf32>
    %23 = arith.mulf %1, %22 : vector<16x128xf32>
    %c0_11 = arith.constant 0 : index
    %c0_12 = arith.constant 0 : index
    %24 = vector.load %arg4[%c0_11, %c0_12] : memref<4x128xf32, #tpu.memory_space<vmem>>, vector<1x128xf32>
    %25 = vector.broadcast %24 : vector<1x128xf32> to vector<16x128xf32>
    %26 = arith.mulf %17, %25 : vector<16x128xf32>
    %27 = math.exp %26 : vector<16x128xf32>
    %c1 = arith.constant 1 : index
    %c0_13 = arith.constant 0 : index
    %28 = vector.load %arg4[%c1, %c0_13] : memref<4x128xf32, #tpu.memory_space<vmem>>, vector<1x128xf32>
    %29 = vector.broadcast %28 : vector<1x128xf32> to vector<16x128xf32>
    %30 = arith.mulf %17, %29 : vector<16x128xf32>
    %31 = math.exp %30 : vector<16x128xf32>
    %c2 = arith.constant 2 : index
    %c0_14 = arith.constant 0 : index
    %32 = vector.load %arg4[%c2, %c0_14] : memref<4x128xf32, #tpu.memory_space<vmem>>, vector<1x128xf32>
    %33 = vector.broadcast %32 : vector<1x128xf32> to vector<16x128xf32>
    %34 = arith.mulf %17, %33 : vector<16x128xf32>
    %35 = math.exp %34 : vector<16x128xf32>
    %c3 = arith.constant 3 : index
    %c0_15 = arith.constant 0 : index
    %36 = vector.load %arg4[%c3, %c0_15] : memref<4x128xf32, #tpu.memory_space<vmem>>, vector<1x128xf32>
    %37 = vector.broadcast %36 : vector<1x128xf32> to vector<16x128xf32>
    %38 = arith.mulf %17, %37 : vector<16x128xf32>
    %39 = math.exp %38 : vector<16x128xf32>
    %40 = tpu.concatenate %27, %31, %35, %39 in 1 : vector<16x128xf32>, vector<16x128xf32>, vector<16x128xf32>, vector<16x128xf32> -> vector<16x512xf32>
    %41 = vector.extract_strided_slice %18 {offsets = [0, 0], sizes = [16, 1], strides = [1, 1]} : vector<16x4xf32> to vector<16x1xf32>
    %42 = vector.broadcast %41 : vector<16x1xf32> to vector<16x128xf32>
    %43 = arith.mulf %20, %42 : vector<16x128xf32>
    %44 = vector.extract_strided_slice %18 {offsets = [0, 1], sizes = [16, 1], strides = [1, 1]} : vector<16x4xf32> to vector<16x1xf32>
    %45 = vector.broadcast %44 : vector<16x1xf32> to vector<16x128xf32>
    %46 = arith.mulf %20, %45 : vector<16x128xf32>
    %47 = vector.extract_strided_slice %18 {offsets = [0, 2], sizes = [16, 1], strides = [1, 1]} : vector<16x4xf32> to vector<16x1xf32>
    %48 = vector.broadcast %47 : vector<16x1xf32> to vector<16x128xf32>
    %49 = arith.mulf %20, %48 : vector<16x128xf32>
    %50 = vector.extract_strided_slice %18 {offsets = [0, 3], sizes = [16, 1], strides = [1, 1]} : vector<16x4xf32> to vector<16x1xf32>
    %51 = vector.broadcast %50 : vector<16x1xf32> to vector<16x128xf32>
    %52 = arith.mulf %20, %51 : vector<16x128xf32>
    %53 = tpu.concatenate %43, %46, %49, %52 in 1 : vector<16x128xf32>, vector<16x128xf32>, vector<16x128xf32>, vector<16x128xf32> -> vector<16x512xf32>
    %54 = vector.extract_strided_slice %19 {offsets = [0, 0], sizes = [16, 1], strides = [1, 1]} : vector<16x4xf32> to vector<16x1xf32>
    %55 = vector.shape_cast %54 : vector<16x1xf32> to vector<16x1xf32>
    %56 = vector.broadcast %55 : vector<16x1xf32> to vector<16x128xf32>
    %57 = vector.extract_strided_slice %19 {offsets = [0, 1], sizes = [16, 1], strides = [1, 1]} : vector<16x4xf32> to vector<16x1xf32>
    %58 = vector.shape_cast %57 : vector<16x1xf32> to vector<16x1xf32>
    %59 = vector.broadcast %58 : vector<16x1xf32> to vector<16x128xf32>
    %60 = vector.extract_strided_slice %19 {offsets = [0, 2], sizes = [16, 1], strides = [1, 1]} : vector<16x4xf32> to vector<16x1xf32>
    %61 = vector.shape_cast %60 : vector<16x1xf32> to vector<16x1xf32>
    %62 = vector.broadcast %61 : vector<16x1xf32> to vector<16x128xf32>
    %63 = vector.extract_strided_slice %19 {offsets = [0, 3], sizes = [16, 1], strides = [1, 1]} : vector<16x4xf32> to vector<16x1xf32>
    %64 = vector.shape_cast %63 : vector<16x1xf32> to vector<16x1xf32>
    %65 = vector.broadcast %64 : vector<16x1xf32> to vector<16x128xf32>
    %66 = tpu.concatenate %56, %59, %62, %65 in 1 : vector<16x128xf32>, vector<16x128xf32>, vector<16x128xf32>, vector<16x128xf32> -> vector<16x512xf32>
    %cst_16 = arith.constant 0.000000e+00 : f32
    %67 = vector.broadcast %cst_16 : f32 to vector<1x512xf32>
    %68 = vector.extract_strided_slice %40 {offsets = [0, 0], sizes = [1, 512], strides = [1, 1]} : vector<16x512xf32> to vector<1x512xf32>
    %69 = arith.mulf %68, %67 : vector<1x512xf32>
    %70 = vector.extract_strided_slice %53 {offsets = [0, 0], sizes = [1, 512], strides = [1, 1]} : vector<16x512xf32> to vector<1x512xf32>
    %71 = arith.addf %69, %70 : vector<1x512xf32>
    %72 = vector.extract_strided_slice %66 {offsets = [0, 0], sizes = [1, 512], strides = [1, 1]} : vector<16x512xf32> to vector<1x512xf32>
    %73 = arith.mulf %71, %72 : vector<1x512xf32>
    %74 = vector.extract_strided_slice %23 {offsets = [0, 0], sizes = [1, 128], strides = [1, 1]} : vector<16x128xf32> to vector<1x128xf32>
    %75 = vector.extract_strided_slice %73 {offsets = [0, 0], sizes = [1, 128], strides = [1, 1]} : vector<1x512xf32> to vector<1x128xf32>
    %76 = arith.addf %74, %75 : vector<1x128xf32>
    %77 = vector.extract_strided_slice %73 {offsets = [0, 128], sizes = [1, 128], strides = [1, 1]} : vector<1x512xf32> to vector<1x128xf32>
    %78 = arith.addf %76, %77 : vector<1x128xf32>
    %79 = vector.extract_strided_slice %73 {offsets = [0, 256], sizes = [1, 128], strides = [1, 1]} : vector<1x512xf32> to vector<1x128xf32>
    %80 = arith.addf %78, %79 : vector<1x128xf32>
    %81 = vector.extract_strided_slice %73 {offsets = [0, 384], sizes = [1, 128], strides = [1, 1]} : vector<1x512xf32> to vector<1x128xf32>
    %82 = arith.addf %80, %81 : vector<1x128xf32>
    %83 = vector.extract_strided_slice %40 {offsets = [1, 0], sizes = [1, 512], strides = [1, 1]} : vector<16x512xf32> to vector<1x512xf32>
    %84 = arith.mulf %83, %71 : vector<1x512xf32>
    %85 = vector.extract_strided_slice %53 {offsets = [1, 0], sizes = [1, 512], strides = [1, 1]} : vector<16x512xf32> to vector<1x512xf32>
    %86 = arith.addf %84, %85 : vector<1x512xf32>
    %87 = vector.extract_strided_slice %66 {offsets = [1, 0], sizes = [1, 512], strides = [1, 1]} : vector<16x512xf32> to vector<1x512xf32>
    %88 = arith.mulf %86, %87 : vector<1x512xf32>
    %89 = vector.extract_strided_slice %23 {offsets = [1, 0], sizes = [1, 128], strides = [1, 1]} : vector<16x128xf32> to vector<1x128xf32>
    %90 = vector.extract_strided_slice %88 {offsets = [0, 0], sizes = [1, 128], strides = [1, 1]} : vector<1x512xf32> to vector<1x128xf32>
    %91 = arith.addf %89, %90 : vector<1x128xf32>
    %92 = vector.extract_strided_slice %88 {offsets = [0, 128], sizes = [1, 128], strides = [1, 1]} : vector<1x512xf32> to vector<1x128xf32>
    %93 = arith.addf %91, %92 : vector<1x128xf32>
    %94 = vector.extract_strided_slice %88 {offsets = [0, 256], sizes = [1, 128], strides = [1, 1]} : vector<1x512xf32> to vector<1x128xf32>
    %95 = arith.addf %93, %94 : vector<1x128xf32>
    %96 = vector.extract_strided_slice %88 {offsets = [0, 384], sizes = [1, 128], strides = [1, 1]} : vector<1x512xf32> to vector<1x128xf32>
    %97 = arith.addf %95, %96 : vector<1x128xf32>
    %98 = vector.extract_strided_slice %40 {offsets = [2, 0], sizes = [1, 512], strides = [1, 1]} : vector<16x512xf32> to vector<1x512xf32>
    %99 = arith.mulf %98, %86 : vector<1x512xf32>
    %100 = vector.extract_strided_slice %53 {offsets = [2, 0], sizes = [1, 512], strides = [1, 1]} : vector<16x512xf32> to vector<1x512xf32>
    %101 = arith.addf %99, %100 : vector<1x512xf32>
    %102 = vector.extract_strided_slice %66 {offsets = [2, 0], sizes = [1, 512], strides = [1, 1]} : vector<16x512xf32> to vector<1x512xf32>
    %103 = arith.mulf %101, %102 : vector<1x512xf32>
    %104 = vector.extract_strided_slice %23 {offsets = [2, 0], sizes = [1, 128], strides = [1, 1]} : vector<16x128xf32> to vector<1x128xf32>
    %105 = vector.extract_strided_slice %103 {offsets = [0, 0], sizes = [1, 128], strides = [1, 1]} : vector<1x512xf32> to vector<1x128xf32>
    %106 = arith.addf %104, %105 : vector<1x128xf32>
    %107 = vector.extract_strided_slice %103 {offsets = [0, 128], sizes = [1, 128], strides = [1, 1]} : vector<1x512xf32> to vector<1x128xf32>
    %108 = arith.addf %106, %107 : vector<1x128xf32>
    %109 = vector.extract_strided_slice %103 {offsets = [0, 256], sizes = [1, 128], strides = [1, 1]} : vector<1x512xf32> to vector<1x128xf32>
    %110 = arith.addf %108, %109 : vector<1x128xf32>
    %111 = vector.extract_strided_slice %103 {offsets = [0, 384], sizes = [1, 128], strides = [1, 1]} : vector<1x512xf32> to vector<1x128xf32>
    %112 = arith.addf %110, %111 : vector<1x128xf32>
    %113 = vector.extract_strided_slice %40 {offsets = [3, 0], sizes = [1, 512], strides = [1, 1]} : vector<16x512xf32> to vector<1x512xf32>
    %114 = arith.mulf %113, %101 : vector<1x512xf32>
    %115 = vector.extract_strided_slice %53 {offsets = [3, 0], sizes = [1, 512], strides = [1, 1]} : vector<16x512xf32> to vector<1x512xf32>
    %116 = arith.addf %114, %115 : vector<1x512xf32>
    %117 = vector.extract_strided_slice %66 {offsets = [3, 0], sizes = [1, 512], strides = [1, 1]} : vector<16x512xf32> to vector<1x512xf32>
    %118 = arith.mulf %116, %117 : vector<1x512xf32>
    %119 = vector.extract_strided_slice %23 {offsets = [3, 0], sizes = [1, 128], strides = [1, 1]} : vector<16x128xf32> to vector<1x128xf32>
    %120 = vector.extract_strided_slice %118 {offsets = [0, 0], sizes = [1, 128], strides = [1, 1]} : vector<1x512xf32> to vector<1x128xf32>
    %121 = arith.addf %119, %120 : vector<1x128xf32>
    %122 = vector.extract_strided_slice %118 {offsets = [0, 128], sizes = [1, 128], strides = [1, 1]} : vector<1x512xf32> to vector<1x128xf32>
    %123 = arith.addf %121, %122 : vector<1x128xf32>
    %124 = vector.extract_strided_slice %118 {offsets = [0, 256], sizes = [1, 128], strides = [1, 1]} : vector<1x512xf32> to vector<1x128xf32>
    %125 = arith.addf %123, %124 : vector<1x128xf32>
    %126 = vector.extract_strided_slice %118 {offsets = [0, 384], sizes = [1, 128], strides = [1, 1]} : vector<1x512xf32> to vector<1x128xf32>
    %127 = arith.addf %125, %126 : vector<1x128xf32>
    %128 = vector.extract_strided_slice %40 {offsets = [4, 0], sizes = [1, 512], strides = [1, 1]} : vector<16x512xf32> to vector<1x512xf32>
    %129 = arith.mulf %128, %116 : vector<1x512xf32>
    %130 = vector.extract_strided_slice %53 {offsets = [4, 0], sizes = [1, 512], strides = [1, 1]} : vector<16x512xf32> to vector<1x512xf32>
    %131 = arith.addf %129, %130 : vector<1x512xf32>
    %132 = vector.extract_strided_slice %66 {offsets = [4, 0], sizes = [1, 512], strides = [1, 1]} : vector<16x512xf32> to vector<1x512xf32>
    %133 = arith.mulf %131, %132 : vector<1x512xf32>
    %134 = vector.extract_strided_slice %23 {offsets = [4, 0], sizes = [1, 128], strides = [1, 1]} : vector<16x128xf32> to vector<1x128xf32>
    %135 = vector.extract_strided_slice %133 {offsets = [0, 0], sizes = [1, 128], strides = [1, 1]} : vector<1x512xf32> to vector<1x128xf32>
    %136 = arith.addf %134, %135 : vector<1x128xf32>
    %137 = vector.extract_strided_slice %133 {offsets = [0, 128], sizes = [1, 128], strides = [1, 1]} : vector<1x512xf32> to vector<1x128xf32>
    %138 = arith.addf %136, %137 : vector<1x128xf32>
    %139 = vector.extract_strided_slice %133 {offsets = [0, 256], sizes = [1, 128], strides = [1, 1]} : vector<1x512xf32> to vector<1x128xf32>
    %140 = arith.addf %138, %139 : vector<1x128xf32>
    %141 = vector.extract_strided_slice %133 {offsets = [0, 384], sizes = [1, 128], strides = [1, 1]} : vector<1x512xf32> to vector<1x128xf32>
    %142 = arith.addf %140, %141 : vector<1x128xf32>
    %143 = vector.extract_strided_slice %40 {offsets = [5, 0], sizes = [1, 512], strides = [1, 1]} : vector<16x512xf32> to vector<1x512xf32>
    %144 = arith.mulf %143, %131 : vector<1x512xf32>
    %145 = vector.extract_strided_slice %53 {offsets = [5, 0], sizes = [1, 512], strides = [1, 1]} : vector<16x512xf32> to vector<1x512xf32>
    %146 = arith.addf %144, %145 : vector<1x512xf32>
    %147 = vector.extract_strided_slice %66 {offsets = [5, 0], sizes = [1, 512], strides = [1, 1]} : vector<16x512xf32> to vector<1x512xf32>
    %148 = arith.mulf %146, %147 : vector<1x512xf32>
    %149 = vector.extract_strided_slice %23 {offsets = [5, 0], sizes = [1, 128], strides = [1, 1]} : vector<16x128xf32> to vector<1x128xf32>
    %150 = vector.extract_strided_slice %148 {offsets = [0, 0], sizes = [1, 128], strides = [1, 1]} : vector<1x512xf32> to vector<1x128xf32>
    %151 = arith.addf %149, %150 : vector<1x128xf32>
    %152 = vector.extract_strided_slice %148 {offsets = [0, 128], sizes = [1, 128], strides = [1, 1]} : vector<1x512xf32> to vector<1x128xf32>
    %153 = arith.addf %151, %152 : vector<1x128xf32>
    %154 = vector.extract_strided_slice %148 {offsets = [0, 256], sizes = [1, 128], strides = [1, 1]} : vector<1x512xf32> to vector<1x128xf32>
    %155 = arith.addf %153, %154 : vector<1x128xf32>
    %156 = vector.extract_strided_slice %148 {offsets = [0, 384], sizes = [1, 128], strides = [1, 1]} : vector<1x512xf32> to vector<1x128xf32>
    %157 = arith.addf %155, %156 : vector<1x128xf32>
    %158 = vector.extract_strided_slice %40 {offsets = [6, 0], sizes = [1, 512], strides = [1, 1]} : vector<16x512xf32> to vector<1x512xf32>
    %159 = arith.mulf %158, %146 : vector<1x512xf32>
    %160 = vector.extract_strided_slice %53 {offsets = [6, 0], sizes = [1, 512], strides = [1, 1]} : vector<16x512xf32> to vector<1x512xf32>
    %161 = arith.addf %159, %160 : vector<1x512xf32>
    %162 = vector.extract_strided_slice %66 {offsets = [6, 0], sizes = [1, 512], strides = [1, 1]} : vector<16x512xf32> to vector<1x512xf32>
    %163 = arith.mulf %161, %162 : vector<1x512xf32>
    %164 = vector.extract_strided_slice %23 {offsets = [6, 0], sizes = [1, 128], strides = [1, 1]} : vector<16x128xf32> to vector<1x128xf32>
    %165 = vector.extract_strided_slice %163 {offsets = [0, 0], sizes = [1, 128], strides = [1, 1]} : vector<1x512xf32> to vector<1x128xf32>
    %166 = arith.addf %164, %165 : vector<1x128xf32>
    %167 = vector.extract_strided_slice %163 {offsets = [0, 128], sizes = [1, 128], strides = [1, 1]} : vector<1x512xf32> to vector<1x128xf32>
    %168 = arith.addf %166, %167 : vector<1x128xf32>
    %169 = vector.extract_strided_slice %163 {offsets = [0, 256], sizes = [1, 128], strides = [1, 1]} : vector<1x512xf32> to vector<1x128xf32>
    %170 = arith.addf %168, %169 : vector<1x128xf32>
    %171 = vector.extract_strided_slice %163 {offsets = [0, 384], sizes = [1, 128], strides = [1, 1]} : vector<1x512xf32> to vector<1x128xf32>
    %172 = arith.addf %170, %171 : vector<1x128xf32>
    %173 = vector.extract_strided_slice %40 {offsets = [7, 0], sizes = [1, 512], strides = [1, 1]} : vector<16x512xf32> to vector<1x512xf32>
    %174 = arith.mulf %173, %161 : vector<1x512xf32>
    %175 = vector.extract_strided_slice %53 {offsets = [7, 0], sizes = [1, 512], strides = [1, 1]} : vector<16x512xf32> to vector<1x512xf32>
    %176 = arith.addf %174, %175 : vector<1x512xf32>
    %177 = vector.extract_strided_slice %66 {offsets = [7, 0], sizes = [1, 512], strides = [1, 1]} : vector<16x512xf32> to vector<1x512xf32>
    %178 = arith.mulf %176, %177 : vector<1x512xf32>
    %179 = vector.extract_strided_slice %23 {offsets = [7, 0], sizes = [1, 128], strides = [1, 1]} : vector<16x128xf32> to vector<1x128xf32>
    %180 = vector.extract_strided_slice %178 {offsets = [0, 0], sizes = [1, 128], strides = [1, 1]} : vector<1x512xf32> to vector<1x128xf32>
    %181 = arith.addf %179, %180 : vector<1x128xf32>
    %182 = vector.extract_strided_slice %178 {offsets = [0, 128], sizes = [1, 128], strides = [1, 1]} : vector<1x512xf32> to vector<1x128xf32>
    %183 = arith.addf %181, %182 : vector<1x128xf32>
    %184 = vector.extract_strided_slice %178 {offsets = [0, 256], sizes = [1, 128], strides = [1, 1]} : vector<1x512xf32> to vector<1x128xf32>
    %185 = arith.addf %183, %184 : vector<1x128xf32>
    %186 = vector.extract_strided_slice %178 {offsets = [0, 384], sizes = [1, 128], strides = [1, 1]} : vector<1x512xf32> to vector<1x128xf32>
    %187 = arith.addf %185, %186 : vector<1x128xf32>
    %188 = vector.extract_strided_slice %40 {offsets = [8, 0], sizes = [1, 512], strides = [1, 1]} : vector<16x512xf32> to vector<1x512xf32>
    %189 = arith.mulf %188, %176 : vector<1x512xf32>
    %190 = vector.extract_strided_slice %53 {offsets = [8, 0], sizes = [1, 512], strides = [1, 1]} : vector<16x512xf32> to vector<1x512xf32>
    %191 = arith.addf %189, %190 : vector<1x512xf32>
    %192 = vector.extract_strided_slice %66 {offsets = [8, 0], sizes = [1, 512], strides = [1, 1]} : vector<16x512xf32> to vector<1x512xf32>
    %193 = arith.mulf %191, %192 : vector<1x512xf32>
    %194 = vector.extract_strided_slice %23 {offsets = [8, 0], sizes = [1, 128], strides = [1, 1]} : vector<16x128xf32> to vector<1x128xf32>
    %195 = vector.extract_strided_slice %193 {offsets = [0, 0], sizes = [1, 128], strides = [1, 1]} : vector<1x512xf32> to vector<1x128xf32>
    %196 = arith.addf %194, %195 : vector<1x128xf32>
    %197 = vector.extract_strided_slice %193 {offsets = [0, 128], sizes = [1, 128], strides = [1, 1]} : vector<1x512xf32> to vector<1x128xf32>
    %198 = arith.addf %196, %197 : vector<1x128xf32>
    %199 = vector.extract_strided_slice %193 {offsets = [0, 256], sizes = [1, 128], strides = [1, 1]} : vector<1x512xf32> to vector<1x128xf32>
    %200 = arith.addf %198, %199 : vector<1x128xf32>
    %201 = vector.extract_strided_slice %193 {offsets = [0, 384], sizes = [1, 128], strides = [1, 1]} : vector<1x512xf32> to vector<1x128xf32>
    %202 = arith.addf %200, %201 : vector<1x128xf32>
    %203 = vector.extract_strided_slice %40 {offsets = [9, 0], sizes = [1, 512], strides = [1, 1]} : vector<16x512xf32> to vector<1x512xf32>
    %204 = arith.mulf %203, %191 : vector<1x512xf32>
    %205 = vector.extract_strided_slice %53 {offsets = [9, 0], sizes = [1, 512], strides = [1, 1]} : vector<16x512xf32> to vector<1x512xf32>
    %206 = arith.addf %204, %205 : vector<1x512xf32>
    %207 = vector.extract_strided_slice %66 {offsets = [9, 0], sizes = [1, 512], strides = [1, 1]} : vector<16x512xf32> to vector<1x512xf32>
    %208 = arith.mulf %206, %207 : vector<1x512xf32>
    %209 = vector.extract_strided_slice %23 {offsets = [9, 0], sizes = [1, 128], strides = [1, 1]} : vector<16x128xf32> to vector<1x128xf32>
    %210 = vector.extract_strided_slice %208 {offsets = [0, 0], sizes = [1, 128], strides = [1, 1]} : vector<1x512xf32> to vector<1x128xf32>
    %211 = arith.addf %209, %210 : vector<1x128xf32>
    %212 = vector.extract_strided_slice %208 {offsets = [0, 128], sizes = [1, 128], strides = [1, 1]} : vector<1x512xf32> to vector<1x128xf32>
    %213 = arith.addf %211, %212 : vector<1x128xf32>
    %214 = vector.extract_strided_slice %208 {offsets = [0, 256], sizes = [1, 128], strides = [1, 1]} : vector<1x512xf32> to vector<1x128xf32>
    %215 = arith.addf %213, %214 : vector<1x128xf32>
    %216 = vector.extract_strided_slice %208 {offsets = [0, 384], sizes = [1, 128], strides = [1, 1]} : vector<1x512xf32> to vector<1x128xf32>
    %217 = arith.addf %215, %216 : vector<1x128xf32>
    %218 = vector.extract_strided_slice %40 {offsets = [10, 0], sizes = [1, 512], strides = [1, 1]} : vector<16x512xf32> to vector<1x512xf32>
    %219 = arith.mulf %218, %206 : vector<1x512xf32>
    %220 = vector.extract_strided_slice %53 {offsets = [10, 0], sizes = [1, 512], strides = [1, 1]} : vector<16x512xf32> to vector<1x512xf32>
    %221 = arith.addf %219, %220 : vector<1x512xf32>
    %222 = vector.extract_strided_slice %66 {offsets = [10, 0], sizes = [1, 512], strides = [1, 1]} : vector<16x512xf32> to vector<1x512xf32>
    %223 = arith.mulf %221, %222 : vector<1x512xf32>
    %224 = vector.extract_strided_slice %23 {offsets = [10, 0], sizes = [1, 128], strides = [1, 1]} : vector<16x128xf32> to vector<1x128xf32>
    %225 = vector.extract_strided_slice %223 {offsets = [0, 0], sizes = [1, 128], strides = [1, 1]} : vector<1x512xf32> to vector<1x128xf32>
    %226 = arith.addf %224, %225 : vector<1x128xf32>
    %227 = vector.extract_strided_slice %223 {offsets = [0, 128], sizes = [1, 128], strides = [1, 1]} : vector<1x512xf32> to vector<1x128xf32>
    %228 = arith.addf %226, %227 : vector<1x128xf32>
    %229 = vector.extract_strided_slice %223 {offsets = [0, 256], sizes = [1, 128], strides = [1, 1]} : vector<1x512xf32> to vector<1x128xf32>
    %230 = arith.addf %228, %229 : vector<1x128xf32>
    %231 = vector.extract_strided_slice %223 {offsets = [0, 384], sizes = [1, 128], strides = [1, 1]} : vector<1x512xf32> to vector<1x128xf32>
    %232 = arith.addf %230, %231 : vector<1x128xf32>
    %233 = vector.extract_strided_slice %40 {offsets = [11, 0], sizes = [1, 512], strides = [1, 1]} : vector<16x512xf32> to vector<1x512xf32>
    %234 = arith.mulf %233, %221 : vector<1x512xf32>
    %235 = vector.extract_strided_slice %53 {offsets = [11, 0], sizes = [1, 512], strides = [1, 1]} : vector<16x512xf32> to vector<1x512xf32>
    %236 = arith.addf %234, %235 : vector<1x512xf32>
    %237 = vector.extract_strided_slice %66 {offsets = [11, 0], sizes = [1, 512], strides = [1, 1]} : vector<16x512xf32> to vector<1x512xf32>
    %238 = arith.mulf %236, %237 : vector<1x512xf32>
    %239 = vector.extract_strided_slice %23 {offsets = [11, 0], sizes = [1, 128], strides = [1, 1]} : vector<16x128xf32> to vector<1x128xf32>
    %240 = vector.extract_strided_slice %238 {offsets = [0, 0], sizes = [1, 128], strides = [1, 1]} : vector<1x512xf32> to vector<1x128xf32>
    %241 = arith.addf %239, %240 : vector<1x128xf32>
    %242 = vector.extract_strided_slice %238 {offsets = [0, 128], sizes = [1, 128], strides = [1, 1]} : vector<1x512xf32> to vector<1x128xf32>
    %243 = arith.addf %241, %242 : vector<1x128xf32>
    %244 = vector.extract_strided_slice %238 {offsets = [0, 256], sizes = [1, 128], strides = [1, 1]} : vector<1x512xf32> to vector<1x128xf32>
    %245 = arith.addf %243, %244 : vector<1x128xf32>
    %246 = vector.extract_strided_slice %238 {offsets = [0, 384], sizes = [1, 128], strides = [1, 1]} : vector<1x512xf32> to vector<1x128xf32>
    %247 = arith.addf %245, %246 : vector<1x128xf32>
    %248 = vector.extract_strided_slice %40 {offsets = [12, 0], sizes = [1, 512], strides = [1, 1]} : vector<16x512xf32> to vector<1x512xf32>
    %249 = arith.mulf %248, %236 : vector<1x512xf32>
    %250 = vector.extract_strided_slice %53 {offsets = [12, 0], sizes = [1, 512], strides = [1, 1]} : vector<16x512xf32> to vector<1x512xf32>
    %251 = arith.addf %249, %250 : vector<1x512xf32>
    %252 = vector.extract_strided_slice %66 {offsets = [12, 0], sizes = [1, 512], strides = [1, 1]} : vector<16x512xf32> to vector<1x512xf32>
    %253 = arith.mulf %251, %252 : vector<1x512xf32>
    %254 = vector.extract_strided_slice %23 {offsets = [12, 0], sizes = [1, 128], strides = [1, 1]} : vector<16x128xf32> to vector<1x128xf32>
    %255 = vector.extract_strided_slice %253 {offsets = [0, 0], sizes = [1, 128], strides = [1, 1]} : vector<1x512xf32> to vector<1x128xf32>
    %256 = arith.addf %254, %255 : vector<1x128xf32>
    %257 = vector.extract_strided_slice %253 {offsets = [0, 128], sizes = [1, 128], strides = [1, 1]} : vector<1x512xf32> to vector<1x128xf32>
    %258 = arith.addf %256, %257 : vector<1x128xf32>
    %259 = vector.extract_strided_slice %253 {offsets = [0, 256], sizes = [1, 128], strides = [1, 1]} : vector<1x512xf32> to vector<1x128xf32>
    %260 = arith.addf %258, %259 : vector<1x128xf32>
    %261 = vector.extract_strided_slice %253 {offsets = [0, 384], sizes = [1, 128], strides = [1, 1]} : vector<1x512xf32> to vector<1x128xf32>
    %262 = arith.addf %260, %261 : vector<1x128xf32>
    %263 = vector.extract_strided_slice %40 {offsets = [13, 0], sizes = [1, 512], strides = [1, 1]} : vector<16x512xf32> to vector<1x512xf32>
    %264 = arith.mulf %263, %251 : vector<1x512xf32>
    %265 = vector.extract_strided_slice %53 {offsets = [13, 0], sizes = [1, 512], strides = [1, 1]} : vector<16x512xf32> to vector<1x512xf32>
    %266 = arith.addf %264, %265 : vector<1x512xf32>
    %267 = vector.extract_strided_slice %66 {offsets = [13, 0], sizes = [1, 512], strides = [1, 1]} : vector<16x512xf32> to vector<1x512xf32>
    %268 = arith.mulf %266, %267 : vector<1x512xf32>
    %269 = vector.extract_strided_slice %23 {offsets = [13, 0], sizes = [1, 128], strides = [1, 1]} : vector<16x128xf32> to vector<1x128xf32>
    %270 = vector.extract_strided_slice %268 {offsets = [0, 0], sizes = [1, 128], strides = [1, 1]} : vector<1x512xf32> to vector<1x128xf32>
    %271 = arith.addf %269, %270 : vector<1x128xf32>
    %272 = vector.extract_strided_slice %268 {offsets = [0, 128], sizes = [1, 128], strides = [1, 1]} : vector<1x512xf32> to vector<1x128xf32>
    %273 = arith.addf %271, %272 : vector<1x128xf32>
    %274 = vector.extract_strided_slice %268 {offsets = [0, 256], sizes = [1, 128], strides = [1, 1]} : vector<1x512xf32> to vector<1x128xf32>
    %275 = arith.addf %273, %274 : vector<1x128xf32>
    %276 = vector.extract_strided_slice %268 {offsets = [0, 384], sizes = [1, 128], strides = [1, 1]} : vector<1x512xf32> to vector<1x128xf32>
    %277 = arith.addf %275, %276 : vector<1x128xf32>
    %278 = vector.extract_strided_slice %40 {offsets = [14, 0], sizes = [1, 512], strides = [1, 1]} : vector<16x512xf32> to vector<1x512xf32>
    %279 = arith.mulf %278, %266 : vector<1x512xf32>
    %280 = vector.extract_strided_slice %53 {offsets = [14, 0], sizes = [1, 512], strides = [1, 1]} : vector<16x512xf32> to vector<1x512xf32>
    %281 = arith.addf %279, %280 : vector<1x512xf32>
    %282 = vector.extract_strided_slice %66 {offsets = [14, 0], sizes = [1, 512], strides = [1, 1]} : vector<16x512xf32> to vector<1x512xf32>
    %283 = arith.mulf %281, %282 : vector<1x512xf32>
    %284 = vector.extract_strided_slice %23 {offsets = [14, 0], sizes = [1, 128], strides = [1, 1]} : vector<16x128xf32> to vector<1x128xf32>
    %285 = vector.extract_strided_slice %283 {offsets = [0, 0], sizes = [1, 128], strides = [1, 1]} : vector<1x512xf32> to vector<1x128xf32>
    %286 = arith.addf %284, %285 : vector<1x128xf32>
    %287 = vector.extract_strided_slice %283 {offsets = [0, 128], sizes = [1, 128], strides = [1, 1]} : vector<1x512xf32> to vector<1x128xf32>
    %288 = arith.addf %286, %287 : vector<1x128xf32>
    %289 = vector.extract_strided_slice %283 {offsets = [0, 256], sizes = [1, 128], strides = [1, 1]} : vector<1x512xf32> to vector<1x128xf32>
    %290 = arith.addf %288, %289 : vector<1x128xf32>
    %291 = vector.extract_strided_slice %283 {offsets = [0, 384], sizes = [1, 128], strides = [1, 1]} : vector<1x512xf32> to vector<1x128xf32>
    %292 = arith.addf %290, %291 : vector<1x128xf32>
    %293 = vector.extract_strided_slice %40 {offsets = [15, 0], sizes = [1, 512], strides = [1, 1]} : vector<16x512xf32> to vector<1x512xf32>
    %294 = arith.mulf %293, %281 : vector<1x512xf32>
    %295 = vector.extract_strided_slice %53 {offsets = [15, 0], sizes = [1, 512], strides = [1, 1]} : vector<16x512xf32> to vector<1x512xf32>
    %296 = arith.addf %294, %295 : vector<1x512xf32>
    %297 = vector.extract_strided_slice %66 {offsets = [15, 0], sizes = [1, 512], strides = [1, 1]} : vector<16x512xf32> to vector<1x512xf32>
    %298 = arith.mulf %296, %297 : vector<1x512xf32>
    %299 = vector.extract_strided_slice %23 {offsets = [15, 0], sizes = [1, 128], strides = [1, 1]} : vector<16x128xf32> to vector<1x128xf32>
    %300 = vector.extract_strided_slice %298 {offsets = [0, 0], sizes = [1, 128], strides = [1, 1]} : vector<1x512xf32> to vector<1x128xf32>
    %301 = arith.addf %299, %300 : vector<1x128xf32>
    %302 = vector.extract_strided_slice %298 {offsets = [0, 128], sizes = [1, 128], strides = [1, 1]} : vector<1x512xf32> to vector<1x128xf32>
    %303 = arith.addf %301, %302 : vector<1x128xf32>
    %304 = vector.extract_strided_slice %298 {offsets = [0, 256], sizes = [1, 128], strides = [1, 1]} : vector<1x512xf32> to vector<1x128xf32>
    %305 = arith.addf %303, %304 : vector<1x128xf32>
    %306 = vector.extract_strided_slice %298 {offsets = [0, 384], sizes = [1, 128], strides = [1, 1]} : vector<1x512xf32> to vector<1x128xf32>
    %307 = arith.addf %305, %306 : vector<1x128xf32>
    %308 = tpu.concatenate %82, %97, %112, %127, %142, %157, %172, %187, %202, %217, %232, %247, %262, %277, %292, %307 in 0 : vector<1x128xf32>, vector<1x128xf32>, vector<1x128xf32>, vector<1x128xf32>, vector<1x128xf32>, vector<1x128xf32>, vector<1x128xf32>, vector<1x128xf32>, vector<1x128xf32>, vector<1x128xf32>, vector<1x128xf32>, vector<1x128xf32>, vector<1x128xf32>, vector<1x128xf32>, vector<1x128xf32>, vector<1x128xf32> -> vector<16x128xf32>
    %cst_17 = arith.constant dense<0.000000e+00> : vector<16xf32>
    %309 = vector.multi_reduction <add>, %308, %cst_17 [1] : vector<16x128xf32> to vector<16xf32>
    %310 = vector.shape_cast %309 : vector<16xf32> to vector<16x1xf32>
    %cst_18 = arith.constant 1.280000e+02 : f32
    %311 = vector.broadcast %cst_18 : f32 to vector<16x1xf32>
    %312 = arith.divf %310, %311 : vector<16x1xf32>
    %313 = vector.broadcast %312 : vector<16x1xf32> to vector<16x128xf32>
    %314 = arith.subf %308, %313 : vector<16x128xf32>
    %315 = arith.mulf %314, %314 : vector<16x128xf32>
    %cst_19 = arith.constant dense<0.000000e+00> : vector<16xf32>
    %316 = vector.multi_reduction <add>, %315, %cst_19 [1] : vector<16x128xf32> to vector<16xf32>
    %317 = vector.shape_cast %316 : vector<16xf32> to vector<16x1xf32>
    %cst_20 = arith.constant 1.280000e+02 : f32
    %318 = vector.broadcast %cst_20 : f32 to vector<16x1xf32>
    %319 = arith.divf %317, %318 : vector<16x1xf32>
    %cst_21 = arith.constant 9.99999974E-6 : f32
    %320 = vector.broadcast %cst_21 : f32 to vector<16x1xf32>
    %321 = arith.addf %319, %320 : vector<16x1xf32>
    %322 = math.rsqrt %321 : vector<16x1xf32>
    %323 = vector.broadcast %322 : vector<16x1xf32> to vector<16x128xf32>
    %324 = arith.mulf %314, %323 : vector<16x128xf32>
    %c0_22 = arith.constant 0 : index
    %c0_23 = arith.constant 0 : index
    %325 = vector.load %arg6[%c0_22, %c0_23] : memref<1x128xf32, #tpu.memory_space<vmem>>, vector<1x128xf32>
    %326 = vector.broadcast %325 : vector<1x128xf32> to vector<16x128xf32>
    %327 = arith.mulf %324, %326 : vector<16x128xf32>
    %c0_24 = arith.constant 0 : index
    %c0_25 = arith.constant 0 : index
    %328 = vector.load %arg7[%c0_24, %c0_25] : memref<1x128xf32, #tpu.memory_space<vmem>>, vector<1x128xf32>
    %329 = vector.broadcast %328 : vector<1x128xf32> to vector<16x128xf32>
    %330 = arith.addf %327, %329 : vector<16x128xf32>
    %331 = vector.shape_cast %330 : vector<16x128xf32> to vector<1x16x128xf32>
    %c0_26 = arith.constant 0 : index
    %c0_27 = arith.constant 0 : index
    %c0_28 = arith.constant 0 : index
    %332 = vector.load %arg8[%c0_26, %c0_27, %c0_28] : memref<1x16x128xf32, #tpu.memory_space<vmem>>, vector<1x16x128xf32>
    tpu.vector_store %arg8[%c0_26, %c0_27, %c0_28], %331 {strides = array<i32>} : memref<1x16x128xf32, #tpu.memory_space<vmem>>, vector<1x16x128xf32>,
    return
  }
  func.func @transform_0(%arg0: i32) -> (i32, i32, i32) {
    %c0_i32 = arith.constant 0 : i32
    %c0_i32_0 = arith.constant 0 : i32
    %c0_i32_1 = arith.constant 0 : i32
    return %arg0, %c0_i32, %c0_i32_0 : i32, i32, i32
  }
  func.func @transform_1(%arg0: i32) -> (i32, i32) {
    %c0_i32 = arith.constant 0 : i32
    %c0_i32_0 = arith.constant 0 : i32
    %c0_i32_1 = arith.constant 0 : i32
    return %c0_i32, %c0_i32_0 : i32, i32
  }
  func.func @transform_2(%arg0: i32) -> (i32, i32) {
    %c0_i32 = arith.constant 0 : i32
    %c0_i32_0 = arith.constant 0 : i32
    %c0_i32_1 = arith.constant 0 : i32
    return %c0_i32, %c0_i32_0 : i32, i32
  }
  func.func @transform_3(%arg0: i32) -> (i32, i32) {
    %c0_i32 = arith.constant 0 : i32
    %c0_i32_0 = arith.constant 0 : i32
    %c0_i32_1 = arith.constant 0 : i32
    return %c0_i32, %c0_i32_0 : i32, i32
  }
  func.func @transform_4(%arg0: i32) -> (i32, i32) {
    %c0_i32 = arith.constant 0 : i32
    %c0_i32_0 = arith.constant 0 : i32
    %c0_i32_1 = arith.constant 0 : i32
    return %c0_i32, %c0_i32_0 : i32, i32
  }
  func.func @transform_5(%arg0: i32) -> (i32, i32) {
    %c0_i32 = arith.constant 0 : i32
    %c0_i32_0 = arith.constant 0 : i32
    %c0_i32_1 = arith.constant 0 : i32
    return %c0_i32, %c0_i32_0 : i32, i32
  }
  func.func @transform_6(%arg0: i32) -> (i32, i32) {
    %c0_i32 = arith.constant 0 : i32
    %c0_i32_0 = arith.constant 0 : i32
    %c0_i32_1 = arith.constant 0 : i32
    return %c0_i32, %c0_i32_0 : i32, i32
  }
  func.func @transform_7(%arg0: i32) -> (i32, i32, i32) {
    %c0_i32 = arith.constant 0 : i32
    %c0_i32_0 = arith.constant 0 : i32
    %c0_i32_1 = arith.constant 0 : i32
    return %arg0, %c0_i32, %c0_i32_0 : i32, i32, i32
  }
}

module attributes {stable_mosaic.version = 11 : i64} {
  func.func @_ssm_kernel(%arg0: i32, %arg1: memref<1x16x128xf32, #tpu.memory_space<vmem>>, %arg2: memref<128x136xf32, #tpu.memory_space<vmem>>, %arg3: memref<1x128xf32, #tpu.memory_space<vmem>>, %arg4: memref<4x128xf32, #tpu.memory_space<vmem>>, %arg5: memref<1x128xf32, #tpu.memory_space<vmem>>, %arg6: memref<1x128xf32, #tpu.memory_space<vmem>>, %arg7: memref<1x128xf32, #tpu.memory_space<vmem>>, %arg8: memref<1x16x128xf32, #tpu.memory_space<vmem>>) attributes {dimension_semantics = [#tpu.dimension_semantics<parallel>], iteration_bounds = array<i64: 2>, scalar_prefetch = 0 : i64, scratch_operands = 0 : i64, tpu.core_type = #tpu.core_type<tc>, window_params = [{transform_indices = @transform_0, window_bounds = array<i64: 1, 16, 128>}, {pipeline_mode = #tpu.pipeline_mode<synchronous>, transform_indices = @transform_1, window_bounds = array<i64: 128, 136>}, {pipeline_mode = #tpu.pipeline_mode<synchronous>, transform_indices = @transform_2, window_bounds = array<i64: 1, 128>}, {pipeline_mode = #tpu.pipeline_mode<synchronous>, transform_indices = @transform_3, window_bounds = array<i64: 4, 128>}, {pipeline_mode = #tpu.pipeline_mode<synchronous>, transform_indices = @transform_4, window_bounds = array<i64: 1, 128>}, {pipeline_mode = #tpu.pipeline_mode<synchronous>, transform_indices = @transform_5, window_bounds = array<i64: 1, 128>}, {pipeline_mode = #tpu.pipeline_mode<synchronous>, transform_indices = @transform_6, window_bounds = array<i64: 1, 128>}, {transform_indices = @transform_7, window_bounds = array<i64: 1, 16, 128>}]} {
    %c0 = arith.constant 0 : index
    %c0_0 = arith.constant 0 : index
    %c0_1 = arith.constant 0 : index
    %0 = vector.load %arg1[%c0, %c0_0, %c0_1] : memref<1x16x128xf32, #tpu.memory_space<vmem>>, vector<1x16x128xf32>
    %1 = vector.shape_cast %0 : vector<1x16x128xf32> to vector<16x128xf32>
    %c0_2 = arith.constant 0 : index
    %c0_3 = arith.constant 0 : index
    %2 = vector.load %arg2[%c0_2, %c0_3] : memref<128x136xf32, #tpu.memory_space<vmem>>, vector<128x136xf32>
    %cst = arith.constant dense<0.000000e+00> : vector<16x136xf32>
    %3 = tpu.matmul %1, %2, %cst {dimension_numbers = #tpu.dot_dimension_numbers<[1], [0], [0], [1], [0, 0, 1, 1], [], []>} : vector<16x128xf32>, vector<128x136xf32>, vector<16x136xf32> -> vector<16x136xf32>
    %4 = vector.extract_strided_slice %3 {offsets = [0, 0], sizes = [16, 128], strides = [1, 1]} : vector<16x136xf32> to vector<16x128xf32>
    %c0_4 = arith.constant 0 : index
    %c0_5 = arith.constant 0 : index
    %5 = vector.load %arg3[%c0_4, %c0_5] : memref<1x128xf32, #tpu.memory_space<vmem>>, vector<1x128xf32>
    %6 = vector.broadcast %5 : vector<1x128xf32> to vector<16x128xf32>
    %7 = arith.addf %4, %6 : vector<16x128xf32>
    %cst_6 = arith.constant 0.000000e+00 : f32
    %8 = vector.broadcast %cst_6 : f32 to vector<16x128xf32>
    %9 = arith.maximumf %7, %8 : vector<16x128xf32>
    %10 = math.absf %7 : vector<16x128xf32>
    %cst_7 = arith.constant 0.000000e+00 : f32
    %11 = vector.broadcast %cst_7 : f32 to vector<16x128xf32>
    %12 = arith.subf %11, %10 : vector<16x128xf32>
    %13 = math.exp %12 : vector<16x128xf32>
    %cst_8 = arith.constant 1.000000e+00 : f32
    %14 = vector.broadcast %cst_8 : f32 to vector<16x128xf32>
    %15 = arith.addf %14, %13 : vector<16x128xf32>
    %16 = math.log %15 : vector<16x128xf32>
    %17 = arith.addf %9, %16 : vector<16x128xf32>
    %18 = vector.extract_strided_slice %3 {offsets = [0, 128], sizes = [16, 4], strides = [1, 1]} : vector<16x136xf32> to vector<16x4xf32>
    %19 = vector.extract_strided_slice %3 {offsets = [0, 132], sizes = [16, 4], strides = [1, 1]} : vector<16x136xf32> to vector<16x4xf32>
    %20 = arith.mulf %17, %1 : vector<16x128xf32>
    %c0_9 = arith.constant 0 : index
    %c0_10 = arith.constant 0 : index
    %21 = vector.load %arg5[%c0_9, %c0_10] : memref<1x128xf32, #tpu.memory_space<vmem>>, vector<1x128xf32>
    %22 = vector.broadcast %21 : vector<1x128xf32> to vector<16x128xf32>
    %23 = arith.mulf %1, %22 : vector<16x128xf32>
    %c0_11 = arith.constant 0 : index
    %c0_12 = arith.constant 0 : index
    %24 = vector.load %arg4[%c0_11, %c0_12] : memref<4x128xf32, #tpu.memory_space<vmem>>, vector<1x128xf32>
    %25 = vector.broadcast %24 : vector<1x128xf32> to vector<16x128xf32>
    %26 = arith.mulf %17, %25 : vector<16x128xf32>
    %27 = math.exp %26 : vector<16x128xf32>
    %c1 = arith.constant 1 : index
    %c0_13 = arith.constant 0 : index
    %28 = vector.load %arg4[%c1, %c0_13] : memref<4x128xf32, #tpu.memory_space<vmem>>, vector<1x128xf32>
    %29 = vector.broadcast %28 : vector<1x128xf32> to vector<16x128xf32>
    %30 = arith.mulf %17, %29 : vector<16x128xf32>
    %31 = math.exp %30 : vector<16x128xf32>
    %c2 = arith.constant 2 : index
    %c0_14 = arith.constant 0 : index
    %32 = vector.load %arg4[%c2, %c0_14] : memref<4x128xf32, #tpu.memory_space<vmem>>, vector<1x128xf32>
    %33 = vector.broadcast %32 : vector<1x128xf32> to vector<16x128xf32>
    %34 = arith.mulf %17, %33 : vector<16x128xf32>
    %35 = math.exp %34 : vector<16x128xf32>
    %c3 = arith.constant 3 : index
    %c0_15 = arith.constant 0 : index
    %36 = vector.load %arg4[%c3, %c0_15] : memref<4x128xf32, #tpu.memory_space<vmem>>, vector<1x128xf32>
    %37 = vector.broadcast %36 : vector<1x128xf32> to vector<16x128xf32>
    %38 = arith.mulf %17, %37 : vector<16x128xf32>
    %39 = math.exp %38 : vector<16x128xf32>
    %40 = tpu.concatenate %27, %31, %35, %39 in 1 : vector<16x128xf32>, vector<16x128xf32>, vector<16x128xf32>, vector<16x128xf32> -> vector<16x512xf32>
    %41 = vector.extract_strided_slice %18 {offsets = [0, 0], sizes = [16, 1], strides = [1, 1]} : vector<16x4xf32> to vector<16x1xf32>
    %42 = vector.broadcast %41 : vector<16x1xf32> to vector<16x128xf32>
    %43 = arith.mulf %20, %42 : vector<16x128xf32>
    %44 = vector.extract_strided_slice %18 {offsets = [0, 1], sizes = [16, 1], strides = [1, 1]} : vector<16x4xf32> to vector<16x1xf32>
    %45 = vector.broadcast %44 : vector<16x1xf32> to vector<16x128xf32>
    %46 = arith.mulf %20, %45 : vector<16x128xf32>
    %47 = vector.extract_strided_slice %18 {offsets = [0, 2], sizes = [16, 1], strides = [1, 1]} : vector<16x4xf32> to vector<16x1xf32>
    %48 = vector.broadcast %47 : vector<16x1xf32> to vector<16x128xf32>
    %49 = arith.mulf %20, %48 : vector<16x128xf32>
    %50 = vector.extract_strided_slice %18 {offsets = [0, 3], sizes = [16, 1], strides = [1, 1]} : vector<16x4xf32> to vector<16x1xf32>
    %51 = vector.broadcast %50 : vector<16x1xf32> to vector<16x128xf32>
    %52 = arith.mulf %20, %51 : vector<16x128xf32>
    %53 = tpu.concatenate %43, %46, %49, %52 in 1 : vector<16x128xf32>, vector<16x128xf32>, vector<16x128xf32>, vector<16x128xf32> -> vector<16x512xf32>
    %54 = vector.extract_strided_slice %19 {offsets = [0, 0], sizes = [16, 1], strides = [1, 1]} : vector<16x4xf32> to vector<16x1xf32>
    %55 = vector.shape_cast %54 : vector<16x1xf32> to vector<16x1xf32>
    %56 = vector.broadcast %55 : vector<16x1xf32> to vector<16x128xf32>
    %57 = vector.extract_strided_slice %19 {offsets = [0, 1], sizes = [16, 1], strides = [1, 1]} : vector<16x4xf32> to vector<16x1xf32>
    %58 = vector.shape_cast %57 : vector<16x1xf32> to vector<16x1xf32>
    %59 = vector.broadcast %58 : vector<16x1xf32> to vector<16x128xf32>
    %60 = vector.extract_strided_slice %19 {offsets = [0, 2], sizes = [16, 1], strides = [1, 1]} : vector<16x4xf32> to vector<16x1xf32>
    %61 = vector.shape_cast %60 : vector<16x1xf32> to vector<16x1xf32>
    %62 = vector.broadcast %61 : vector<16x1xf32> to vector<16x128xf32>
    %63 = vector.extract_strided_slice %19 {offsets = [0, 3], sizes = [16, 1], strides = [1, 1]} : vector<16x4xf32> to vector<16x1xf32>
    %64 = vector.shape_cast %63 : vector<16x1xf32> to vector<16x1xf32>
    %65 = vector.broadcast %64 : vector<16x1xf32> to vector<16x128xf32>
    %66 = tpu.concatenate %56, %59, %62, %65 in 1 : vector<16x128xf32>, vector<16x128xf32>, vector<16x128xf32>, vector<16x128xf32> -> vector<16x512xf32>
    %cst_16 = arith.constant 0.000000e+00 : f32
    %67 = vector.broadcast %cst_16 : f32 to vector<1x512xf32>
    %68 = vector.extract_strided_slice %40 {offsets = [0, 0], sizes = [1, 512], strides = [1, 1]} : vector<16x512xf32> to vector<1x512xf32>
    %69 = arith.mulf %68, %67 : vector<1x512xf32>
    %70 = vector.extract_strided_slice %53 {offsets = [0, 0], sizes = [1, 512], strides = [1, 1]} : vector<16x512xf32> to vector<1x512xf32>
    %71 = arith.addf %69, %70 : vector<1x512xf32>
    %72 = vector.extract_strided_slice %66 {offsets = [0, 0], sizes = [1, 512], strides = [1, 1]} : vector<16x512xf32> to vector<1x512xf32>
    %73 = arith.mulf %71, %72 : vector<1x512xf32>
    %74 = vector.extract_strided_slice %23 {offsets = [0, 0], sizes = [1, 128], strides = [1, 1]} : vector<16x128xf32> to vector<1x128xf32>
    %75 = vector.extract_strided_slice %73 {offsets = [0, 0], sizes = [1, 128], strides = [1, 1]} : vector<1x512xf32> to vector<1x128xf32>
    %76 = arith.addf %74, %75 : vector<1x128xf32>
    %77 = vector.extract_strided_slice %73 {offsets = [0, 128], sizes = [1, 128], strides = [1, 1]} : vector<1x512xf32> to vector<1x128xf32>
    %78 = arith.addf %76, %77 : vector<1x128xf32>
    %79 = vector.extract_strided_slice %73 {offsets = [0, 256], sizes = [1, 128], strides = [1, 1]} : vector<1x512xf32> to vector<1x128xf32>
    %80 = arith.addf %78, %79 : vector<1x128xf32>
    %81 = vector.extract_strided_slice %73 {offsets = [0, 384], sizes = [1, 128], strides = [1, 1]} : vector<1x512xf32> to vector<1x128xf32>
    %82 = arith.addf %80, %81 : vector<1x128xf32>
    %83 = vector.extract_strided_slice %40 {offsets = [1, 0], sizes = [1, 512], strides = [1, 1]} : vector<16x512xf32> to vector<1x512xf32>
    %84 = arith.mulf %83, %71 : vector<1x512xf32>
    %85 = vector.extract_strided_slice %53 {offsets = [1, 0], sizes = [1, 512], strides = [1, 1]} : vector<16x512xf32> to vector<1x512xf32>
    %86 = arith.addf %84, %85 : vector<1x512xf32>
    %87 = vector.extract_strided_slice %66 {offsets = [1, 0], sizes = [1, 512], strides = [1, 1]} : vector<16x512xf32> to vector<1x512xf32>
    %88 = arith.mulf %86, %87 : vector<1x512xf32>
    %89 = vector.extract_strided_slice %23 {offsets = [1, 0], sizes = [1, 128], strides = [1, 1]} : vector<16x128xf32> to vector<1x128xf32>
    %90 = vector.extract_strided_slice %88 {offsets = [0, 0], sizes = [1, 128], strides = [1, 1]} : vector<1x512xf32> to vector<1x128xf32>
    %91 = arith.addf %89, %90 : vector<1x128xf32>
    %92 = vector.extract_strided_slice %88 {offsets = [0, 128], sizes = [1, 128], strides = [1, 1]} : vector<1x512xf32> to vector<1x128xf32>
    %93 = arith.addf %91, %92 : vector<1x128xf32>
    %94 = vector.extract_strided_slice %88 {offsets = [0, 256], sizes = [1, 128], strides = [1, 1]} : vector<1x512xf32> to vector<1x128xf32>
    %95 = arith.addf %93, %94 : vector<1x128xf32>
    %96 = vector.extract_strided_slice %88 {offsets = [0, 384], sizes = [1, 128], strides = [1, 1]} : vector<1x512xf32> to vector<1x128xf32>
    %97 = arith.addf %95, %96 : vector<1x128xf32>
    %98 = vector.extract_strided_slice %40 {offsets = [2, 0], sizes = [1, 512], strides = [1, 1]} : vector<16x512xf32> to vector<1x512xf32>
    %99 = arith.mulf %98, %86 : vector<1x512xf32>
    %100 = vector.extract_strided_slice %53 {offsets = [2, 0], sizes = [1, 512], strides = [1, 1]} : vector<16x512xf32> to vector<1x512xf32>
    %101 = arith.addf %99, %100 : vector<1x512xf32>
    %102 = vector.extract_strided_slice %66 {offsets = [2, 0], sizes = [1, 512], strides = [1, 1]} : vector<16x512xf32> to vector<1x512xf32>
    %103 = arith.mulf %101, %102 : vector<1x512xf32>
    %104 = vector.extract_strided_slice %23 {offsets = [2, 0], sizes = [1, 128], strides = [1, 1]} : vector<16x128xf32> to vector<1x128xf32>
    %105 = vector.extract_strided_slice %103 {offsets = [0, 0], sizes = [1, 128], strides = [1, 1]} : vector<1x512xf32> to vector<1x128xf32>
    %106 = arith.addf %104, %105 : vector<1x128xf32>
    %107 = vector.extract_strided_slice %103 {offsets = [0, 128], sizes = [1, 128], strides = [1, 1]} : vector<1x512xf32> to vector<1x128xf32>
    %108 = arith.addf %106, %107 : vector<1x128xf32>
    %109 = vector.extract_strided_slice %103 {offsets = [0, 256], sizes = [1, 128], strides = [1, 1]} : vector<1x512xf32> to vector<1x128xf32>
    %110 = arith.addf %108, %109 : vector<1x128xf32>
    %111 = vector.extract_strided_slice %103 {offsets = [0, 384], sizes = [1, 128], strides = [1, 1]} : vector<1x512xf32> to vector<1x128xf32>
    %112 = arith.addf %110, %111 : vector<1x128xf32>
    %113 = vector.extract_strided_slice %40 {offsets = [3, 0], sizes = [1, 512], strides = [1, 1]} : vector<16x512xf32> to vector<1x512xf32>
    %114 = arith.mulf %113, %101 : vector<1x512xf32>
    %115 = vector.extract_strided_slice %53 {offsets = [3, 0], sizes = [1, 512], strides = [1, 1]} : vector<16x512xf32> to vector<1x512xf32>
    %116 = arith.addf %114, %115 : vector<1x512xf32>
    %117 = vector.extract_strided_slice %66 {offsets = [3, 0], sizes = [1, 512], strides = [1, 1]} : vector<16x512xf32> to vector<1x512xf32>
    %118 = arith.mulf %116, %117 : vector<1x512xf32>
    %119 = vector.extract_strided_slice %23 {offsets = [3, 0], sizes = [1, 128], strides = [1, 1]} : vector<16x128xf32> to vector<1x128xf32>
    %120 = vector.extract_strided_slice %118 {offsets = [0, 0], sizes = [1, 128], strides = [1, 1]} : vector<1x512xf32> to vector<1x128xf32>
    %121 = arith.addf %119, %120 : vector<1x128xf32>
    %122 = vector.extract_strided_slice %118 {offsets = [0, 128], sizes = [1, 128], strides = [1, 1]} : vector<1x512xf32> to vector<1x128xf32>
    %123 = arith.addf %121, %122 : vector<1x128xf32>
    %124 = vector.extract_strided_slice %118 {offsets = [0, 256], sizes = [1, 128], strides = [1, 1]} : vector<1x512xf32> to vector<1x128xf32>
    %125 = arith.addf %123, %124 : vector<1x128xf32>
    %126 = vector.extract_strided_slice %118 {offsets = [0, 384], sizes = [1, 128], strides = [1, 1]} : vector<1x512xf32> to vector<1x128xf32>
    %127 = arith.addf %125, %126 : vector<1x128xf32>
    %128 = vector.extract_strided_slice %40 {offsets = [4, 0], sizes = [1, 512], strides = [1, 1]} : vector<16x512xf32> to vector<1x512xf32>
    %129 = arith.mulf %128, %116 : vector<1x512xf32>
    %130 = vector.extract_strided_slice %53 {offsets = [4, 0], sizes = [1, 512], strides = [1, 1]} : vector<16x512xf32> to vector<1x512xf32>
    %131 = arith.addf %129, %130 : vector<1x512xf32>
    %132 = vector.extract_strided_slice %66 {offsets = [4, 0], sizes = [1, 512], strides = [1, 1]} : vector<16x512xf32> to vector<1x512xf32>
    %133 = arith.mulf %131, %132 : vector<1x512xf32>
    %134 = vector.extract_strided_slice %23 {offsets = [4, 0], sizes = [1, 128], strides = [1, 1]} : vector<16x128xf32> to vector<1x128xf32>
    %135 = vector.extract_strided_slice %133 {offsets = [0, 0], sizes = [1, 128], strides = [1, 1]} : vector<1x512xf32> to vector<1x128xf32>
    %136 = arith.addf %134, %135 : vector<1x128xf32>
    %137 = vector.extract_strided_slice %133 {offsets = [0, 128], sizes = [1, 128], strides = [1, 1]} : vector<1x512xf32> to vector<1x128xf32>
    %138 = arith.addf %136, %137 : vector<1x128xf32>
    %139 = vector.extract_strided_slice %133 {offsets = [0, 256], sizes = [1, 128], strides = [1, 1]} : vector<1x512xf32> to vector<1x128xf32>
    %140 = arith.addf %138, %139 : vector<1x128xf32>
    %141 = vector.extract_strided_slice %133 {offsets = [0, 384], sizes = [1, 128], strides = [1, 1]} : vector<1x512xf32> to vector<1x128xf32>
    %142 = arith.addf %140, %141 : vector<1x128xf32>
    %143 = vector.extract_strided_slice %40 {offsets = [5, 0], sizes = [1, 512], strides = [1, 1]} : vector<16x512xf32> to vector<1x512xf32>
    %144 = arith.mulf %143, %131 : vector<1x512xf32>
    %145 = vector.extract_strided_slice %53 {offsets = [5, 0], sizes = [1, 512], strides = [1, 1]} : vector<16x512xf32> to vector<1x512xf32>
    %146 = arith.addf %144, %145 : vector<1x512xf32>
    %147 = vector.extract_strided_slice %66 {offsets = [5, 0], sizes = [1, 512], strides = [1, 1]} : vector<16x512xf32> to vector<1x512xf32>
    %148 = arith.mulf %146, %147 : vector<1x512xf32>
    %149 = vector.extract_strided_slice %23 {offsets = [5, 0], sizes = [1, 128], strides = [1, 1]} : vector<16x128xf32> to vector<1x128xf32>
    %150 = vector.extract_strided_slice %148 {offsets = [0, 0], sizes = [1, 128], strides = [1, 1]} : vector<1x512xf32> to vector<1x128xf32>
    %151 = arith.addf %149, %150 : vector<1x128xf32>
    %152 = vector.extract_strided_slice %148 {offsets = [0, 128], sizes = [1, 128], strides = [1, 1]} : vector<1x512xf32> to vector<1x128xf32>
    %153 = arith.addf %151, %152 : vector<1x128xf32>
    %154 = vector.extract_strided_slice %148 {offsets = [0, 256], sizes = [1, 128], strides = [1, 1]} : vector<1x512xf32> to vector<1x128xf32>
    %155 = arith.addf %153, %154 : vector<1x128xf32>
    %156 = vector.extract_strided_slice %148 {offsets = [0, 384], sizes = [1, 128], strides = [1, 1]} : vector<1x512xf32> to vector<1x128xf32>
    %157 = arith.addf %155, %156 : vector<1x128xf32>
    %158 = vector.extract_strided_slice %40 {offsets = [6, 0], sizes = [1, 512], strides = [1, 1]} : vector<16x512xf32> to vector<1x512xf32>
    %159 = arith.mulf %158, %146 : vector<1x512xf32>
    %160 = vector.extract_strided_slice %53 {offsets = [6, 0], sizes = [1, 512], strides = [1, 1]} : vector<16x512xf32> to vector<1x512xf32>
    %161 = arith.addf %159, %160 : vector<1x512xf32>
    %162 = vector.extract_strided_slice %66 {offsets = [6, 0], sizes = [1, 512], strides = [1, 1]} : vector<16x512xf32> to vector<1x512xf32>
    %163 = arith.mulf %161, %162 : vector<1x512xf32>
    %164 = vector.extract_strided_slice %23 {offsets = [6, 0], sizes = [1, 128], strides = [1, 1]} : vector<16x128xf32> to vector<1x128xf32>
    %165 = vector.extract_strided_slice %163 {offsets = [0, 0], sizes = [1, 128], strides = [1, 1]} : vector<1x512xf32> to vector<1x128xf32>
    %166 = arith.addf %164, %165 : vector<1x128xf32>
    %167 = vector.extract_strided_slice %163 {offsets = [0, 128], sizes = [1, 128], strides = [1, 1]} : vector<1x512xf32> to vector<1x128xf32>
    %168 = arith.addf %166, %167 : vector<1x128xf32>
    %169 = vector.extract_strided_slice %163 {offsets = [0, 256], sizes = [1, 128], strides = [1, 1]} : vector<1x512xf32> to vector<1x128xf32>
    %170 = arith.addf %168, %169 : vector<1x128xf32>
    %171 = vector.extract_strided_slice %163 {offsets = [0, 384], sizes = [1, 128], strides = [1, 1]} : vector<1x512xf32> to vector<1x128xf32>
    %172 = arith.addf %170, %171 : vector<1x128xf32>
    %173 = vector.extract_strided_slice %40 {offsets = [7, 0], sizes = [1, 512], strides = [1, 1]} : vector<16x512xf32> to vector<1x512xf32>
    %174 = arith.mulf %173, %161 : vector<1x512xf32>
    %175 = vector.extract_strided_slice %53 {offsets = [7, 0], sizes = [1, 512], strides = [1, 1]} : vector<16x512xf32> to vector<1x512xf32>
    %176 = arith.addf %174, %175 : vector<1x512xf32>
    %177 = vector.extract_strided_slice %66 {offsets = [7, 0], sizes = [1, 512], strides = [1, 1]} : vector<16x512xf32> to vector<1x512xf32>
    %178 = arith.mulf %176, %177 : vector<1x512xf32>
    %179 = vector.extract_strided_slice %23 {offsets = [7, 0], sizes = [1, 128], strides = [1, 1]} : vector<16x128xf32> to vector<1x128xf32>
    %180 = vector.extract_strided_slice %178 {offsets = [0, 0], sizes = [1, 128], strides = [1, 1]} : vector<1x512xf32> to vector<1x128xf32>
    %181 = arith.addf %179, %180 : vector<1x128xf32>
    %182 = vector.extract_strided_slice %178 {offsets = [0, 128], sizes = [1, 128], strides = [1, 1]} : vector<1x512xf32> to vector<1x128xf32>
    %183 = arith.addf %181, %182 : vector<1x128xf32>
    %184 = vector.extract_strided_slice %178 {offsets = [0, 256], sizes = [1, 128], strides = [1, 1]} : vector<1x512xf32> to vector<1x128xf32>
    %185 = arith.addf %183, %184 : vector<1x128xf32>
    %186 = vector.extract_strided_slice %178 {offsets = [0, 384], sizes = [1, 128], strides = [1, 1]} : vector<1x512xf32> to vector<1x128xf32>
    %187 = arith.addf %185, %186 : vector<1x128xf32>
    %188 = vector.extract_strided_slice %40 {offsets = [8, 0], sizes = [1, 512], strides = [1, 1]} : vector<16x512xf32> to vector<1x512xf32>
    %189 = arith.mulf %188, %176 : vector<1x512xf32>
    %190 = vector.extract_strided_slice %53 {offsets = [8, 0], sizes = [1, 512], strides = [1, 1]} : vector<16x512xf32> to vector<1x512xf32>
    %191 = arith.addf %189, %190 : vector<1x512xf32>
    %192 = vector.extract_strided_slice %66 {offsets = [8, 0], sizes = [1, 512], strides = [1, 1]} : vector<16x512xf32> to vector<1x512xf32>
    %193 = arith.mulf %191, %192 : vector<1x512xf32>
    %194 = vector.extract_strided_slice %23 {offsets = [8, 0], sizes = [1, 128], strides = [1, 1]} : vector<16x128xf32> to vector<1x128xf32>
    %195 = vector.extract_strided_slice %193 {offsets = [0, 0], sizes = [1, 128], strides = [1, 1]} : vector<1x512xf32> to vector<1x128xf32>
    %196 = arith.addf %194, %195 : vector<1x128xf32>
    %197 = vector.extract_strided_slice %193 {offsets = [0, 128], sizes = [1, 128], strides = [1, 1]} : vector<1x512xf32> to vector<1x128xf32>
    %198 = arith.addf %196, %197 : vector<1x128xf32>
    %199 = vector.extract_strided_slice %193 {offsets = [0, 256], sizes = [1, 128], strides = [1, 1]} : vector<1x512xf32> to vector<1x128xf32>
    %200 = arith.addf %198, %199 : vector<1x128xf32>
    %201 = vector.extract_strided_slice %193 {offsets = [0, 384], sizes = [1, 128], strides = [1, 1]} : vector<1x512xf32> to vector<1x128xf32>
    %202 = arith.addf %200, %201 : vector<1x128xf32>
    %203 = vector.extract_strided_slice %40 {offsets = [9, 0], sizes = [1, 512], strides = [1, 1]} : vector<16x512xf32> to vector<1x512xf32>
    %204 = arith.mulf %203, %191 : vector<1x512xf32>
    %205 = vector.extract_strided_slice %53 {offsets = [9, 0], sizes = [1, 512], strides = [1, 1]} : vector<16x512xf32> to vector<1x512xf32>
    %206 = arith.addf %204, %205 : vector<1x512xf32>
    %207 = vector.extract_strided_slice %66 {offsets = [9, 0], sizes = [1, 512], strides = [1, 1]} : vector<16x512xf32> to vector<1x512xf32>
    %208 = arith.mulf %206, %207 : vector<1x512xf32>
    %209 = vector.extract_strided_slice %23 {offsets = [9, 0], sizes = [1, 128], strides = [1, 1]} : vector<16x128xf32> to vector<1x128xf32>
    %210 = vector.extract_strided_slice %208 {offsets = [0, 0], sizes = [1, 128], strides = [1, 1]} : vector<1x512xf32> to vector<1x128xf32>
    %211 = arith.addf %209, %210 : vector<1x128xf32>
    %212 = vector.extract_strided_slice %208 {offsets = [0, 128], sizes = [1, 128], strides = [1, 1]} : vector<1x512xf32> to vector<1x128xf32>
    %213 = arith.addf %211, %212 : vector<1x128xf32>
    %214 = vector.extract_strided_slice %208 {offsets = [0, 256], sizes = [1, 128], strides = [1, 1]} : vector<1x512xf32> to vector<1x128xf32>
    %215 = arith.addf %213, %214 : vector<1x128xf32>
    %216 = vector.extract_strided_slice %208 {offsets = [0, 384], sizes = [1, 128], strides = [1, 1]} : vector<1x512xf32> to vector<1x128xf32>
    %217 = arith.addf %215, %216 : vector<1x128xf32>
    %218 = vector.extract_strided_slice %40 {offsets = [10, 0], sizes = [1, 512], strides = [1, 1]} : vector<16x512xf32> to vector<1x512xf32>
    %219 = arith.mulf %218, %206 : vector<1x512xf32>
    %220 = vector.extract_strided_slice %53 {offsets = [10, 0], sizes = [1, 512], strides = [1, 1]} : vector<16x512xf32> to vector<1x512xf32>
    %221 = arith.addf %219, %220 : vector<1x512xf32>
    %222 = vector.extract_strided_slice %66 {offsets = [10, 0], sizes = [1, 512], strides = [1, 1]} : vector<16x512xf32> to vector<1x512xf32>
    %223 = arith.mulf %221, %222 : vector<1x512xf32>
    %224 = vector.extract_strided_slice %23 {offsets = [10, 0], sizes = [1, 128], strides = [1, 1]} : vector<16x128xf32> to vector<1x128xf32>
    %225 = vector.extract_strided_slice %223 {offsets = [0, 0], sizes = [1, 128], strides = [1, 1]} : vector<1x512xf32> to vector<1x128xf32>
    %226 = arith.addf %224, %225 : vector<1x128xf32>
    %227 = vector.extract_strided_slice %223 {offsets = [0, 128], sizes = [1, 128], strides = [1, 1]} : vector<1x512xf32> to vector<1x128xf32>
    %228 = arith.addf %226, %227 : vector<1x128xf32>
    %229 = vector.extract_strided_slice %223 {offsets = [0, 256], sizes = [1, 128], strides = [1, 1]} : vector<1x512xf32> to vector<1x128xf32>
    %230 = arith.addf %228, %229 : vector<1x128xf32>
    %231 = vector.extract_strided_slice %223 {offsets = [0, 384], sizes = [1, 128], strides = [1, 1]} : vector<1x512xf32> to vector<1x128xf32>
    %232 = arith.addf %230, %231 : vector<1x128xf32>
    %233 = vector.extract_strided_slice %40 {offsets = [11, 0], sizes = [1, 512], strides = [1, 1]} : vector<16x512xf32> to vector<1x512xf32>
    %234 = arith.mulf %233, %221 : vector<1x512xf32>
    %235 = vector.extract_strided_slice %53 {offsets = [11, 0], sizes = [1, 512], strides = [1, 1]} : vector<16x512xf32> to vector<1x512xf32>
    %236 = arith.addf %234, %235 : vector<1x512xf32>
    %237 = vector.extract_strided_slice %66 {offsets = [11, 0], sizes = [1, 512], strides = [1, 1]} : vector<16x512xf32> to vector<1x512xf32>
    %238 = arith.mulf %236, %237 : vector<1x512xf32>
    %239 = vector.extract_strided_slice %23 {offsets = [11, 0], sizes = [1, 128], strides = [1, 1]} : vector<16x128xf32> to vector<1x128xf32>
    %240 = vector.extract_strided_slice %238 {offsets = [0, 0], sizes = [1, 128], strides = [1, 1]} : vector<1x512xf32> to vector<1x128xf32>
    %241 = arith.addf %239, %240 : vector<1x128xf32>
    %242 = vector.extract_strided_slice %238 {offsets = [0, 128], sizes = [1, 128], strides = [1, 1]} : vector<1x512xf32> to vector<1x128xf32>
    %243 = arith.addf %241, %242 : vector<1x128xf32>
    %244 = vector.extract_strided_slice %238 {offsets = [0, 256], sizes = [1, 128], strides = [1, 1]} : vector<1x512xf32> to vector<1x128xf32>
    %245 = arith.addf %243, %244 : vector<1x128xf32>
    %246 = vector.extract_strided_slice %238 {offsets = [0, 384], sizes = [1, 128], strides = [1, 1]} : vector<1x512xf32> to vector<1x128xf32>
    %247 = arith.addf %245, %246 : vector<1x128xf32>
    %248 = vector.extract_strided_slice %40 {offsets = [12, 0], sizes = [1, 512], strides = [1, 1]} : vector<16x512xf32> to vector<1x512xf32>
    %249 = arith.mulf %248, %236 : vector<1x512xf32>
    %250 = vector.extract_strided_slice %53 {offsets = [12, 0], sizes = [1, 512], strides = [1, 1]} : vector<16x512xf32> to vector<1x512xf32>
    %251 = arith.addf %249, %250 : vector<1x512xf32>
    %252 = vector.extract_strided_slice %66 {offsets = [12, 0], sizes = [1, 512], strides = [1, 1]} : vector<16x512xf32> to vector<1x512xf32>
    %253 = arith.mulf %251, %252 : vector<1x512xf32>
    %254 = vector.extract_strided_slice %23 {offsets = [12, 0], sizes = [1, 128], strides = [1, 1]} : vector<16x128xf32> to vector<1x128xf32>
    %255 = vector.extract_strided_slice %253 {offsets = [0, 0], sizes = [1, 128], strides = [1, 1]} : vector<1x512xf32> to vector<1x128xf32>
    %256 = arith.addf %254, %255 : vector<1x128xf32>
    %257 = vector.extract_strided_slice %253 {offsets = [0, 128], sizes = [1, 128], strides = [1, 1]} : vector<1x512xf32> to vector<1x128xf32>
    %258 = arith.addf %256, %257 : vector<1x128xf32>
    %259 = vector.extract_strided_slice %253 {offsets = [0, 256], sizes = [1, 128], strides = [1, 1]} : vector<1x512xf32> to vector<1x128xf32>
    %260 = arith.addf %258, %259 : vector<1x128xf32>
    %261 = vector.extract_strided_slice %253 {offsets = [0, 384], sizes = [1, 128], strides = [1, 1]} : vector<1x512xf32> to vector<1x128xf32>
    %262 = arith.addf %260, %261 : vector<1x128xf32>
    %263 = vector.extract_strided_slice %40 {offsets = [13, 0], sizes = [1, 512], strides = [1, 1]} : vector<16x512xf32> to vector<1x512xf32>
    %264 = arith.mulf %263, %251 : vector<1x512xf32>
    %265 = vector.extract_strided_slice %53 {offsets = [13, 0], sizes = [1, 512], strides = [1, 1]} : vector<16x512xf32> to vector<1x512xf32>
    %266 = arith.addf %264, %265 : vector<1x512xf32>
    %267 = vector.extract_strided_slice %66 {offsets = [13, 0], sizes = [1, 512], strides = [1, 1]} : vector<16x512xf32> to vector<1x512xf32>
    %268 = arith.mulf %266, %267 : vector<1x512xf32>
    %269 = vector.extract_strided_slice %23 {offsets = [13, 0], sizes = [1, 128], strides = [1, 1]} : vector<16x128xf32> to vector<1x128xf32>
    %270 = vector.extract_strided_slice %268 {offsets = [0, 0], sizes = [1, 128], strides = [1, 1]} : vector<1x512xf32> to vector<1x128xf32>
    %271 = arith.addf %269, %270 : vector<1x128xf32>
    %272 = vector.extract_strided_slice %268 {offsets = [0, 128], sizes = [1, 128], strides = [1, 1]} : vector<1x512xf32> to vector<1x128xf32>
    %273 = arith.addf %271, %272 : vector<1x128xf32>
    %274 = vector.extract_strided_slice %268 {offsets = [0, 256], sizes = [1, 128], strides = [1, 1]} : vector<1x512xf32> to vector<1x128xf32>
    %275 = arith.addf %273, %274 : vector<1x128xf32>
    %276 = vector.extract_strided_slice %268 {offsets = [0, 384], sizes = [1, 128], strides = [1, 1]} : vector<1x512xf32> to vector<1x128xf32>
    %277 = arith.addf %275, %276 : vector<1x128xf32>
    %278 = vector.extract_strided_slice %40 {offsets = [14, 0], sizes = [1, 512], strides = [1, 1]} : vector<16x512xf32> to vector<1x512xf32>
    %279 = arith.mulf %278, %266 : vector<1x512xf32>
    %280 = vector.extract_strided_slice %53 {offsets = [14, 0], sizes = [1, 512], strides = [1, 1]} : vector<16x512xf32> to vector<1x512xf32>
    %281 = arith.addf %279, %280 : vector<1x512xf32>
    %282 = vector.extract_strided_slice %66 {offsets = [14, 0], sizes = [1, 512], strides = [1, 1]} : vector<16x512xf32> to vector<1x512xf32>
    %283 = arith.mulf %281, %282 : vector<1x512xf32>
    %284 = vector.extract_strided_slice %23 {offsets = [14, 0], sizes = [1, 128], strides = [1, 1]} : vector<16x128xf32> to vector<1x128xf32>
    %285 = vector.extract_strided_slice %283 {offsets = [0, 0], sizes = [1, 128], strides = [1, 1]} : vector<1x512xf32> to vector<1x128xf32>
    %286 = arith.addf %284, %285 : vector<1x128xf32>
    %287 = vector.extract_strided_slice %283 {offsets = [0, 128], sizes = [1, 128], strides = [1, 1]} : vector<1x512xf32> to vector<1x128xf32>
    %288 = arith.addf %286, %287 : vector<1x128xf32>
    %289 = vector.extract_strided_slice %283 {offsets = [0, 256], sizes = [1, 128], strides = [1, 1]} : vector<1x512xf32> to vector<1x128xf32>
    %290 = arith.addf %288, %289 : vector<1x128xf32>
    %291 = vector.extract_strided_slice %283 {offsets = [0, 384], sizes = [1, 128], strides = [1, 1]} : vector<1x512xf32> to vector<1x128xf32>
    %292 = arith.addf %290, %291 : vector<1x128xf32>
    %293 = vector.extract_strided_slice %40 {offsets = [15, 0], sizes = [1, 512], strides = [1, 1]} : vector<16x512xf32> to vector<1x512xf32>
    %294 = arith.mulf %293, %281 : vector<1x512xf32>
    %295 = vector.extract_strided_slice %53 {offsets = [15, 0], sizes = [1, 512], strides = [1, 1]} : vector<16x512xf32> to vector<1x512xf32>
    %296 = arith.addf %294, %295 : vector<1x512xf32>
    %297 = vector.extract_strided_slice %66 {offsets = [15, 0], sizes = [1, 512], strides = [1, 1]} : vector<16x512xf32> to vector<1x512xf32>
    %298 = arith.mulf %296, %297 : vector<1x512xf32>
    %299 = vector.extract_strided_slice %23 {offsets = [15, 0], sizes = [1, 128], strides = [1, 1]} : vector<16x128xf32> to vector<1x128xf32>
    %300 = vector.extract_strided_slice %298 {offsets = [0, 0], sizes = [1, 128], strides = [1, 1]} : vector<1x512xf32> to vector<1x128xf32>
    %301 = arith.addf %299, %300 : vector<1x128xf32>
    %302 = vector.extract_strided_slice %298 {offsets = [0, 128], sizes = [1, 128], strides = [1, 1]} : vector<1x512xf32> to vector<1x128xf32>
    %303 = arith.addf %301, %302 : vector<1x128xf32>
    %304 = vector.extract_strided_slice %298 {offsets = [0, 256], sizes = [1, 128], strides = [1, 1]} : vector<1x512xf32> to vector<1x128xf32>
    %305 = arith.addf %303, %304 : vector<1x128xf32>
    %306 = vector.extract_strided_slice %298 {offsets = [0, 384], sizes = [1, 128], strides = [1, 1]} : vector<1x512xf32> to vector<1x128xf32>
    %307 = arith.addf %305, %306 : vector<1x128xf32>
    %308 = tpu.concatenate %82, %97, %112, %127, %142, %157, %172, %187, %202, %217, %232, %247, %262, %277, %292, %307 in 0 : vector<1x128xf32>, vector<1x128xf32>, vector<1x128xf32>, vector<1x128xf32>, vector<1x128xf32>, vector<1x128xf32>, vector<1x128xf32>, vector<1x128xf32>, vector<1x128xf32>, vector<1x128xf32>, vector<1x128xf32>, vector<1x128xf32>, vector<1x128xf32>, vector<1x128xf32>, vector<1x128xf32>, vector<1x128xf32> -> vector<16x128xf32>
    %cst_17 = arith.constant dense<0.000000e+00> : vector<16xf32>
    %309 = vector.multi_reduction <add>, %308, %cst_17 [1] : vector<16x128xf32> to vector<16xf32>
    %310 = vector.shape_cast %309 : vector<16xf32> to vector<16x1xf32>
    %cst_18 = arith.constant 1.280000e+02 : f32
    %311 = vector.broadcast %cst_18 : f32 to vector<16x1xf32>
    %312 = arith.divf %310, %311 : vector<16x1xf32>
    %313 = vector.broadcast %312 : vector<16x1xf32> to vector<16x128xf32>
    %314 = arith.subf %308, %313 : vector<16x128xf32>
    %315 = arith.mulf %314, %314 : vector<16x128xf32>
    %cst_19 = arith.constant dense<0.000000e+00> : vector<16xf32>
    %316 = vector.multi_reduction <add>, %315, %cst_19 [1] : vector<16x128xf32> to vector<16xf32>
    %317 = vector.shape_cast %316 : vector<16xf32> to vector<16x1xf32>
    %cst_20 = arith.constant 1.280000e+02 : f32
    %318 = vector.broadcast %cst_20 : f32 to vector<16x1xf32>
    %319 = arith.divf %317, %318 : vector<16x1xf32>
    %cst_21 = arith.constant 9.99999974E-6 : f32
    %320 = vector.broadcast %cst_21 : f32 to vector<16x1xf32>
    %321 = arith.addf %319, %320 : vector<16x1xf32>
    %322 = math.rsqrt %321 : vector<16x1xf32>
    %323 = vector.broadcast %322 : vector<16x1xf32> to vector<16x128xf32>
    %324 = arith.mulf %314, %323 : vector<16x128xf32>
    %c0_22 = arith.constant 0 : index
    %c0_23 = arith.constant 0 : index
    %325 = vector.load %arg6[%c0_22, %c0_23] : memref<1x128xf32, #tpu.memory_space<vmem>>, vector<1x128xf32>
    %326 = vector.broadcast %325 : vector<1x128xf32> to vector<16x128xf32>
    %327 = arith.mulf %324, %326 : vector<16x128xf32>
    %c0_24 = arith.constant 0 : index
    %c0_25 = arith.constant 0 : index
    %328 = vector.load %arg7[%c0_24, %c0_25] : memref<1x128xf32, #tpu.memory_space<vmem>>, vector<1x128xf32>
    %329 = vector.broadcast %328 : vector<1x128xf32> to vector<16x128xf32>
    %330 = arith.addf %327, %329 : vector<16x128xf32>
    %331 = vector.shape_cast %330 : vector<16x128xf32> to vector<1x16x128xf32>
    %c0_26 = arith.constant 0 : index
    %c0_27 = arith.constant 0 : index
    %c0_28 = arith.constant 0 : index
    %332 = vector.load %arg8[%c0_26, %c0_27, %c0_28] : memref<1x16x128xf32, #tpu.memory_space<vmem>>, vector<1x16x128xf32>
    tpu.vector_store %arg8[%c0_26, %c0_27, %c0_28], %331 {strides = array<i32>} : memref<1x16x128xf32, #tpu.memory_space<vmem>>, vector<1x16x128xf32>,
    return
  }
  func.func @transform_0(%arg0: i32) -> (i32, i32, i32) {
    %c0_i32 = arith.constant 0 : i32
    %c0_i32_0 = arith.constant 0 : i32
    %c0_i32_1 = arith.constant 0 : i32
    return %arg0, %c0_i32, %c0_i32_0 : i32, i32, i32
  }
  func.func @transform_1(%arg0: i32) -> (i32, i32) {
    %c0_i32 = arith.constant 0 : i32
    %c0_i32_0 = arith.constant 0 : i32
    %c0_i32_1 = arith.constant 0 : i32
    return %c0_i32, %c0_i32_0 : i32, i32
  }
  func.func @transform_2(%arg0: i32) -> (i32, i32) {
    %c0_i32 = arith.constant 0 : i32
    %c0_i32_0 = arith.constant 0 : i32
    %c0_i32_1 = arith.constant 0 : i32
    return %c0_i32, %c0_i32_0 : i32, i32
  }
  func.func @transform_3(%arg0: i32) -> (i32, i32) {
    %c0_i32 = arith.constant 0 : i32
    %c0_i32_0 = arith.constant 0 : i32
    %c0_i32_1 = arith.constant 0 : i32
    return %c0_i32, %c0_i32_0 : i32, i32
  }
  func.func @transform_4(%arg0: i32) -> (i32, i32) {
    %c0_i32 = arith.constant 0 : i32
    %c0_i32_0 = arith.constant 0 : i32
    %c0_i32_1 = arith.constant 0 : i32
    return %c0_i32, %c0_i32_0 : i32, i32
  }
  func.func @transform_5(%arg0: i32) -> (i32, i32) {
    %c0_i32 = arith.constant 0 : i32
    %c0_i32_0 = arith.constant 0 : i32
    %c0_i32_1 = arith.constant 0 : i32
    return %c0_i32, %c0_i32_0 : i32, i32
  }
  func.func @transform_6(%arg0: i32) -> (i32, i32) {
    %c0_i32 = arith.constant 0 : i32
    %c0_i32_0 = arith.constant 0 : i32
    %c0_i32_1 = arith.constant 0 : i32
    return %c0_i32, %c0_i32_0 : i32, i32
  }
  func.func @transform_7(%arg0: i32) -> (i32, i32, i32) {
    %c0_i32 = arith.constant 0 : i32
    %c0_i32_0 = arith.constant 0 : i32
    %c0_i32_1 = arith.constant 0 : i32
    return %arg0, %c0_i32, %c0_i32_0 : i32, i32, i32
  }
}

</mosaic_0001>

<bundles_post_ra>
// kernel: tpu_custom_call.1
= control target key start
LH: loop header
LB: loop body
LE: loop exit
PB: predicated region body
PF: predicated region fallthrough
CT: control target
= control target key end

     0   :  { %12 = vsyncpa [#allocation3], 0  ;;  %s1979_s0 = inlined_call_operand.vmem [shape: f32[2,16,128], index: 0, kind: input, shape index: {}]   ;;  %s1980_s1 = inlined_call_operand.vmem [shape: f32[128,136], index: 1, kind: input, shape index: {}]   ;;  %s1981_s2 = inlined_call_operand.vmem [shape: f32[1,128], index: 2, kind: input, shape index: {}]   ;;  %s1982_s3 = inlined_call_operand.vmem [shape: f32[4,128], index: 3, kind: input, shape index: {}]   ;;  %s1983_s4 = inlined_call_operand.vmem [shape: f32[1,128], index: 4, kind: input, shape index: {}]   ;;  %s1984_s5 = inlined_call_operand.vmem [shape: f32[1,128], index: 5, kind: input, shape index: {}]   ;;  %s1985_s6 = inlined_call_operand.vmem [shape: f32[1,128], index: 6, kind: input, shape index: {}]   ;;  %s1986_s7 = inlined_call_operand.hbm [shape: f32[2,16,128], index: 7, kind: output, shape index: {}]  }
   0x1   :  { %14 = vsyncpa [#allocation3 + $0x1], 0  ;;  %s1357_s24 = smov 0   ;;  %s1359_s25 = smov 0  }
   0x2   :  { %s1361_s26 = smov 0   ;;  %s1363_s27 = smov 0  }
   0x3 LB: > { %s1378_s28 = sadd.s32 4294967295, %s1304_s27   ;;  %s1091_s29 = sadd.s32 4294967294, %s1304_s27   ;;  %s1304_s27 = sphi %s1363_s27, %s1992_s27   ;;  %s1300_s26 = sphi %s1361_s26, %s1991_s26   ;;  %s1296_s25 = sphi %s1359_s25, %s1990_s25   ;;  %s1292_s24 = sphi %s1357_s24, %s1989_s24  }
   0x4   : > { %s1382_s30 = sadd.s32 1, %s1304_s27   ;;  %s179_s8 = sadd.s32 1, %s1300_s26 }
   0x5   : > { %s176_s9 = ssub.s32 %s1304_s27, %s1382_s30  ;;  %p189_p0 = scmp.ne.s32.totalorder %s1300_s26, %s1296_s25 }
   0x6   : > { %p177_p1 = scmp.eq.s32.totalorder %s176_s9, 0  ;;  %p190_p2 = scmp.eq.s32.totalorder %s1378_s28, 1 }
   0x7   : > { %p195_p3 = scmp.ne.s32.totalorder %s1296_s25, %s1292_s24  ;;  %p196_p4 = scmp.eq.s32.totalorder %s1091_s29, 1 }
   0x8   : > { %s1393_s10 = scalar_select %p177_p1, %s1300_s26, %s179_s8  }
   0x9   : > { %p1395_p5 = por %p190_p2, %p189_p0  ;;  %p1399_p6 = por %p196_p4, %p195_p3 }
   0xa   : > { %p1094_p7 = scmp.ge.s32.totalorder %s1304_s27, 1  ;;  %p240_p8 = scmp.lt.s32.totalorder %s1304_s27, 3 }
   0xc   : > { %p241_p9 = pnand %p1094_p7, %p240_p8 }
   0xd   : > { %p272_p10 = scmp.lt.s32.totalorder (!%p241_p9), %s1378_s28, 1  ;;  %s269_s8 = sand.u32 (!%p241_p9), 1, %s1296_s25  }
   0xe   : > { %244 = sbr.rel (%p241_p9) target bundleno = 675 (0x2a3), region = 48  ;;  %s1104_s18 = sshll.u32 (!%p241_p9), %s1378_s28, 4 }
   0xf   : > { %s1025_s20 = scalar_lea.hbm (!%p241_p9), %s1986_s7, %s1104_s18  ;;  %s1262_s14 = scalar_lea.hbm (!%p241_p9), %s1986_s7, 32 }
  0x10   : > { %s1028_s23 = sshll.u32 (!%p241_p9), %s1025_s20, 4  ;;  %s1029_s23 = int_to_ptr.hbm [resolvable:$true] %s1028_s23 }
  0x11   : > { %s1256_s29 = sshra.s32 (!%p241_p9), %s1029_s23, 4  ;;  %s1257_s29 = int_to_ptr.hbm [resolvable:$true] %s1256_s29 }
  0x12   : > { %p1263_p0 = scmp.lt.s32.totalorder (!%p241_p9), %s1257_s29, %s1986_s7 }
  0x13   : > { %v310_v0 = vld [vmem:[%s1980_s1 + $0xf8] sm:$0xff]  ;;  %v308_v1 = vld [vmem:[%s1980_s1 + $0xe8] sm:$0xff]  ;;  %v309_v5 = vld [vmem:[%s1980_s1 + $0xf0] sm:$0xff]  ;;  %s273_s21 = scalar_select %p272_p10, %s1378_s28, 1  ;;  %v1306_v33 = vmov 2   ;;  %v1307_v34 = vmov 0  }
  0x14   : > { %334 = vmatpush.msra.mxu1 %v310_v0  ;;  %1121 = vmatpush.msra.mxu3 %v310_v0  ;;  %v306_v2 = vld [vmem:[%s1980_s1 + $0xd8] sm:$0xff]  ;;  %v304_v3 = vld [vmem:[%s1980_s1 + $0xc8] sm:$0xff]  ;;  %v307_v6 = vld [vmem:[%s1980_s1 + $0xe0] sm:$0xff]  ;;  %v1308_v38 = vmov 3   ;;  %v1309_v39 = vmov 1   ;;  %v1310_v40 = vmov 4  }
  0x15   : > { %v302_v4 = vld [vmem:[%s1980_s1 + $0xb8] sm:$0xff]  ;;  %v300_v7 = vld [vmem:[%s1980_s1 + $0xa8] sm:$0xff]  ;;  %311 = vmatpush.msra.mxu0 %v309_v5  ;;  %1105 = vmatpush.msra.mxu2 %v309_v5  ;;  %v305_v8 = vld [vmem:[%s1980_s1 + $0xd0] sm:$0xff]  ;;  %s1103_s16 = sshll.u32 %s273_s21, 4  ;;  %v1311_v41 = vmov 6   ;;  %v1312_v42 = vmov 5  }
  0x16   : > { %335 = vmatpush.msra.mxu1 %v308_v1  ;;  %1122 = vmatpush.msra.mxu3 %v308_v1  ;;  %v298_v9 = vld [vmem:[%s1980_s1 + $0x98] sm:$0xff]  ;;  %v296_v10 = vld [vmem:[%s1980_s1 + $0x88] sm:$0xff]  ;;  %v303_v11 = vld [vmem:[%s1980_s1 + $0xc0] sm:$0xff]  ;;  %s276_s13 = scalar_lea.vmem %s1979_s0, %s1103_s16  ;;  %v1313_v43 = vmov 7   ;;  %vm931_vm0 = vcmask 1040384   ;;  %vm933_vm1 = vcmask 1041408  }
  0x17   : > { %312 = vmatpush.msra.mxu0 %v307_v6  ;;  %1106 = vmatpush.msra.mxu2 %v307_v6  ;;  %v301_v12 = vld [vmem:[%s1980_s1 + $0xb0] sm:$0xff]  ;;  %v294_v13 = vld [vmem:[%s1980_s1 + $0x78] sm:$0xff]  ;;  %v299_v14 = vld [vmem:[%s1980_s1 + $0xa0] sm:$0xff]  ;;  %vm935_vm2 = vcmask 1042432   ;;  %vm937_vm3 = vcmask 1043456   ;;  %vm939_vm4 = vcmask 1044480  }
  0x18   : > { %336 = vmatpush.msra.mxu1 %v306_v2  ;;  %1123 = vmatpush.msra.mxu3 %v306_v2  ;;  %v292_v15 = vld [vmem:[%s1980_s1 + $0x68] sm:$0xff]  ;;  %v297_v16 = vld [vmem:[%s1980_s1 + $0x90] sm:$0xff]  ;;  %v290_v17 = vld [vmem:[%s1980_s1 + $0x58] sm:$0xff]  ;;  %vm941_vm5 = vcmask 1045504   ;;  %vm943_vm6 = vcmask 1046528   ;;  %s1014_s28 = scalar_lea.sflag [#allocation3], %s269_s8 }
  0x19   : > { %313 = vmatpush.msra.mxu0 %v305_v8  ;;  %1107 = vmatpush.msra.mxu2 %v305_v8  ;;  %v295_v18 = vld [vmem:[%s1980_s1 + $0x80] sm:$0xff]  ;;  %v288_v19 = vld [vmem:[%s1980_s1 + $0x48] sm:$0xff]  ;;  %v293_v20 = vld [vmem:[%s1980_s1 + $0x70] sm:$0xff]  ;;  %s1258_s21 = scalar_lea.hbm %s1257_s29, 16 }
  0x1a   : > { %337 = vmatpush.msra.mxu1 %v304_v3  ;;  %1124 = vmatpush.msra.mxu3 %v304_v3  ;;  %v286_v21 = vld [vmem:[%s1980_s1 + $0x38] sm:$0xff]  ;;  %v291_v22 = vld [vmem:[%s1980_s1 + $0x60] sm:$0xff]  ;;  %v284_v23 = vld [vmem:[%s1980_s1 + $0x28] sm:$0xff]  ;;  %p1259_p11 = scmp.ne.s32.totalorder %s1257_s29, %s1258_s21  ;;  %p1264_p1 = scmp.lt.s32.totalorder %s1262_s14, %s1258_s21 }
  0x1b   : > { %314 = vmatpush.msra.mxu0 %v303_v11  ;;  %1108 = vmatpush.msra.mxu2 %v303_v11  ;;  %v289_v24 = vld [vmem:[%s1980_s1 + $0x50] sm:$0xff]  ;;  %v282_v25 = vld [vmem:[%s1980_s1 + $0x18] sm:$0xff]  ;;  %v287_v26 = vld [vmem:[%s1980_s1 + $0x40] sm:$0xff] }
  0x1c   : > { %338 = vmatpush.msra.mxu1 %v302_v4  ;;  %1125 = vmatpush.msra.mxu3 %v302_v4  ;;  %v280_v27 = vld [vmem:[%s1980_s1 + $0x8] sm:$0xff]  ;;  %v1494_v28 = vld [vmem:[%s276_s13] sm:$0xff]  ;;  %v285_v30 = vld [vmem:[%s1980_s1 + $0x30] sm:$0xff]  ;;  %p1260_p12 = pnand %p1259_p11, %p1395_p5  ;;  %p1265_p2 = por %p1264_p1, %p1263_p0 }
  0x1d   : > { %315 = vmatpush.msra.mxu0 %v301_v12  ;;  %1109 = vmatpush.msra.mxu2 %v301_v12  ;;  %v1496_v29 = vld [vmem:[%s276_s13 + $0x8] sm:$0xff]  ;;  %v283_v31 = vld [vmem:[%s1980_s1 + $0x20] sm:$0xff]  ;;  %v281_v32 = vld [vmem:[%s1980_s1 + $0x10] sm:$0xff]  ;;  %s1095_s13 = sshll.u32 %s269_s8, 4 }
  0x1e   : > { %339 = vmatpush.msra.mxu1 %v300_v7  ;;  %1126 = vmatpush.msra.mxu3 %v300_v7  ;;  %v279_v35 = vld [vmem:[%s1980_s1] sm:$0xff]  ;;  %s271_s17 = scalar_lea.vmem [#allocation2], %s1095_s13  ;;  %p1261_p13 = pneg %p1260_p12 }
  0x1f   : > { %316 = vmatpush.msra.mxu0 %v299_v14  ;;  %1110 = vmatpush.msra.mxu2 %v299_v14  ;;  %v1205_v44 = vld [vmem:[%s1981_s2] ss:$0 sm:$0xff]  ;;  %v1527_v59 = vld [vmem:[%s1982_s3 + $0x2] ss:$0 sm:$0xff]  ;;  %v1535_v2 = vld [vmem:[%s1982_s3 + $0x3] ss:$0 sm:$0xff] }
  0x20   : > { %340 = vmatpush.msra.mxu1 %v298_v9  ;;  %1127 = vmatpush.msra.mxu3 %v298_v9  ;;  %v1522_v58 = vld [vmem:[%s1982_s3] ss:$0 sm:$0xff]  ;;  %v1540_v4 = vld [vmem:[%s1982_s3 + $0x1] ss:$0 sm:$0xff]  ;;  %s1026_s22 = sshll.u32 %s271_s17, 4  ;;  %p1266_p3 = pnand %p1265_p2, %p1261_p13  ;;  %s1027_s22 = int_to_ptr.vmem [resolvable:$true] %s1026_s22 }
  0x21   : > { %317 = vmatpush.msra.mxu0 %v297_v16  ;;  %1111 = vmatpush.msra.mxu2 %v297_v16 }
  0x22   : > { %341 = vmatpush.msra.mxu1 %v296_v10  ;;  %1128 = vmatpush.msra.mxu3 %v296_v10 }
  0x23   : > { %318 = vmatpush.msra.mxu0 %v295_v18  ;;  %1112 = vmatpush.msra.mxu2 %v295_v18 }
  0x24   : > { %342 = vmatpush.msra.mxu1 %v294_v13  ;;  %1129 = vmatpush.msra.mxu3 %v294_v13 }
  0x25   : > { %319 = vmatpush.msra.mxu0 %v293_v20  ;;  %1113 = vmatpush.msra.mxu2 %v293_v20 }
  0x26   : > { %343 = vmatpush.msra.mxu1 %v292_v15  ;;  %1130 = vmatpush.msra.mxu3 %v292_v15 }
  0x27   : > { %320 = vmatpush.msra.mxu0 %v291_v22  ;;  %1114 = vmatpush.msra.mxu2 %v291_v22 }
  0x28   : > { %344 = vmatpush.msra.mxu1 %v290_v17  ;;  %1131 = vmatpush.msra.mxu3 %v290_v17 }
  0x29   : > { %321 = vmatpush.msra.mxu0 %v289_v24  ;;  %1115 = vmatpush.msra.mxu2 %v289_v24 }
  0x2a   : > { %345 = vmatpush.msra.mxu1 %v288_v19  ;;  %1132 = vmatpush.msra.mxu3 %v288_v19 }
  0x2b   : > { %322 = vmatpush.msra.mxu0 %v287_v26  ;;  %1116 = vmatpush.msra.mxu2 %v287_v26 }
  0x2c   : > { %346 = vmatpush.msra.mxu1 %v286_v21  ;;  %1133 = vmatpush.msra.mxu3 %v286_v21 }
  0x2d   : > { %323 = vmatpush.msra.mxu0 %v285_v30  ;;  %1117 = vmatpush.msra.mxu2 %v285_v30 }
  0x2e   : > { %347 = vmatpush.msra.mxu1 %v284_v23  ;;  %1134 = vmatpush.msra.mxu3 %v284_v23 }
  0x2f   : > { %1189 = vset.pattern.permute.xlu1 %v1306_v33  ;;  %1187 = vset.pattern.permute.xlu0 %v1307_v34 }
  0x30   : > { %348 = vmatpush.msra.mxu1 %v282_v25  ;;  %1135 = vmatpush.msra.mxu3 %v282_v25 }
  0x31   : > { %324 = vmatpush.msra.mxu0 %v283_v31  ;;  %1118 = vmatpush.msra.mxu2 %v283_v31 }
  0x32   : > { %349 = vmatpush.msra.mxu1 %v280_v27  ;;  %1136 = vmatpush.msra.mxu3 %v280_v27 }
  0x33   : > { %350 = vmatmul.f32.vlgmr.msra.gmra.mxu1 %v1494_v28  ;;  %353 = vmatmul.f32.vlgmr.msra.gmra.mxu3 %v1496_v29 }
  0x34   : > { %1191 = vset.pattern.permute.xlu2 %v1307_v34  ;;  %325 = vmatpush.msra.mxu0 %v281_v32 }
  0x35   : > { %1119 = vmatpush.msra.mxu2 %v281_v32 }
  0x36   : > { %326 = vmatpush.msra.mxu0 %v279_v35 }
  0x37   : > { %1120 = vmatpush.msra.mxu2 %v279_v35  ;;  %327 = vmatmul.f32.vlgmr.msra.gmra.mxu0 %v1494_v28 }
  0x38   : > { %330 = vmatmul.f32.vlgmr.msra.gmra.mxu2 %v1496_v29 }
  0xb0   : > { %v351_v36 = vpop.f32.mrf.mxu1 }
  0xb1   : > { %444 = vperm.xlu1 %1189, %v351_v36   ;;  %423 = vperm.xlu0 %1187, %v351_v36  }
  0xb4   : > { %v328_v45 = vpop.f32.mrf.mxu0 }
  0xb5   : > { %v361_v46 = vadd.f32 %v1205_v44, %v328_v45 }
  0xb6   : > { %v354_v37 = vpop.f32.mrf.mxu3 }
  0xb7   : > { %428 = vperm.xlu2 %1191, %v354_v37   ;;  %v365_v47 = vand.u32 2147483647, %v361_v46  ;;  %v363_v54 = vmax.f32 %v361_v46, 0.0 }
  0xb9   : > { %1190 = vset.pattern.permute.xlu1 %v1308_v38  ;;  %1188 = vset.pattern.permute.xlu0 %v1309_v39  ;;  %v367_v48 = vsub.f32 0.0, %v365_v47 }
  0xba   : > { %454 = vperm.xlu1 %1190, %v351_v36   ;;  %434 = vperm.xlu0 %1188, %v351_v36  }
  0xbb   : > { %v369_v49 = vmul.f32 1.442695, %v367_v48  ;;  %v331_v53 = vpop.f32.mrf.mxu2 }
  0xbc   : > { %v1517_v56 = vadd.f32 %v1205_v44, %v331_v53 }
  0xbd   : > { %1212 = vpow2.f32 %v369_v49 }
  0xbe   : > { %v366_v60 = vand.u32 2147483647, %v1517_v56  ;;  %v364_v48 = vmax.f32 %v1517_v56, 0.0 }
  0xbf   : > { %1192 = vset.pattern.permute.xlu2 %v1309_v39 }
  0xc0   : > { %438 = vperm.xlu2 %1192, %v354_v37   ;;  %v368_v63 = vsub.f32 0.0, %v366_v60 }
  0xc2   : > { %1193 = vset.pattern.permute.xlu1 %v1306_v33  ;;  %1195 = vset.pattern.permute.xlu0 %v1310_v40  ;;  %v371_v3 = vmul.f32 1.442695, %v368_v63 }
  0xc3   : > { %448 = vperm.xlu1 %1193, %v354_v37   ;;  %464 = vperm.xlu0 %1195, %v351_v36   ;;  %v1213_v50 = vpop.eup %1212 }
  0xc4   : > { %v373_v51 = vadd.f32 1.0, %v1213_v50 }
  0xc6   : > { %1214 = vlog2.f32 %v373_v51 }
  0xc8   : > { %1194 = vset.pattern.permute.xlu2 %v1308_v38 }
  0xc9   : > { %458 = vperm.xlu2 %1194, %v354_v37  }
  0xcb   : > { %1198 = vset.pattern.permute.xlu1 %v1310_v40  ;;  %1200 = vset.pattern.permute.xlu0 %v1311_v41 }
  0xcc   : > { %468 = vperm.xlu1 %1198, %v354_v37   ;;  %484 = vperm.xlu0 %1200, %v354_v37   ;;  %v1215_v52 = vpop.eup %1214 }
  0xcd   : > { %v376_v55 = vmul.f32 0.6931472, %v1215_v52 }
  0xcf   : > { %v379_v57 = vadd.f32 %v376_v55, %v363_v54 }
  0xd1   : > { %1196 = vset.pattern.permute.xlu2 %v1312_v42  ;;  %v391_v61 = vmul.f32 %v1522_v58, %v379_v57  ;;  %v407_v62 = vmul.f32 %v1527_v59, %v379_v57  ;;  %v415_v5 = vmul.f32 %v1535_v2, %v379_v57  ;;  %v399_v7 = vmul.f32 %v1540_v4, %v379_v57 }
  0xd2   : > { %472 = vperm.xlu2 %1196, %v351_v36   ;;  %v381_v13 = vmul.f32 %v379_v57, %v1494_v28 }
  0xd3   : > { %v393_v0 = vmul.f32 1.442695, %v391_v61  ;;  %v409_v1 = vmul.f32 1.442695, %v407_v62  ;;  %v417_v9 = vmul.f32 1.442695, %v415_v5 }
  0xd4   : > { %1199 = vset.pattern.permute.xlu1 %v1312_v42  ;;  %1203 = vset.pattern.permute.xlu0 %v1313_v43  ;;  %v401_v12 = vmul.f32 1.442695, %v399_v7 }
  0xd5   : > { %476 = vperm.xlu1 %1199, %v354_v37   ;;  %1216 = vpow2.f32 %v393_v0 }
  0xd6   : > { %1218 = vpow2.f32 %v409_v1 }
  0xd7   : > { %1220 = vpow2.f32 %v371_v3 }
  0xd8   : > { %1222 = vpow2.f32 %v417_v9 }
  0xd9   : > { %1224 = vpow2.f32 %v401_v12 }
  0xda   : > { %1197 = vset.pattern.permute.xlu2 %v1311_v41 }
  0xdb   : > { %480 = vperm.xlu2 %1197, %v351_v36   ;;  %v1546_v8 = vpop.eup %1216 }
  0xdc   : > { %v1548_v10 = vpop.eup %1218  ;;  %v495_v20 = vmul.f32 0.0, %v1546_v8 }
  0xdd   : > { %1201 = vset.pattern.permute.xlu1 %v1313_v43  ;;  %v1221_v11 = vpop.eup %1220  ;;  %v497_v16 = vmul.f32 0.0, %v1548_v10 }
  0xde   : > { %488 = vperm.xlu1 %1201, %v351_v36   ;;  %v374_v17 = vadd.f32 1.0, %v1221_v11  ;;  %v1567_v26 = vpop.eup %1222 }
  0xdf   : > { %v1571_v31 = vpop.eup %1224 }
  0xe0   : > { %1226 = vlog2.f32 %v374_v17  ;;  %v496_v42 = vmul.f32 0.0, %v1571_v31 }
  0xe3   : > { %1202 = vset.pattern.permute.xlu2 %v1313_v43 }
  0xe4   : > { %492 = vperm.xlu2 %1202, %v354_v37   ;;  %v498_v37 = vmul.f32 0.0, %v1567_v26 }
  0xe6   : > { %v1227_v38 = vpop.eup %1226 }
  0xe7   : > { %v378_v49 = vmul.f32 0.6931472, %v1227_v38 }
  0xe9   : > { %v380_v56 = vadd.f32 %v378_v49, %v364_v48 }
  0xeb   : > { %v392_v5 = vmul.f32 %v1522_v58, %v380_v56  ;;  %v400_v11 = vmul.f32 %v1540_v4, %v380_v56  ;;  %v416_v17 = vmul.f32 %v1535_v2, %v380_v56 }
 0x111   : > { %v1543_v6 = vpop.permute.xlu2 %428 }
 0x11a   : > { %v1557_v21 = vpop.permute.xlu2 %438 }
 0x123   : > { %v445_v14 = vpop.permute.xlu1 %444  ;;  %v424_v15 = vpop.permute.xlu0 %423 }
 0x124   : > { %v1552_v18 = vmul.f32 %v445_v14, %v381_v13  ;;  %v1554_v19 = vmul.f32 %v424_v15, %v381_v13  ;;  %v1587_v43 = vpop.permute.xlu2 %458  ;;  %v1630_v14 = vld [vmem:[%s1983_s4] ss:$0 sm:$0xff]  ;;  %v408_v15 = vmul.f32 %v1527_v59, %v380_v56 }
 0x125   : > { %v1653_v38 = vmul.f32 %v1630_v14, %v1494_v28 }
 0x126   : > { %v1560_v22 = vadd.f32 %v497_v16, %v1552_v18  ;;  %v1563_v23 = vadd.f32 %v495_v20, %v1554_v19 }
 0x128   : > { %v517_v24 = vrot.slane %v1560_v22, 7  ;;  %v515_v25 = vrot.slane %v1563_v23, 7 }
 0x12a   : > { %v525_v27 = vmul.f32 %v1548_v10, %v517_v24  ;;  %v523_v30 = vmul.f32 %v1546_v8, %v515_v25  ;;  %v395_v24 = vmul.f32 1.442695, %v392_v5  ;;  %v382_v25 = vmul.f32 %v380_v56, %v1496_v29 }
 0x12c   : > { %v455_v32 = vpop.permute.xlu1 %454  ;;  %v1574_v33 = vadd.f32 %v525_v27, %v1552_v18  ;;  %v1577_v34 = vadd.f32 %v523_v30, %v1554_v19  ;;  %v435_v36 = vpop.permute.xlu0 %434  ;;  %1228 = vpow2.f32 %v395_v24 }
 0x12d   : > { %v1579_v35 = vmul.f32 %v455_v32, %v381_v13  ;;  %v1582_v39 = vmul.f32 %v435_v36, %v381_v13  ;;  %v1620_v7 = vpop.permute.xlu2 %472  ;;  %v403_v32 = vmul.f32 1.442695, %v400_v11 }
 0x12e   : > { %v545_v40 = vrot.slane %v1574_v33, 7  ;;  %v543_v41 = vrot.slane %v1577_v34, 7 }
 0x12f   : > { %v1590_v44 = vadd.f32 %v498_v37, %v1579_v35  ;;  %v1595_v47 = vadd.f32 %v496_v42, %v1582_v39  ;;  %1230 = vpow2.f32 %v403_v32 }
 0x130   : > { %v553_v45 = vmul.f32 %v1548_v10, %v545_v40  ;;  %v551_v46 = vmul.f32 %v1546_v8, %v543_v41  ;;  %v411_v40 = vmul.f32 1.442695, %v408_v15 }
 0x131   : > { %v518_v50 = vrot.slane %v1590_v44, 7  ;;  %v516_v53 = vrot.slane %v1595_v47, 7  ;;  %v504_v5 = vmul.f32 %v1595_v47, %v1620_v7 }
 0x132   : > { %v1600_v51 = vadd.f32 %v553_v45, %v1552_v18  ;;  %v1603_v52 = vadd.f32 %v551_v46, %v1554_v19  ;;  %v419_v45 = vmul.f32 1.442695, %v416_v17  ;;  %1232 = vpow2.f32 %v411_v40  ;;  %v1694_v17 = vpop.eup %1228 }
 0x133   : > { %v526_v54 = vmul.f32 %v1567_v26, %v518_v50  ;;  %v524_v60 = vmul.f32 %v1571_v31, %v516_v53  ;;  %v1663_v50 = vmul.f32 %v1543_v6, %v382_v25 }
 0x134   : > { %v573_v55 = vrot.slane %v1600_v51, 7  ;;  %v571_v57 = vrot.slane %v1603_v52, 7  ;;  %1234 = vpow2.f32 %v419_v45 }
 0x135   : > { %v1611_v61 = vadd.f32 %v526_v54, %v1579_v35  ;;  %v1613_v62 = vpop.permute.xlu1 %448  ;;  %v528_v1 = vadd.f32 %v524_v60, %v1582_v39  ;;  %v1643_v27 = vpop.permute.xlu0 %464  ;;  %v1668_v54 = vmul.f32 %v1557_v21, %v382_v25 }
 0x136   : > { %v579_v63 = vmul.f32 %v1546_v8, %v571_v57  ;;  %v581_v3 = vmul.f32 %v1548_v10, %v573_v55  ;;  %v503_v46 = vmul.f32 %v1563_v23, %v1643_v27  ;;  %v1674_v23 = vpop.permute.xlu2 %480  ;;  %v531_v6 = vmul.f32 %v1577_v34, %v1643_v27 }
 0x137   : > { %v546_v0 = vrot.slane %v1611_v61, 7  ;;  %v544_v12 = vrot.slane %v528_v1, 7  ;;  %v532_v47 = vmul.f32 %v528_v1, %v1620_v7 }
 0x138   : > { %v1623_v9 = vadd.f32 %v579_v63, %v1554_v19  ;;  %v1635_v58 = vadd.f32 %v581_v3, %v1552_v18  ;;  %v507_v63 = vadd.f32 %v503_v46, %v1653_v38  ;;  %v1683_v3 = vmul.f32 %v1587_v43, %v382_v25 }
 0x139   : > { %v554_v13 = vmul.f32 %v1567_v26, %v546_v0  ;;  %v552_v20 = vmul.f32 %v1571_v31, %v544_v12  ;;  %v505_v12 = vmul.f32 %v1560_v22, %v1674_v23  ;;  %v535_v43 = vadd.f32 %v531_v6, %v1653_v38 }
 0x13a   : > { %v599_v16 = vrot.slane %v1623_v9, 7  ;;  %v601_v30 = vrot.slane %v1635_v58, 7  ;;  %v533_v22 = vmul.f32 %v1574_v33, %v1674_v23  ;;  %v587_v1 = vmul.f32 %v1623_v9, %v1643_v27 }
 0x13b   : > { %v1640_v4 = vadd.f32 %v554_v13, %v1579_v35  ;;  %v556_v37 = vadd.f32 %v552_v20, %v1582_v39  ;;  %v559_v13 = vmul.f32 %v1603_v52, %v1643_v27  ;;  %v508_v52 = vadd.f32 %v507_v63, %v504_v5 }
 0x13c   : > { %v607_v59 = vmul.f32 %v1546_v8, %v599_v16  ;;  %v609_v41 = vmul.f32 %v1548_v10, %v601_v30  ;;  %v1719_v33 = vmul.f32 %v1613_v62, %v382_v25  ;;  %v589_v25 = vmul.f32 %v1635_v58, %v1674_v23 }
 0x13d   : > { %v574_v2 = vrot.slane %v1640_v4, 7  ;;  %v572_v48 = vrot.slane %v556_v37, 7  ;;  %v563_v6 = vadd.f32 %v559_v13, %v1653_v38 }
 0x13e   : > { %v1647_v36 = vpop.permute.xlu1 %468  ;;  %v1657_v42 = vadd.f32 %v607_v59, %v1554_v19  ;;  %v613_v28 = vadd.f32 %v609_v41, %v1552_v18  ;;  %v1701_v59 = vpop.eup %1230  ;;  %v561_v41 = vmul.f32 %v1600_v51, %v1674_v23  ;;  %v536_v51 = vadd.f32 %v535_v43, %v532_v47 }
 0x13f   : > { %v582_v49 = vmul.f32 %v1567_v26, %v574_v2  ;;  %v580_v55 = vmul.f32 %v1571_v31, %v572_v48  ;;  %v1709_v40 = vpop.eup %1232 }
 0x140   : > { %v627_v53 = vrot.slane %v1657_v42, 7  ;;  %v629_v60 = vrot.slane %v613_v28, 7  ;;  %v1716_v48 = vpop.eup %1234  ;;  %v617_v43 = vmul.f32 %v613_v28, %v1674_v23 }
 0x141   : > { %v1672_v57 = vadd.f32 %v582_v49, %v1579_v35  ;;  %v584_v21 = vadd.f32 %v580_v55, %v1582_v39  ;;  %v560_v49 = vmul.f32 %v556_v37, %v1620_v7  ;;  %v591_v37 = vadd.f32 %v587_v1, %v1653_v38 }
 0x142   : > { %v635_v56 = vmul.f32 %v1546_v8, %v627_v53  ;;  %v637_v11 = vmul.f32 %v1548_v10, %v629_v60 }
 0x143   : > { %v602_v0 = vrot.slane %v1672_v57, 7  ;;  %v600_v15 = vrot.slane %v584_v21, 7  ;;  %v588_v63 = vmul.f32 %v584_v21, %v1620_v7  ;;  %v564_v13 = vadd.f32 %v563_v6, %v560_v49 }
 0x144   : > { %v639_v34 = vadd.f32 %v635_v56, %v1554_v19  ;;  %v641_v24 = vadd.f32 %v637_v11, %v1552_v18  ;;  %v509_v56 = vadd.f32 %v508_v52, %v505_v12  ;;  %v537_v21 = vadd.f32 %v536_v51, %v533_v22 }
 0x145   : > { %v610_v16 = vmul.f32 %v1567_v26, %v602_v0  ;;  %v608_v32 = vmul.f32 %v1571_v31, %v600_v15  ;;  %v615_v15 = vmul.f32 %v1657_v42, %v1643_v27 }
 0x146   : > { %v655_v30 = vrot.slane %v639_v34, 7  ;;  %v657_v45 = vrot.slane %v641_v24, 7  ;;  %v643_v47 = vmul.f32 %v639_v34, %v1643_v27  ;;  %v565_v34 = vadd.f32 %v564_v13, %v561_v41 }
 0x147   : > { %v1697_v20 = vpop.permute.xlu1 %476  ;;  %v1707_v2 = vadd.f32 %v610_v16, %v1579_v35  ;;  %v612_v53 = vadd.f32 %v608_v32, %v1582_v39  ;;  %v645_v51 = vmul.f32 %v641_v24, %v1674_v23 }
 0x148   : > { %v663_v46 = vmul.f32 %v1546_v8, %v655_v30  ;;  %v665_v60 = vmul.f32 %v1548_v10, %v657_v45  ;;  %v592_v30 = vadd.f32 %v591_v37, %v588_v63 }
 0x149   : > { %v630_v55 = vrot.slane %v1707_v2, 7  ;;  %v628_v0 = vrot.slane %v612_v53, 7  ;;  %v616_v52 = vmul.f32 %v612_v53, %v1620_v7 }
 0x14a   : > { %v667_v9 = vadd.f32 %v663_v46, %v1554_v19  ;;  %v669_v5 = vadd.f32 %v665_v60, %v1552_v18  ;;  %v619_v46 = vadd.f32 %v615_v15, %v1653_v38  ;;  %v593_v63 = vadd.f32 %v592_v30, %v589_v25 }
 0x14b   : > { %v638_v62 = vmul.f32 %v1567_v26, %v630_v55  ;;  %v636_v16 = vmul.f32 %v1571_v31, %v628_v0 }
 0x14c   : > { %v683_v11 = vrot.slane %v667_v9, 7  ;;  %v685_v45 = vrot.slane %v669_v5, 7  ;;  %v671_v55 = vmul.f32 %v667_v9, %v1643_v27  ;;  %v620_v0 = vadd.f32 %v619_v46, %v616_v52 }
 0x14d   : > { %v642_v12 = vadd.f32 %v638_v62, %v1579_v35  ;;  %v640_v32 = vadd.f32 %v636_v16, %v1582_v39  ;;  %v673_v24 = vmul.f32 %v669_v5, %v1674_v23 }
 0x14e   : > { %v691_v28 = vmul.f32 %v1546_v8, %v683_v11  ;;  %v693_v9 = vmul.f32 %v1548_v10, %v685_v45  ;;  %v675_v11 = vadd.f32 %v671_v55, %v1653_v38  ;;  %v621_v5 = vadd.f32 %v620_v0, %v617_v43 }
 0x14f   : > { %v658_v1 = vrot.slane %v642_v12, 7  ;;  %v656_v49 = vrot.slane %v640_v32, 7  ;;  %v644_v6 = vmul.f32 %v640_v32, %v1620_v7 }
 0x150   : > { %v1739_v58 = vpop.permute.xlu1 %488  ;;  %v695_v62 = vadd.f32 %v691_v28, %v1554_v19  ;;  %v697_v15 = vadd.f32 %v693_v9, %v1552_v18 }
 0x151   : > { %v506_v42 = vmul.f32 %v1590_v44, %v1739_v58  ;;  %v534_v22 = vmul.f32 %v1611_v61, %v1739_v58  ;;  %v562_v53 = vmul.f32 %v1640_v4, %v1739_v58  ;;  %v647_v44 = vadd.f32 %v643_v47, %v1653_v38 }
 0x152   : > { %v664_v8 = vmul.f32 %v1571_v31, %v656_v49  ;;  %v666_v41 = vmul.f32 %v1567_v26, %v658_v1  ;;  %v711_v16 = vrot.slane %v695_v62, 7  ;;  %v590_v25 = vmul.f32 %v1672_v57, %v1739_v58 }
 0x153   : > { %v510_v61 = vadd.f32 %v509_v56, %v506_v42  ;;  %v538_v60 = vadd.f32 %v537_v21, %v534_v22  ;;  %v566_v56 = vadd.f32 %v565_v34, %v562_v53  ;;  %v648_v13 = vadd.f32 %v647_v44, %v644_v6 }
 0x154   : > { %v668_v4 = vadd.f32 %v664_v8, %v1582_v39  ;;  %v670_v37 = vadd.f32 %v666_v41, %v1579_v35  ;;  %v618_v47 = vmul.f32 %v1707_v2, %v1739_v58  ;;  %v713_v52 = vrot.slane %v697_v15, 7 }
 0x155   : > { %v932_v21 = vsel %vm931_vm0, %v510_v61, %v538_v60  ;;  %v699_v18 = vmul.f32 %v695_v62, %v1643_v27  ;;  %v719_v42 = vmul.f32 %v1694_v17, %v711_v16  ;;  %v649_v57 = vadd.f32 %v648_v13, %v645_v51 }
 0x156   : > { %v672_v10 = vmul.f32 %v668_v4, %v1620_v7  ;;  %v684_v19 = vrot.slane %v668_v4, 7  ;;  %v686_v30 = vrot.slane %v670_v37, 7  ;;  %v721_v45 = vmul.f32 %v1709_v40, %v713_v52 }
 0x157   : > { %v934_v28 = vsel %vm933_vm1, %v932_v21, %v566_v56  ;;  %v594_v2 = vadd.f32 %v593_v63, %v590_v25  ;;  %v646_v43 = vmul.f32 %v642_v12, %v1739_v58  ;;  %v723_v46 = vadd.f32 %v719_v42, %v1663_v50 }
 0x158   : > { %v676_v32 = vadd.f32 %v675_v11, %v672_v10  ;;  %v692_v1 = vmul.f32 %v1571_v31, %v684_v19  ;;  %v694_v22 = vmul.f32 %v1567_v26, %v686_v30  ;;  %v622_v31 = vadd.f32 %v621_v5, %v618_v47 }
 0x159   : > { %v1781_v55 = vadd.f32 %v721_v45, %v1719_v33  ;;  %v703_v53 = vadd.f32 %v699_v18, %v1653_v38  ;;  %v936_v51 = vsel %vm935_vm2, %v934_v28, %v594_v2  ;;  %v650_v44 = vadd.f32 %v649_v57, %v646_v43 }
 0x15a   : > { %v696_v34 = vadd.f32 %v692_v1, %v1582_v39  ;;  %v677_v49 = vadd.f32 %v676_v32, %v673_v24  ;;  %v698_v27 = vadd.f32 %v694_v22, %v1579_v35  ;;  %v674_v12 = vmul.f32 %v670_v37, %v1739_v58 }
 0x15b   : > { %v739_v61 = vrot.slane %v723_v46, 7  ;;  %v701_v60 = vmul.f32 %v697_v15, %v1674_v23  ;;  %v741_v41 = vrot.slane %v1781_v55, 7  ;;  %v938_v0 = vsel %vm937_vm3, %v936_v51, %v622_v31 }
 0x15c   : > { %v700_v26 = vmul.f32 %v696_v34, %v1620_v7  ;;  %v712_v6 = vrot.slane %v696_v34, 7  ;;  %v714_v39 = vrot.slane %v698_v27, 7  ;;  %v678_v63 = vadd.f32 %v677_v49, %v674_v12 }
 0x15d   : > { %v747_v38 = vmul.f32 %v1694_v17, %v739_v61  ;;  %v702_v9 = vmul.f32 %v698_v27, %v1739_v58  ;;  %v749_v37 = vmul.f32 %v1709_v40, %v741_v41  ;;  %v940_v15 = vsel %vm939_vm4, %v938_v0, %v650_v44 }
 0x15e   : > { %v704_v8 = vadd.f32 %v703_v53, %v700_v26  ;;  %v720_v35 = vmul.f32 %v1701_v59, %v712_v6  ;;  %v722_v7 = vmul.f32 %v1716_v48, %v714_v39  ;;  %v942_v58 = vsel %vm941_vm5, %v940_v15, %v678_v63 }
 0x15f   : > { %v751_v24 = vadd.f32 %v747_v38, %v1663_v50  ;;  %v753_v13 = vadd.f32 %v749_v37, %v1719_v33  ;;  %v1820_v49 = vmul.f32 %v1630_v14, %v1496_v29  ;;  %v727_v27 = vmul.f32 %v723_v46, %v1647_v36 }
 0x160   : > { %v705_v62 = vadd.f32 %v704_v8, %v701_v60  ;;  %v724_v4 = vadd.f32 %v720_v35, %v1668_v54  ;;  %v726_v23 = vadd.f32 %v722_v7, %v1683_v3  ;;  %v1837_v8 = vpop.permute.xlu0 %484 }
 0x161   : > { %v767_v25 = vrot.slane %v751_v24, 7  ;;  %v769_v19 = vrot.slane %v753_v13, 7  ;;  %v731_v14 = vadd.f32 %v727_v27, %v1820_v49 }
 0x162   : > { %v706_v11 = vadd.f32 %v705_v62, %v702_v9  ;;  %v740_v56 = vrot.slane %v724_v4, 7  ;;  %v742_v16 = vrot.slane %v726_v23, 7  ;;  %v728_v44 = vmul.f32 %v724_v4, %v1697_v20 }
 0x163   : > { %v775_v5 = vmul.f32 %v1694_v17, %v767_v25  ;;  %v777_v52 = vmul.f32 %v1709_v40, %v769_v19  ;;  %v729_v62 = vmul.f32 %v1781_v55, %v1837_v8 }
 0x164   : > { %v748_v10 = vmul.f32 %v1701_v59, %v740_v56  ;;  %v1803_v21 = vsel %vm943_vm6, %v942_v58, %v706_v11  ;;  %v750_v47 = vmul.f32 %v1716_v48, %v742_v16  ;;  %v732_v63 = vadd.f32 %v731_v14, %v728_v44  ;;  %v1854_v16 = vpop.permute.xlu2 %492 }
 0x165   : > { %952 = vadd.xlane.f32.xlu1 %v1803_v21  ;;  %v779_v1 = vadd.f32 %v775_v5, %v1663_v50  ;;  %v781_v42 = vadd.f32 %v777_v52, %v1719_v33  ;;  %v755_v11 = vmul.f32 %v751_v24, %v1647_v36  ;;  %v730_v19 = vmul.f32 %v726_v23, %v1854_v16 }
 0x166   : > { %v752_v30 = vadd.f32 %v748_v10, %v1668_v54  ;;  %v754_v32 = vadd.f32 %v750_v47, %v1683_v3  ;;  %v733_v25 = vadd.f32 %v732_v63, %v729_v62  ;;  %v757_v24 = vmul.f32 %v753_v13, %v1837_v8 }
 0x167   : > { %v795_v22 = vrot.slane %v779_v1, 7  ;;  %v797_v28 = vrot.slane %v781_v42, 7 }
 0x168   : > { %v768_v18 = vrot.slane %v752_v30, 7  ;;  %v770_v57 = vrot.slane %v754_v32, 7  ;;  %v756_v5 = vmul.f32 %v752_v30, %v1697_v20 }
 0x169   : > { %v803_v43 = vmul.f32 %v1694_v17, %v795_v22  ;;  %v805_v31 = vmul.f32 %v1709_v40, %v797_v28  ;;  %v783_v22 = vmul.f32 %v779_v1, %v1647_v36  ;;  %v1870_v28 = vadd.f32 %v733_v25, %v730_v19 }
 0x16a   : > { %v776_v45 = vmul.f32 %v1701_v59, %v768_v18  ;;  %v778_v2 = vmul.f32 %v1716_v48, %v770_v57  ;;  %v759_v57 = vadd.f32 %v755_v11, %v1820_v49  ;;  %v785_v1 = vmul.f32 %v781_v42, %v1837_v8 }
 0x16b   : > { %v807_v53 = vadd.f32 %v803_v43, %v1663_v50  ;;  %v1828_v51 = vadd.f32 %v805_v31, %v1719_v33 }
 0x16c   : > { %v780_v34 = vadd.f32 %v776_v45, %v1668_v54  ;;  %v1824_v26 = vadd.f32 %v778_v2, %v1683_v3  ;;  %v758_v2 = vmul.f32 %v754_v32, %v1854_v16  ;;  %v760_v44 = vadd.f32 %v759_v57, %v756_v5 }
 0x16d   : > { %v823_v39 = vrot.slane %v807_v53, 7  ;;  %v825_v29 = vrot.slane %v1828_v51, 7  ;;  %v811_v31 = vmul.f32 %v807_v53, %v1647_v36  ;;  %v813_v5 = vmul.f32 %v1828_v51, %v1837_v8 }
 0x16e   : > { %v796_v6 = vrot.slane %v780_v34, 7  ;;  %v798_v12 = vrot.slane %v1824_v26, 7  ;;  %v784_v13 = vmul.f32 %v780_v34, %v1697_v20 }
 0x16f   : > { %v831_v60 = vmul.f32 %v1694_v17, %v823_v39  ;;  %v833_v41 = vmul.f32 %v1709_v40, %v825_v29 }
 0x170   : > { %v804_v61 = vmul.f32 %v1701_v59, %v796_v6  ;;  %v806_v46 = vmul.f32 %v1716_v48, %v798_v12 }
 0x171   : > { %v835_v38 = vadd.f32 %v831_v60, %v1663_v50  ;;  %v1846_v9 = vadd.f32 %v833_v41, %v1719_v33  ;;  %v815_v41 = vadd.f32 %v811_v31, %v1820_v49 }
 0x172   : > { %v808_v35 = vadd.f32 %v804_v61, %v1668_v54  ;;  %v1842_v7 = vadd.f32 %v806_v46, %v1683_v3  ;;  %v787_v61 = vadd.f32 %v783_v22, %v1820_v49 }
 0x173   : > { %v851_v37 = vrot.slane %v835_v38, 7  ;;  %v853_v15 = vrot.slane %v1846_v9, 7  ;;  %v839_v53 = vmul.f32 %v835_v38, %v1647_v36  ;;  %v841_v51 = vmul.f32 %v1846_v9, %v1837_v8 }
 0x174   : > { %v824_v0 = vrot.slane %v808_v35, 7  ;;  %v826_v4 = vrot.slane %v1842_v7, 7  ;;  %v812_v32 = vmul.f32 %v808_v35, %v1697_v20  ;;  %v788_v60 = vadd.f32 %v787_v61, %v784_v13 }
 0x175   : > { %v859_v10 = vmul.f32 %v1694_v17, %v851_v37  ;;  %v861_v47 = vmul.f32 %v1709_v40, %v853_v15  ;;  %v843_v25 = vadd.f32 %v839_v53, %v1820_v49 }
 0x176   : > { %v832_v56 = vmul.f32 %v1701_v59, %v824_v0  ;;  %v834_v58 = vmul.f32 %v1716_v48, %v826_v4  ;;  %v816_v11 = vadd.f32 %v815_v41, %v812_v32  ;;  %v789_v31 = vadd.f32 %v788_v60, %v785_v1 }
 0x177   : > { %v863_v18 = vadd.f32 %v859_v10, %v1663_v50  ;;  %v865_v23 = vadd.f32 %v861_v47, %v1719_v33  ;;  %v761_v47 = vadd.f32 %v760_v44, %v757_v24 }
 0x178   : > { %v836_v55 = vadd.f32 %v832_v56, %v1668_v54  ;;  %v1864_v52 = vadd.f32 %v834_v58, %v1683_v3 }
 0x179   : > { %v879_v43 = vrot.slane %v863_v18, 7  ;;  %v881_v6 = vrot.slane %v865_v23, 7  ;;  %v867_v46 = vmul.f32 %v863_v18, %v1647_v36  ;;  %v762_v1 = vadd.f32 %v761_v47, %v758_v2 }
 0x17a   : > { %v852_v45 = vrot.slane %v836_v55, 7  ;;  %v854_v30 = vrot.slane %v1864_v52, 7  ;;  %v840_v35 = vmul.f32 %v836_v55, %v1697_v20  ;;  %v786_v55 = vmul.f32 %v1824_v26, %v1854_v16 }
 0x17b   : > { %v887_v39 = vmul.f32 %v1694_v17, %v879_v43  ;;  %v889_v34 = vmul.f32 %v1709_v40, %v881_v6  ;;  %v871_v58 = vadd.f32 %v867_v46, %v1820_v49  ;;  %v817_v26 = vadd.f32 %v816_v11, %v813_v5 }
 0x17c   : > { %v860_v27 = vmul.f32 %v1701_v59, %v852_v45  ;;  %v862_v12 = vmul.f32 %v1716_v48, %v854_v30  ;;  %v844_v57 = vadd.f32 %v843_v25, %v840_v35  ;;  %v869_v6 = vmul.f32 %v865_v23, %v1837_v8 }
 0x17d   : > { %v891_v42 = vadd.f32 %v887_v39, %v1663_v50  ;;  %v893_v0 = vadd.f32 %v889_v34, %v1719_v33  ;;  %v814_v39 = vmul.f32 %v1842_v7, %v1854_v16  ;;  %v790_v23 = vadd.f32 %v789_v31, %v786_v55  ;;  %v1210_v31 = vld [vmem:[%s1984_s5] ss:$0 sm:$0xff] }
 0x17e   : > { %v864_v29 = vadd.f32 %v860_v27, %v1668_v54  ;;  %v866_v14 = vadd.f32 %v862_v12, %v1683_v3  ;;  %v845_v61 = vadd.f32 %v844_v57, %v841_v51 }
 0x17f   : > { %v907_v37 = vrot.slane %v891_v42, 7  ;;  %v895_v56 = vmul.f32 %v891_v42, %v1647_v36  ;;  %v909_v15 = vrot.slane %v893_v0, 7  ;;  %v897_v32 = vmul.f32 %v893_v0, %v1837_v8 }
 0x180   : > { %v880_v63 = vrot.slane %v864_v29, 7  ;;  %v868_v62 = vmul.f32 %v864_v29, %v1697_v20  ;;  %v882_v4 = vrot.slane %v866_v14, 7  ;;  %v818_v53 = vadd.f32 %v817_v26, %v814_v39 }
 0x181   : > { %v915_v19 = vmul.f32 %v1694_v17, %v907_v37  ;;  %v899_v13 = vadd.f32 %v895_v56, %v1820_v49  ;;  %v917_v24 = vmul.f32 %v1709_v40, %v909_v15  ;;  %v870_v46 = vmul.f32 %v866_v14, %v1854_v16 }
 0x182   : > { %v888_v38 = vmul.f32 %v1701_v59, %v880_v63  ;;  %v890_v10 = vmul.f32 %v1716_v48, %v882_v4  ;;  %v872_v22 = vadd.f32 %v871_v58, %v868_v62  ;;  %v945_v63 = vsel %vm931_vm0, %v1870_v28, %v762_v1 }
 0x183   : > { %v919_v30 = vadd.f32 %v915_v19, %v1663_v50  ;;  %v921_v34 = vadd.f32 %v917_v24, %v1719_v33  ;;  %v946_v0 = vsel %vm933_vm1, %v945_v63, %v790_v23  ;;  %v1314_v37 = vmov 128.0  }
 0x184   : > { %v892_v18 = vadd.f32 %v888_v38, %v1668_v54  ;;  %v894_v45 = vadd.f32 %v890_v10, %v1683_v3  ;;  %v873_v29 = vadd.f32 %v872_v22, %v869_v6  ;;  %1236 = vrcp.f32 %v1314_v37 }
 0x185   : > { %v923_v50 = vmul.f32 %v919_v30, %v1647_v36  ;;  %v925_v33 = vmul.f32 %v921_v34, %v1837_v8 }
 0x186   : > { %v896_v43 = vmul.f32 %v892_v18, %v1697_v20  ;;  %v908_v17 = vrot.slane %v892_v18, 7  ;;  %v910_v27 = vrot.slane %v894_v45, 7  ;;  %v898_v60 = vmul.f32 %v894_v45, %v1854_v16 }
 0x188   : > { %v900_v44 = vadd.f32 %v899_v13, %v896_v43  ;;  %v916_v12 = vmul.f32 %v1701_v59, %v908_v17  ;;  %v918_v40 = vmul.f32 %v1716_v48, %v910_v27  ;;  %v842_v59 = vmul.f32 %v1864_v52, %v1854_v16  ;;  %v1211_v27 = vld [vmem:[%s1985_s6] ss:$0 sm:$0xff] }
 0x189   : > { %v927_v48 = vadd.f32 %v923_v50, %v1820_v49 }
 0x18a   : > { %v920_v9 = vadd.f32 %v916_v12, %v1668_v54  ;;  %v901_v36 = vadd.f32 %v900_v44, %v897_v32  ;;  %v922_v7 = vadd.f32 %v918_v40, %v1683_v3  ;;  %v846_v2 = vadd.f32 %v845_v61, %v842_v59  ;;  %v1237_v28 = vpop.eup %1236 }
 0x18b   : > { %v874_v54 = vadd.f32 %v873_v29, %v870_v46  ;;  %v957_v11 = vmul.f32 128.0, %v1237_v28  ;;  %vm961_vm7 = vweird.f32 %v1237_v28 }
 0x18c   : > { %v924_v42 = vmul.f32 %v920_v9, %v1697_v20  ;;  %v902_v52 = vadd.f32 %v901_v36, %v898_v60  ;;  %v926_v14 = vmul.f32 %v922_v7, %v1854_v16  ;;  %v947_v20 = vsel %vm935_vm2, %v946_v0, %v818_v53 }
 0x18d   : > { %v948_v49 = vsel %vm937_vm3, %v947_v20, %v846_v2  ;;  %v958_v38 = vsub.f32 1.0, %v957_v11 }
 0x18e   : > { %v928_v41 = vadd.f32 %v927_v48, %v924_v42  ;;  %v949_v62 = vsel %vm939_vm4, %v948_v49, %v874_v54 }
 0x18f   : > { %v950_v4 = vsel %vm941_vm5, %v949_v62, %v902_v52  ;;  %v959_v56 = vmul.f32 %v1237_v28, %v958_v38 }
 0x190   : > { %v929_v3 = vadd.f32 %v928_v41, %v925_v33 }
 0x191   : > { %v960_v16 = vadd.f32 %v1237_v28, %v959_v56 }
 0x192   : > { %v930_v35 = vadd.f32 %v929_v3, %v926_v14 }
 0x193   : > { %v962_v15 = vsel %vm961_vm7, %v1237_v28, %v960_v16 }
 0x194   : > { %v951_v8 = vsel %vm943_vm6, %v950_v4, %v930_v35 }
 0x195   : > { %954 = vadd.xlane.f32.xlu2 %v951_v8 }
 0x1d8   : > { %v953_v25 = vpop.xlane.xlu1 %952 }
 0x1d9   : > { %v963_v58 = vmul.f32 %v962_v15, %v953_v25 }
 0x1db   : > { %v965_v10 = vsub.f32 %v1803_v21, %v963_v58 }
 0x1dd   : > { %v967_v19 = vmul.f32 %v965_v10, %v965_v10 }
 0x1df   : > { %969 = vadd.xlane.f32.xlu0 %v967_v19 }
 0x208   : > { %v955_v47 = vpop.xlane.xlu2 %954 }
 0x209   : > { %v964_v55 = vmul.f32 %v962_v15, %v955_v47 }
 0x20b   : > { %v966_v5 = vsub.f32 %v951_v8, %v964_v55 }
 0x20d   : > { %v968_v18 = vmul.f32 %v966_v5, %v966_v5 }
 0x20f   : > { %971 = vadd.xlane.f32.xlu2 %v968_v18 }
 0x252   : > { %v970_v57 = vpop.xlane.xlu0 %969 }
 0x253   : > { %v973_v22 = vmul.f32 %v970_v57, %v962_v15 }
 0x255   : > { %v975_v45 = vadd.f32 1e-05, %v973_v22 }
 0x257   : > { %1238 = vrsqrt.f32 %v975_v45  ;;  %vm983_vm9 = vweird.f32 %v975_v45 }
 0x25d   : > { %v1239_v30 = vpop.eup %1238 }
 0x25e   : > { %v978_v43 = vmul.f32 %v1239_v30, %v975_v45  ;;  %vm984_vm8 = vweird.f32 %v1239_v30 }
 0x25f   : > { %vm985_vm10 = vmor %vm983_vm9, %vm984_vm8 }
 0x260   : > { %v979_v13 = vmul.f32 %v1239_v30, %v978_v43 }
 0x262   : > { %v980_v17 = vmul.f32 0.5, %v979_v13 }
 0x264   : > { %v981_v24 = vsub.f32 1.5, %v980_v17 }
 0x266   : > { %v982_v21 = vmul.f32 %v1239_v30, %v981_v24 }
 0x268   : > { %v986_v26 = vsel %vm985_vm10, %v1239_v30, %v982_v21 }
 0x269   : > { %v997_v51 = vmul.f32 %v986_v26, %v965_v10 }
 0x26b   : > { %v1003_v6 = vmul.f32 %v1210_v31, %v997_v51 }
 0x26d   : > { %v1009_v44 = vadd.f32 %v1211_v27, %v1003_v6 }
 0x26f   : > { %1011 = vst [vmem:[%s271_s17] sm:$0xff] %v1009_v44 }
 0x282   : > { %v972_v12 = vpop.xlane.xlu2 %971 }
 0x283   : > { %v974_v50 = vmul.f32 %v972_v12, %v962_v15 }
 0x285   : > { %v976_v39 = vadd.f32 1e-05, %v974_v50 }
 0x287   : > { %1240 = vrsqrt.f32 %v976_v39  ;;  %vm993_vm12 = vweird.f32 %v976_v39 }
 0x28d   : > { %v1241_v61 = vpop.eup %1240 }
 0x28e   : > { %v988_v32 = vmul.f32 %v1241_v61, %v976_v39  ;;  %vm994_vm11 = vweird.f32 %v1241_v61 }
 0x28f   : > { %vm995_vm13 = vmor %vm993_vm12, %vm994_vm11 }
 0x290   : > { %v989_v40 = vmul.f32 %v1241_v61, %v988_v32 }
 0x292   : > { %v990_v1 = vmul.f32 0.5, %v989_v40 }
 0x294   : > { %v991_v29 = vsub.f32 1.5, %v990_v1 }
 0x296   : > { %v992_v9 = vmul.f32 %v1241_v61, %v991_v29 }
 0x298   : > { %v996_v34 = vsel %vm995_vm13, %v1241_v61, %v992_v9 }
 0x299   : > { %v998_v23 = vmul.f32 %v996_v34, %v966_v5 }
 0x29b   : > { %v1004_v53 = vmul.f32 %v1210_v31, %v998_v23 }
 0x29d   : > { %v1010_v59 = vadd.f32 %v1211_v27, %v1004_v53 }
 0x29f   : > { %1012 = vst [vmem:[%s271_s17 + $0x8] sm:$0xff] %v1010_v59 }
 0x2a0   : > { %1269 = shalt.err (!%p1266_p3)
}
 0x2a1   : > { %s1315_s8 = smov 128   ;;  %s1316_s17 = smov 8  }
 0x2a2   : > { %1137 = dma.vmem_to_hbm [thread:$0]  (%p1395_p5), %s1027_s22, 256, %s1029_s23, %s1014_s28, %s1315_s8, %s1315_s8, %s1316_s17  }
 0x2a3 PF: > { %p1143_p4 = scmp.ge.s32.totalorder %s1304_s27, 2  ;;  %s1043_s16 = sand.u32 1, %s1292_s24  }
 0x2a4   : > { %s1044_s19 = scalar_lea.sflag [#allocation3], %s1043_s16 }
 0x2a5   : > { %p1140_p7 = pnand %p1143_p4, %p1399_p6 }
 0x2a7   : > { %p1141_p8 = pneg %p1140_p7 }
 0x2a9   : > { %1287 = dma.done.wait (%p1141_p8), %s1044_s19, 256  }
 0x2aa   : > { %1289 = vsyncadd (%p1141_p8), %s1044_s19, 4294967040  ;;  %p17_p9 = scmp.ge.s32.totalorder %s1382_s30, 4   ;;  %s1989_s24 = smov %s1296_s25 }
 0x2ab   : > { %s1990_s25 = smov %s1300_s26  ;;  %s1991_s26 = smov %s1393_s10 }
 0x2ac   : > { %s1992_s27 = smov %s1382_s30  ;;  %19 = sbr.rel (!%p17_p9) target bundleno = 3 (0x3), region = 83 }
 0x2b1   :  { %1050 = vsyncpa [#allocation3], 1 }
 0x2b2   :  { %1052 = vsyncpa [#allocation3 + $0x1], 1 }

// kernel: tpu_custom_call.1
= control target key start
LH: loop header
LB: loop body
LE: loop exit
PB: predicated region body
PF: predicated region fallthrough
CT: control target
= control target key end

     0   :  { %12 = vsyncpa [#allocation3], 0  ;;  %s1979_s0 = inlined_call_operand.vmem [shape: f32[2,16,128], index: 0, kind: input, shape index: {}]   ;;  %s1980_s1 = inlined_call_operand.vmem [shape: f32[128,136], index: 1, kind: input, shape index: {}]   ;;  %s1981_s2 = inlined_call_operand.vmem [shape: f32[1,128], index: 2, kind: input, shape index: {}]   ;;  %s1982_s3 = inlined_call_operand.vmem [shape: f32[4,128], index: 3, kind: input, shape index: {}]   ;;  %s1983_s4 = inlined_call_operand.vmem [shape: f32[1,128], index: 4, kind: input, shape index: {}]   ;;  %s1984_s5 = inlined_call_operand.vmem [shape: f32[1,128], index: 5, kind: input, shape index: {}]   ;;  %s1985_s6 = inlined_call_operand.vmem [shape: f32[1,128], index: 6, kind: input, shape index: {}]   ;;  %s1986_s7 = inlined_call_operand.hbm [shape: f32[2,16,128], index: 7, kind: output, shape index: {}]  }
   0x1   :  { %14 = vsyncpa [#allocation3 + $0x1], 0  ;;  %s1357_s24 = smov 0   ;;  %s1359_s25 = smov 0  }
   0x2   :  { %s1361_s26 = smov 0   ;;  %s1363_s27 = smov 0  }
   0x3 LB: > { %s1378_s28 = sadd.s32 4294967295, %s1304_s27   ;;  %s1091_s29 = sadd.s32 4294967294, %s1304_s27   ;;  %s1304_s27 = sphi %s1363_s27, %s1992_s27   ;;  %s1300_s26 = sphi %s1361_s26, %s1991_s26   ;;  %s1296_s25 = sphi %s1359_s25, %s1990_s25   ;;  %s1292_s24 = sphi %s1357_s24, %s1989_s24  }
   0x4   : > { %s1382_s30 = sadd.s32 1, %s1304_s27   ;;  %s179_s8 = sadd.s32 1, %s1300_s26 }
   0x5   : > { %s176_s9 = ssub.s32 %s1304_s27, %s1382_s30  ;;  %p189_p0 = scmp.ne.s32.totalorder %s1300_s26, %s1296_s25 }
   0x6   : > { %p177_p1 = scmp.eq.s32.totalorder %s176_s9, 0  ;;  %p190_p2 = scmp.eq.s32.totalorder %s1378_s28, 1 }
   0x7   : > { %p195_p3 = scmp.ne.s32.totalorder %s1296_s25, %s1292_s24  ;;  %p196_p4 = scmp.eq.s32.totalorder %s1091_s29, 1 }
   0x8   : > { %s1393_s10 = scalar_select %p177_p1, %s1300_s26, %s179_s8  }
   0x9   : > { %p1395_p5 = por %p190_p2, %p189_p0  ;;  %p1399_p6 = por %p196_p4, %p195_p3 }
   0xa   : > { %p1094_p7 = scmp.ge.s32.totalorder %s1304_s27, 1  ;;  %p240_p8 = scmp.lt.s32.totalorder %s1304_s27, 3 }
   0xc   : > { %p241_p9 = pnand %p1094_p7, %p240_p8 }
   0xd   : > { %p272_p10 = scmp.lt.s32.totalorder (!%p241_p9), %s1378_s28, 1  ;;  %s269_s8 = sand.u32 (!%p241_p9), 1, %s1296_s25  }
   0xe   : > { %244 = sbr.rel (%p241_p9) target bundleno = 675 (0x2a3), region = 48  ;;  %s1104_s18 = sshll.u32 (!%p241_p9), %s1378_s28, 4 }
   0xf   : > { %s1025_s20 = scalar_lea.hbm (!%p241_p9), %s1986_s7, %s1104_s18  ;;  %s1262_s14 = scalar_lea.hbm (!%p241_p9), %s1986_s7, 32 }
  0x10   : > { %s1028_s23 = sshll.u32 (!%p241_p9), %s1025_s20, 4  ;;  %s1029_s23 = int_to_ptr.hbm [resolvable:$true] %s1028_s23 }
  0x11   : > { %s1256_s29 = sshra.s32 (!%p241_p9), %s1029_s23, 4  ;;  %s1257_s29 = int_to_ptr.hbm [resolvable:$true] %s1256_s29 }
  0x12   : > { %p1263_p0 = scmp.lt.s32.totalorder (!%p241_p9), %s1257_s29, %s1986_s7 }
  0x13   : > { %v310_v0 = vld [vmem:[%s1980_s1 + $0xf8] sm:$0xff]  ;;  %v308_v1 = vld [vmem:[%s1980_s1 + $0xe8] sm:$0xff]  ;;  %v309_v5 = vld [vmem:[%s1980_s1 + $0xf0] sm:$0xff]  ;;  %s273_s21 = scalar_select %p272_p10, %s1378_s28, 1  ;;  %v1306_v33 = vmov 2   ;;  %v1307_v34 = vmov 0  }
  0x14   : > { %334 = vmatpush.msra.mxu1 %v310_v0  ;;  %1121 = vmatpush.msra.mxu3 %v310_v0  ;;  %v306_v2 = vld [vmem:[%s1980_s1 + $0xd8] sm:$0xff]  ;;  %v304_v3 = vld [vmem:[%s1980_s1 + $0xc8] sm:$0xff]  ;;  %v307_v6 = vld [vmem:[%s1980_s1 + $0xe0] sm:$0xff]  ;;  %v1308_v38 = vmov 3   ;;  %v1309_v39 = vmov 1   ;;  %v1310_v40 = vmov 4  }
  0x15   : > { %v302_v4 = vld [vmem:[%s1980_s1 + $0xb8] sm:$0xff]  ;;  %v300_v7 = vld [vmem:[%s1980_s1 + $0xa8] sm:$0xff]  ;;  %311 = vmatpush.msra.mxu0 %v309_v5  ;;  %1105 = vmatpush.msra.mxu2 %v309_v5  ;;  %v305_v8 = vld [vmem:[%s1980_s1 + $0xd0] sm:$0xff]  ;;  %s1103_s16 = sshll.u32 %s273_s21, 4  ;;  %v1311_v41 = vmov 6   ;;  %v1312_v42 = vmov 5  }
  0x16   : > { %335 = vmatpush.msra.mxu1 %v308_v1  ;;  %1122 = vmatpush.msra.mxu3 %v308_v1  ;;  %v298_v9 = vld [vmem:[%s1980_s1 + $0x98] sm:$0xff]  ;;  %v296_v10 = vld [vmem:[%s1980_s1 + $0x88] sm:$0xff]  ;;  %v303_v11 = vld [vmem:[%s1980_s1 + $0xc0] sm:$0xff]  ;;  %s276_s13 = scalar_lea.vmem %s1979_s0, %s1103_s16  ;;  %v1313_v43 = vmov 7   ;;  %vm931_vm0 = vcmask 1040384   ;;  %vm933_vm1 = vcmask 1041408  }
  0x17   : > { %312 = vmatpush.msra.mxu0 %v307_v6  ;;  %1106 = vmatpush.msra.mxu2 %v307_v6  ;;  %v301_v12 = vld [vmem:[%s1980_s1 + $0xb0] sm:$0xff]  ;;  %v294_v13 = vld [vmem:[%s1980_s1 + $0x78] sm:$0xff]  ;;  %v299_v14 = vld [vmem:[%s1980_s1 + $0xa0] sm:$0xff]  ;;  %vm935_vm2 = vcmask 1042432   ;;  %vm937_vm3 = vcmask 1043456   ;;  %vm939_vm4 = vcmask 1044480  }
  0x18   : > { %336 = vmatpush.msra.mxu1 %v306_v2  ;;  %1123 = vmatpush.msra.mxu3 %v306_v2  ;;  %v292_v15 = vld [vmem:[%s1980_s1 + $0x68] sm:$0xff]  ;;  %v297_v16 = vld [vmem:[%s1980_s1 + $0x90] sm:$0xff]  ;;  %v290_v17 = vld [vmem:[%s1980_s1 + $0x58] sm:$0xff]  ;;  %vm941_vm5 = vcmask 1045504   ;;  %vm943_vm6 = vcmask 1046528   ;;  %s1014_s28 = scalar_lea.sflag [#allocation3], %s269_s8 }
  0x19   : > { %313 = vmatpush.msra.mxu0 %v305_v8  ;;  %1107 = vmatpush.msra.mxu2 %v305_v8  ;;  %v295_v18 = vld [vmem:[%s1980_s1 + $0x80] sm:$0xff]  ;;  %v288_v19 = vld [vmem:[%s1980_s1 + $0x48] sm:$0xff]  ;;  %v293_v20 = vld [vmem:[%s1980_s1 + $0x70] sm:$0xff]  ;;  %s1258_s21 = scalar_lea.hbm %s1257_s29, 16 }
  0x1a   : > { %337 = vmatpush.msra.mxu1 %v304_v3  ;;  %1124 = vmatpush.msra.mxu3 %v304_v3  ;;  %v286_v21 = vld [vmem:[%s1980_s1 + $0x38] sm:$0xff]  ;;  %v291_v22 = vld [vmem:[%s1980_s1 + $0x60] sm:$0xff]  ;;  %v284_v23 = vld [vmem:[%s1980_s1 + $0x28] sm:$0xff]  ;;  %p1259_p11 = scmp.ne.s32.totalorder %s1257_s29, %s1258_s21  ;;  %p1264_p1 = scmp.lt.s32.totalorder %s1262_s14, %s1258_s21 }
  0x1b   : > { %314 = vmatpush.msra.mxu0 %v303_v11  ;;  %1108 = vmatpush.msra.mxu2 %v303_v11  ;;  %v289_v24 = vld [vmem:[%s1980_s1 + $0x50] sm:$0xff]  ;;  %v282_v25 = vld [vmem:[%s1980_s1 + $0x18] sm:$0xff]  ;;  %v287_v26 = vld [vmem:[%s1980_s1 + $0x40] sm:$0xff] }
  0x1c   : > { %338 = vmatpush.msra.mxu1 %v302_v4  ;;  %1125 = vmatpush.msra.mxu3 %v302_v4  ;;  %v280_v27 = vld [vmem:[%s1980_s1 + $0x8] sm:$0xff]  ;;  %v1494_v28 = vld [vmem:[%s276_s13] sm:$0xff]  ;;  %v285_v30 = vld [vmem:[%s1980_s1 + $0x30] sm:$0xff]  ;;  %p1260_p12 = pnand %p1259_p11, %p1395_p5  ;;  %p1265_p2 = por %p1264_p1, %p1263_p0 }
  0x1d   : > { %315 = vmatpush.msra.mxu0 %v301_v12  ;;  %1109 = vmatpush.msra.mxu2 %v301_v12  ;;  %v1496_v29 = vld [vmem:[%s276_s13 + $0x8] sm:$0xff]  ;;  %v283_v31 = vld [vmem:[%s1980_s1 + $0x20] sm:$0xff]  ;;  %v281_v32 = vld [vmem:[%s1980_s1 + $0x10] sm:$0xff]  ;;  %s1095_s13 = sshll.u32 %s269_s8, 4 }
  0x1e   : > { %339 = vmatpush.msra.mxu1 %v300_v7  ;;  %1126 = vmatpush.msra.mxu3 %v300_v7  ;;  %v279_v35 = vld [vmem:[%s1980_s1] sm:$0xff]  ;;  %s271_s17 = scalar_lea.vmem [#allocation2], %s1095_s13  ;;  %p1261_p13 = pneg %p1260_p12 }
  0x1f   : > { %316 = vmatpush.msra.mxu0 %v299_v14  ;;  %1110 = vmatpush.msra.mxu2 %v299_v14  ;;  %v1205_v44 = vld [vmem:[%s1981_s2] ss:$0 sm:$0xff]  ;;  %v1527_v59 = vld [vmem:[%s1982_s3 + $0x2] ss:$0 sm:$0xff]  ;;  %v1535_v2 = vld [vmem:[%s1982_s3 + $0x3] ss:$0 sm:$0xff] }
  0x20   : > { %340 = vmatpush.msra.mxu1 %v298_v9  ;;  %1127 = vmatpush.msra.mxu3 %v298_v9  ;;  %v1522_v58 = vld [vmem:[%s1982_s3] ss:$0 sm:$0xff]  ;;  %v1540_v4 = vld [vmem:[%s1982_s3 + $0x1] ss:$0 sm:$0xff]  ;;  %s1026_s22 = sshll.u32 %s271_s17, 4  ;;  %p1266_p3 = pnand %p1265_p2, %p1261_p13  ;;  %s1027_s22 = int_to_ptr.vmem [resolvable:$true] %s1026_s22 }
  0x21   : > { %317 = vmatpush.msra.mxu0 %v297_v16  ;;  %1111 = vmatpush.msra.mxu2 %v297_v16 }
  0x22   : > { %341 = vmatpush.msra.mxu1 %v296_v10  ;;  %1128 = vmatpush.msra.mxu3 %v296_v10 }
  0x23   : > { %318 = vmatpush.msra.mxu0 %v295_v18  ;;  %1112 = vmatpush.msra.mxu2 %v295_v18 }
  0x24   : > { %342 = vmatpush.msra.mxu1 %v294_v13  ;;  %1129 = vmatpush.msra.mxu3 %v294_v13 }
  0x25   : > { %319 = vmatpush.msra.mxu0 %v293_v20  ;;  %1113 = vmatpush.msra.mxu2 %v293_v20 }
  0x26   : > { %343 = vmatpush.msra.mxu1 %v292_v15  ;;  %1130 = vmatpush.msra.mxu3 %v292_v15 }
  0x27   : > { %320 = vmatpush.msra.mxu0 %v291_v22  ;;  %1114 = vmatpush.msra.mxu2 %v291_v22 }
  0x28   : > { %344 = vmatpush.msra.mxu1 %v290_v17  ;;  %1131 = vmatpush.msra.mxu3 %v290_v17 }
  0x29   : > { %321 = vmatpush.msra.mxu0 %v289_v24  ;;  %1115 = vmatpush.msra.mxu2 %v289_v24 }
  0x2a   : > { %345 = vmatpush.msra.mxu1 %v288_v19  ;;  %1132 = vmatpush.msra.mxu3 %v288_v19 }
  0x2b   : > { %322 = vmatpush.msra.mxu0 %v287_v26  ;;  %1116 = vmatpush.msra.mxu2 %v287_v26 }
  0x2c   : > { %346 = vmatpush.msra.mxu1 %v286_v21  ;;  %1133 = vmatpush.msra.mxu3 %v286_v21 }
  0x2d   : > { %323 = vmatpush.msra.mxu0 %v285_v30  ;;  %1117 = vmatpush.msra.mxu2 %v285_v30 }
  0x2e   : > { %347 = vmatpush.msra.mxu1 %v284_v23  ;;  %1134 = vmatpush.msra.mxu3 %v284_v23 }
  0x2f   : > { %1189 = vset.pattern.permute.xlu1 %v1306_v33  ;;  %1187 = vset.pattern.permute.xlu0 %v1307_v34 }
  0x30   : > { %348 = vmatpush.msra.mxu1 %v282_v25  ;;  %1135 = vmatpush.msra.mxu3 %v282_v25 }
  0x31   : > { %324 = vmatpush.msra.mxu0 %v283_v31  ;;  %1118 = vmatpush.msra.mxu2 %v283_v31 }
  0x32   : > { %349 = vmatpush.msra.mxu1 %v280_v27  ;;  %1136 = vmatpush.msra.mxu3 %v280_v27 }
  0x33   : > { %350 = vmatmul.f32.vlgmr.msra.gmra.mxu1 %v1494_v28  ;;  %353 = vmatmul.f32.vlgmr.msra.gmra.mxu3 %v1496_v29 }
  0x34   : > { %1191 = vset.pattern.permute.xlu2 %v1307_v34  ;;  %325 = vmatpush.msra.mxu0 %v281_v32 }
  0x35   : > { %1119 = vmatpush.msra.mxu2 %v281_v32 }
  0x36   : > { %326 = vmatpush.msra.mxu0 %v279_v35 }
  0x37   : > { %1120 = vmatpush.msra.mxu2 %v279_v35  ;;  %327 = vmatmul.f32.vlgmr.msra.gmra.mxu0 %v1494_v28 }
  0x38   : > { %330 = vmatmul.f32.vlgmr.msra.gmra.mxu2 %v1496_v29 }
  0xb0   : > { %v351_v36 = vpop.f32.mrf.mxu1 }
  0xb1   : > { %444 = vperm.xlu1 %1189, %v351_v36   ;;  %423 = vperm.xlu0 %1187, %v351_v36  }
  0xb4   : > { %v328_v45 = vpop.f32.mrf.mxu0 }
  0xb5   : > { %v361_v46 = vadd.f32 %v1205_v44, %v328_v45 }
  0xb6   : > { %v354_v37 = vpop.f32.mrf.mxu3 }
  0xb7   : > { %428 = vperm.xlu2 %1191, %v354_v37   ;;  %v365_v47 = vand.u32 2147483647, %v361_v46  ;;  %v363_v54 = vmax.f32 %v361_v46, 0.0 }
  0xb9   : > { %1190 = vset.pattern.permute.xlu1 %v1308_v38  ;;  %1188 = vset.pattern.permute.xlu0 %v1309_v39  ;;  %v367_v48 = vsub.f32 0.0, %v365_v47 }
  0xba   : > { %454 = vperm.xlu1 %1190, %v351_v36   ;;  %434 = vperm.xlu0 %1188, %v351_v36  }
  0xbb   : > { %v369_v49 = vmul.f32 1.442695, %v367_v48  ;;  %v331_v53 = vpop.f32.mrf.mxu2 }
  0xbc   : > { %v1517_v56 = vadd.f32 %v1205_v44, %v331_v53 }
  0xbd   : > { %1212 = vpow2.f32 %v369_v49 }
  0xbe   : > { %v366_v60 = vand.u32 2147483647, %v1517_v56  ;;  %v364_v48 = vmax.f32 %v1517_v56, 0.0 }
  0xbf   : > { %1192 = vset.pattern.permute.xlu2 %v1309_v39 }
  0xc0   : > { %438 = vperm.xlu2 %1192, %v354_v37   ;;  %v368_v63 = vsub.f32 0.0, %v366_v60 }
  0xc2   : > { %1193 = vset.pattern.permute.xlu1 %v1306_v33  ;;  %1195 = vset.pattern.permute.xlu0 %v1310_v40  ;;  %v371_v3 = vmul.f32 1.442695, %v368_v63 }
  0xc3   : > { %448 = vperm.xlu1 %1193, %v354_v37   ;;  %464 = vperm.xlu0 %1195, %v351_v36   ;;  %v1213_v50 = vpop.eup %1212 }
  0xc4   : > { %v373_v51 = vadd.f32 1.0, %v1213_v50 }
  0xc6   : > { %1214 = vlog2.f32 %v373_v51 }
  0xc8   : > { %1194 = vset.pattern.permute.xlu2 %v1308_v38 }
  0xc9   : > { %458 = vperm.xlu2 %1194, %v354_v37  }
  0xcb   : > { %1198 = vset.pattern.permute.xlu1 %v1310_v40  ;;  %1200 = vset.pattern.permute.xlu0 %v1311_v41 }
  0xcc   : > { %468 = vperm.xlu1 %1198, %v354_v37   ;;  %484 = vperm.xlu0 %1200, %v354_v37   ;;  %v1215_v52 = vpop.eup %1214 }
  0xcd   : > { %v376_v55 = vmul.f32 0.6931472, %v1215_v52 }
  0xcf   : > { %v379_v57 = vadd.f32 %v376_v55, %v363_v54 }
  0xd1   : > { %1196 = vset.pattern.permute.xlu2 %v1312_v42  ;;  %v391_v61 = vmul.f32 %v1522_v58, %v379_v57  ;;  %v407_v62 = vmul.f32 %v1527_v59, %v379_v57  ;;  %v415_v5 = vmul.f32 %v1535_v2, %v379_v57  ;;  %v399_v7 = vmul.f32 %v1540_v4, %v379_v57 }
  0xd2   : > { %472 = vperm.xlu2 %1196, %v351_v36   ;;  %v381_v13 = vmul.f32 %v379_v57, %v1494_v28 }
  0xd3   : > { %v393_v0 = vmul.f32 1.442695, %v391_v61  ;;  %v409_v1 = vmul.f32 1.442695, %v407_v62  ;;  %v417_v9 = vmul.f32 1.442695, %v415_v5 }
  0xd4   : > { %1199 = vset.pattern.permute.xlu1 %v1312_v42  ;;  %1203 = vset.pattern.permute.xlu0 %v1313_v43  ;;  %v401_v12 = vmul.f32 1.442695, %v399_v7 }
  0xd5   : > { %476 = vperm.xlu1 %1199, %v354_v37   ;;  %1216 = vpow2.f32 %v393_v0 }
  0xd6   : > { %1218 = vpow2.f32 %v409_v1 }
  0xd7   : > { %1220 = vpow2.f32 %v371_v3 }
  0xd8   : > { %1222 = vpow2.f32 %v417_v9 }
  0xd9   : > { %1224 = vpow2.f32 %v401_v12 }
  0xda   : > { %1197 = vset.pattern.permute.xlu2 %v1311_v41 }
  0xdb   : > { %480 = vperm.xlu2 %1197, %v351_v36   ;;  %v1546_v8 = vpop.eup %1216 }
  0xdc   : > { %v1548_v10 = vpop.eup %1218  ;;  %v495_v20 = vmul.f32 0.0, %v1546_v8 }
  0xdd   : > { %1201 = vset.pattern.permute.xlu1 %v1313_v43  ;;  %v1221_v11 = vpop.eup %1220  ;;  %v497_v16 = vmul.f32 0.0, %v1548_v10 }
  0xde   : > { %488 = vperm.xlu1 %1201, %v351_v36   ;;  %v374_v17 = vadd.f32 1.0, %v1221_v11  ;;  %v1567_v26 = vpop.eup %1222 }
  0xdf   : > { %v1571_v31 = vpop.eup %1224 }
  0xe0   : > { %1226 = vlog2.f32 %v374_v17  ;;  %v496_v42 = vmul.f32 0.0, %v1571_v31 }
  0xe3   : > { %1202 = vset.pattern.permute.xlu2 %v1313_v43 }
  0xe4   : > { %492 = vperm.xlu2 %1202, %v354_v37   ;;  %v498_v37 = vmul.f32 0.0, %v1567_v26 }
  0xe6   : > { %v1227_v38 = vpop.eup %1226 }
  0xe7   : > { %v378_v49 = vmul.f32 0.6931472, %v1227_v38 }
  0xe9   : > { %v380_v56 = vadd.f32 %v378_v49, %v364_v48 }
  0xeb   : > { %v392_v5 = vmul.f32 %v1522_v58, %v380_v56  ;;  %v400_v11 = vmul.f32 %v1540_v4, %v380_v56  ;;  %v416_v17 = vmul.f32 %v1535_v2, %v380_v56 }
 0x111   : > { %v1543_v6 = vpop.permute.xlu2 %428 }
 0x11a   : > { %v1557_v21 = vpop.permute.xlu2 %438 }
 0x123   : > { %v445_v14 = vpop.permute.xlu1 %444  ;;  %v424_v15 = vpop.permute.xlu0 %423 }
 0x124   : > { %v1552_v18 = vmul.f32 %v445_v14, %v381_v13  ;;  %v1554_v19 = vmul.f32 %v424_v15, %v381_v13  ;;  %v1587_v43 = vpop.permute.xlu2 %458  ;;  %v1630_v14 = vld [vmem:[%s1983_s4] ss:$0 sm:$0xff]  ;;  %v408_v15 = vmul.f32 %v1527_v59, %v380_v56 }
 0x125   : > { %v1653_v38 = vmul.f32 %v1630_v14, %v1494_v28 }
 0x126   : > { %v1560_v22 = vadd.f32 %v497_v16, %v1552_v18  ;;  %v1563_v23 = vadd.f32 %v495_v20, %v1554_v19 }
 0x128   : > { %v517_v24 = vrot.slane %v1560_v22, 7  ;;  %v515_v25 = vrot.slane %v1563_v23, 7 }
 0x12a   : > { %v525_v27 = vmul.f32 %v1548_v10, %v517_v24  ;;  %v523_v30 = vmul.f32 %v1546_v8, %v515_v25  ;;  %v395_v24 = vmul.f32 1.442695, %v392_v5  ;;  %v382_v25 = vmul.f32 %v380_v56, %v1496_v29 }
 0x12c   : > { %v455_v32 = vpop.permute.xlu1 %454  ;;  %v1574_v33 = vadd.f32 %v525_v27, %v1552_v18  ;;  %v1577_v34 = vadd.f32 %v523_v30, %v1554_v19  ;;  %v435_v36 = vpop.permute.xlu0 %434  ;;  %1228 = vpow2.f32 %v395_v24 }
 0x12d   : > { %v1579_v35 = vmul.f32 %v455_v32, %v381_v13  ;;  %v1582_v39 = vmul.f32 %v435_v36, %v381_v13  ;;  %v1620_v7 = vpop.permute.xlu2 %472  ;;  %v403_v32 = vmul.f32 1.442695, %v400_v11 }
 0x12e   : > { %v545_v40 = vrot.slane %v1574_v33, 7  ;;  %v543_v41 = vrot.slane %v1577_v34, 7 }
 0x12f   : > { %v1590_v44 = vadd.f32 %v498_v37, %v1579_v35  ;;  %v1595_v47 = vadd.f32 %v496_v42, %v1582_v39  ;;  %1230 = vpow2.f32 %v403_v32 }
 0x130   : > { %v553_v45 = vmul.f32 %v1548_v10, %v545_v40  ;;  %v551_v46 = vmul.f32 %v1546_v8, %v543_v41  ;;  %v411_v40 = vmul.f32 1.442695, %v408_v15 }
 0x131   : > { %v518_v50 = vrot.slane %v1590_v44, 7  ;;  %v516_v53 = vrot.slane %v1595_v47, 7  ;;  %v504_v5 = vmul.f32 %v1595_v47, %v1620_v7 }
 0x132   : > { %v1600_v51 = vadd.f32 %v553_v45, %v1552_v18  ;;  %v1603_v52 = vadd.f32 %v551_v46, %v1554_v19  ;;  %v419_v45 = vmul.f32 1.442695, %v416_v17  ;;  %1232 = vpow2.f32 %v411_v40  ;;  %v1694_v17 = vpop.eup %1228 }
 0x133   : > { %v526_v54 = vmul.f32 %v1567_v26, %v518_v50  ;;  %v524_v60 = vmul.f32 %v1571_v31, %v516_v53  ;;  %v1663_v50 = vmul.f32 %v1543_v6, %v382_v25 }
 0x134   : > { %v573_v55 = vrot.slane %v1600_v51, 7  ;;  %v571_v57 = vrot.slane %v1603_v52, 7  ;;  %1234 = vpow2.f32 %v419_v45 }
 0x135   : > { %v1611_v61 = vadd.f32 %v526_v54, %v1579_v35  ;;  %v1613_v62 = vpop.permute.xlu1 %448  ;;  %v528_v1 = vadd.f32 %v524_v60, %v1582_v39  ;;  %v1643_v27 = vpop.permute.xlu0 %464  ;;  %v1668_v54 = vmul.f32 %v1557_v21, %v382_v25 }
 0x136   : > { %v579_v63 = vmul.f32 %v1546_v8, %v571_v57  ;;  %v581_v3 = vmul.f32 %v1548_v10, %v573_v55  ;;  %v503_v46 = vmul.f32 %v1563_v23, %v1643_v27  ;;  %v1674_v23 = vpop.permute.xlu2 %480  ;;  %v531_v6 = vmul.f32 %v1577_v34, %v1643_v27 }
 0x137   : > { %v546_v0 = vrot.slane %v1611_v61, 7  ;;  %v544_v12 = vrot.slane %v528_v1, 7  ;;  %v532_v47 = vmul.f32 %v528_v1, %v1620_v7 }
 0x138   : > { %v1623_v9 = vadd.f32 %v579_v63, %v1554_v19  ;;  %v1635_v58 = vadd.f32 %v581_v3, %v1552_v18  ;;  %v507_v63 = vadd.f32 %v503_v46, %v1653_v38  ;;  %v1683_v3 = vmul.f32 %v1587_v43, %v382_v25 }
 0x139   : > { %v554_v13 = vmul.f32 %v1567_v26, %v546_v0  ;;  %v552_v20 = vmul.f32 %v1571_v31, %v544_v12  ;;  %v505_v12 = vmul.f32 %v1560_v22, %v1674_v23  ;;  %v535_v43 = vadd.f32 %v531_v6, %v1653_v38 }
 0x13a   : > { %v599_v16 = vrot.slane %v1623_v9, 7  ;;  %v601_v30 = vrot.slane %v1635_v58, 7  ;;  %v533_v22 = vmul.f32 %v1574_v33, %v1674_v23  ;;  %v587_v1 = vmul.f32 %v1623_v9, %v1643_v27 }
 0x13b   : > { %v1640_v4 = vadd.f32 %v554_v13, %v1579_v35  ;;  %v556_v37 = vadd.f32 %v552_v20, %v1582_v39  ;;  %v559_v13 = vmul.f32 %v1603_v52, %v1643_v27  ;;  %v508_v52 = vadd.f32 %v507_v63, %v504_v5 }
 0x13c   : > { %v607_v59 = vmul.f32 %v1546_v8, %v599_v16  ;;  %v609_v41 = vmul.f32 %v1548_v10, %v601_v30  ;;  %v1719_v33 = vmul.f32 %v1613_v62, %v382_v25  ;;  %v589_v25 = vmul.f32 %v1635_v58, %v1674_v23 }
 0x13d   : > { %v574_v2 = vrot.slane %v1640_v4, 7  ;;  %v572_v48 = vrot.slane %v556_v37, 7  ;;  %v563_v6 = vadd.f32 %v559_v13, %v1653_v38 }
 0x13e   : > { %v1647_v36 = vpop.permute.xlu1 %468  ;;  %v1657_v42 = vadd.f32 %v607_v59, %v1554_v19  ;;  %v613_v28 = vadd.f32 %v609_v41, %v1552_v18  ;;  %v1701_v59 = vpop.eup %1230  ;;  %v561_v41 = vmul.f32 %v1600_v51, %v1674_v23  ;;  %v536_v51 = vadd.f32 %v535_v43, %v532_v47 }
 0x13f   : > { %v582_v49 = vmul.f32 %v1567_v26, %v574_v2  ;;  %v580_v55 = vmul.f32 %v1571_v31, %v572_v48  ;;  %v1709_v40 = vpop.eup %1232 }
 0x140   : > { %v627_v53 = vrot.slane %v1657_v42, 7  ;;  %v629_v60 = vrot.slane %v613_v28, 7  ;;  %v1716_v48 = vpop.eup %1234  ;;  %v617_v43 = vmul.f32 %v613_v28, %v1674_v23 }
 0x141   : > { %v1672_v57 = vadd.f32 %v582_v49, %v1579_v35  ;;  %v584_v21 = vadd.f32 %v580_v55, %v1582_v39  ;;  %v560_v49 = vmul.f32 %v556_v37, %v1620_v7  ;;  %v591_v37 = vadd.f32 %v587_v1, %v1653_v38 }
 0x142   : > { %v635_v56 = vmul.f32 %v1546_v8, %v627_v53  ;;  %v637_v11 = vmul.f32 %v1548_v10, %v629_v60 }
 0x143   : > { %v602_v0 = vrot.slane %v1672_v57, 7  ;;  %v600_v15 = vrot.slane %v584_v21, 7  ;;  %v588_v63 = vmul.f32 %v584_v21, %v1620_v7  ;;  %v564_v13 = vadd.f32 %v563_v6, %v560_v49 }
 0x144   : > { %v639_v34 = vadd.f32 %v635_v56, %v1554_v19  ;;  %v641_v24 = vadd.f32 %v637_v11, %v1552_v18  ;;  %v509_v56 = vadd.f32 %v508_v52, %v505_v12  ;;  %v537_v21 = vadd.f32 %v536_v51, %v533_v22 }
 0x145   : > { %v610_v16 = vmul.f32 %v1567_v26, %v602_v0  ;;  %v608_v32 = vmul.f32 %v1571_v31, %v600_v15  ;;  %v615_v15 = vmul.f32 %v1657_v42, %v1643_v27 }
 0x146   : > { %v655_v30 = vrot.slane %v639_v34, 7  ;;  %v657_v45 = vrot.slane %v641_v24, 7  ;;  %v643_v47 = vmul.f32 %v639_v34, %v1643_v27  ;;  %v565_v34 = vadd.f32 %v564_v13, %v561_v41 }
 0x147   : > { %v1697_v20 = vpop.permute.xlu1 %476  ;;  %v1707_v2 = vadd.f32 %v610_v16, %v1579_v35  ;;  %v612_v53 = vadd.f32 %v608_v32, %v1582_v39  ;;  %v645_v51 = vmul.f32 %v641_v24, %v1674_v23 }
 0x148   : > { %v663_v46 = vmul.f32 %v1546_v8, %v655_v30  ;;  %v665_v60 = vmul.f32 %v1548_v10, %v657_v45  ;;  %v592_v30 = vadd.f32 %v591_v37, %v588_v63 }
 0x149   : > { %v630_v55 = vrot.slane %v1707_v2, 7  ;;  %v628_v0 = vrot.slane %v612_v53, 7  ;;  %v616_v52 = vmul.f32 %v612_v53, %v1620_v7 }
 0x14a   : > { %v667_v9 = vadd.f32 %v663_v46, %v1554_v19  ;;  %v669_v5 = vadd.f32 %v665_v60, %v1552_v18  ;;  %v619_v46 = vadd.f32 %v615_v15, %v1653_v38  ;;  %v593_v63 = vadd.f32 %v592_v30, %v589_v25 }
 0x14b   : > { %v638_v62 = vmul.f32 %v1567_v26, %v630_v55  ;;  %v636_v16 = vmul.f32 %v1571_v31, %v628_v0 }
 0x14c   : > { %v683_v11 = vrot.slane %v667_v9, 7  ;;  %v685_v45 = vrot.slane %v669_v5, 7  ;;  %v671_v55 = vmul.f32 %v667_v9, %v1643_v27  ;;  %v620_v0 = vadd.f32 %v619_v46, %v616_v52 }
 0x14d   : > { %v642_v12 = vadd.f32 %v638_v62, %v1579_v35  ;;  %v640_v32 = vadd.f32 %v636_v16, %v1582_v39  ;;  %v673_v24 = vmul.f32 %v669_v5, %v1674_v23 }
 0x14e   : > { %v691_v28 = vmul.f32 %v1546_v8, %v683_v11  ;;  %v693_v9 = vmul.f32 %v1548_v10, %v685_v45  ;;  %v675_v11 = vadd.f32 %v671_v55, %v1653_v38  ;;  %v621_v5 = vadd.f32 %v620_v0, %v617_v43 }
 0x14f   : > { %v658_v1 = vrot.slane %v642_v12, 7  ;;  %v656_v49 = vrot.slane %v640_v32, 7  ;;  %v644_v6 = vmul.f32 %v640_v32, %v1620_v7 }
 0x150   : > { %v1739_v58 = vpop.permute.xlu1 %488  ;;  %v695_v62 = vadd.f32 %v691_v28, %v1554_v19  ;;  %v697_v15 = vadd.f32 %v693_v9, %v1552_v18 }
 0x151   : > { %v506_v42 = vmul.f32 %v1590_v44, %v1739_v58  ;;  %v534_v22 = vmul.f32 %v1611_v61, %v1739_v58  ;;  %v562_v53 = vmul.f32 %v1640_v4, %v1739_v58  ;;  %v647_v44 = vadd.f32 %v643_v47, %v1653_v38 }
 0x152   : > { %v664_v8 = vmul.f32 %v1571_v31, %v656_v49  ;;  %v666_v41 = vmul.f32 %v1567_v26, %v658_v1  ;;  %v711_v16 = vrot.slane %v695_v62, 7  ;;  %v590_v25 = vmul.f32 %v1672_v57, %v1739_v58 }
 0x153   : > { %v510_v61 = vadd.f32 %v509_v56, %v506_v42  ;;  %v538_v60 = vadd.f32 %v537_v21, %v534_v22  ;;  %v566_v56 = vadd.f32 %v565_v34, %v562_v53  ;;  %v648_v13 = vadd.f32 %v647_v44, %v644_v6 }
 0x154   : > { %v668_v4 = vadd.f32 %v664_v8, %v1582_v39  ;;  %v670_v37 = vadd.f32 %v666_v41, %v1579_v35  ;;  %v618_v47 = vmul.f32 %v1707_v2, %v1739_v58  ;;  %v713_v52 = vrot.slane %v697_v15, 7 }
 0x155   : > { %v932_v21 = vsel %vm931_vm0, %v510_v61, %v538_v60  ;;  %v699_v18 = vmul.f32 %v695_v62, %v1643_v27  ;;  %v719_v42 = vmul.f32 %v1694_v17, %v711_v16  ;;  %v649_v57 = vadd.f32 %v648_v13, %v645_v51 }
 0x156   : > { %v672_v10 = vmul.f32 %v668_v4, %v1620_v7  ;;  %v684_v19 = vrot.slane %v668_v4, 7  ;;  %v686_v30 = vrot.slane %v670_v37, 7  ;;  %v721_v45 = vmul.f32 %v1709_v40, %v713_v52 }
 0x157   : > { %v934_v28 = vsel %vm933_vm1, %v932_v21, %v566_v56  ;;  %v594_v2 = vadd.f32 %v593_v63, %v590_v25  ;;  %v646_v43 = vmul.f32 %v642_v12, %v1739_v58  ;;  %v723_v46 = vadd.f32 %v719_v42, %v1663_v50 }
 0x158   : > { %v676_v32 = vadd.f32 %v675_v11, %v672_v10  ;;  %v692_v1 = vmul.f32 %v1571_v31, %v684_v19  ;;  %v694_v22 = vmul.f32 %v1567_v26, %v686_v30  ;;  %v622_v31 = vadd.f32 %v621_v5, %v618_v47 }
 0x159   : > { %v1781_v55 = vadd.f32 %v721_v45, %v1719_v33  ;;  %v703_v53 = vadd.f32 %v699_v18, %v1653_v38  ;;  %v936_v51 = vsel %vm935_vm2, %v934_v28, %v594_v2  ;;  %v650_v44 = vadd.f32 %v649_v57, %v646_v43 }
 0x15a   : > { %v696_v34 = vadd.f32 %v692_v1, %v1582_v39  ;;  %v677_v49 = vadd.f32 %v676_v32, %v673_v24  ;;  %v698_v27 = vadd.f32 %v694_v22, %v1579_v35  ;;  %v674_v12 = vmul.f32 %v670_v37, %v1739_v58 }
 0x15b   : > { %v739_v61 = vrot.slane %v723_v46, 7  ;;  %v701_v60 = vmul.f32 %v697_v15, %v1674_v23  ;;  %v741_v41 = vrot.slane %v1781_v55, 7  ;;  %v938_v0 = vsel %vm937_vm3, %v936_v51, %v622_v31 }
 0x15c   : > { %v700_v26 = vmul.f32 %v696_v34, %v1620_v7  ;;  %v712_v6 = vrot.slane %v696_v34, 7  ;;  %v714_v39 = vrot.slane %v698_v27, 7  ;;  %v678_v63 = vadd.f32 %v677_v49, %v674_v12 }
 0x15d   : > { %v747_v38 = vmul.f32 %v1694_v17, %v739_v61  ;;  %v702_v9 = vmul.f32 %v698_v27, %v1739_v58  ;;  %v749_v37 = vmul.f32 %v1709_v40, %v741_v41  ;;  %v940_v15 = vsel %vm939_vm4, %v938_v0, %v650_v44 }
 0x15e   : > { %v704_v8 = vadd.f32 %v703_v53, %v700_v26  ;;  %v720_v35 = vmul.f32 %v1701_v59, %v712_v6  ;;  %v722_v7 = vmul.f32 %v1716_v48, %v714_v39  ;;  %v942_v58 = vsel %vm941_vm5, %v940_v15, %v678_v63 }
 0x15f   : > { %v751_v24 = vadd.f32 %v747_v38, %v1663_v50  ;;  %v753_v13 = vadd.f32 %v749_v37, %v1719_v33  ;;  %v1820_v49 = vmul.f32 %v1630_v14, %v1496_v29  ;;  %v727_v27 = vmul.f32 %v723_v46, %v1647_v36 }
 0x160   : > { %v705_v62 = vadd.f32 %v704_v8, %v701_v60  ;;  %v724_v4 = vadd.f32 %v720_v35, %v1668_v54  ;;  %v726_v23 = vadd.f32 %v722_v7, %v1683_v3  ;;  %v1837_v8 = vpop.permute.xlu0 %484 }
 0x161   : > { %v767_v25 = vrot.slane %v751_v24, 7  ;;  %v769_v19 = vrot.slane %v753_v13, 7  ;;  %v731_v14 = vadd.f32 %v727_v27, %v1820_v49 }
 0x162   : > { %v706_v11 = vadd.f32 %v705_v62, %v702_v9  ;;  %v740_v56 = vrot.slane %v724_v4, 7  ;;  %v742_v16 = vrot.slane %v726_v23, 7  ;;  %v728_v44 = vmul.f32 %v724_v4, %v1697_v20 }
 0x163   : > { %v775_v5 = vmul.f32 %v1694_v17, %v767_v25  ;;  %v777_v52 = vmul.f32 %v1709_v40, %v769_v19  ;;  %v729_v62 = vmul.f32 %v1781_v55, %v1837_v8 }
 0x164   : > { %v748_v10 = vmul.f32 %v1701_v59, %v740_v56  ;;  %v1803_v21 = vsel %vm943_vm6, %v942_v58, %v706_v11  ;;  %v750_v47 = vmul.f32 %v1716_v48, %v742_v16  ;;  %v732_v63 = vadd.f32 %v731_v14, %v728_v44  ;;  %v1854_v16 = vpop.permute.xlu2 %492 }
 0x165   : > { %952 = vadd.xlane.f32.xlu1 %v1803_v21  ;;  %v779_v1 = vadd.f32 %v775_v5, %v1663_v50  ;;  %v781_v42 = vadd.f32 %v777_v52, %v1719_v33  ;;  %v755_v11 = vmul.f32 %v751_v24, %v1647_v36  ;;  %v730_v19 = vmul.f32 %v726_v23, %v1854_v16 }
 0x166   : > { %v752_v30 = vadd.f32 %v748_v10, %v1668_v54  ;;  %v754_v32 = vadd.f32 %v750_v47, %v1683_v3  ;;  %v733_v25 = vadd.f32 %v732_v63, %v729_v62  ;;  %v757_v24 = vmul.f32 %v753_v13, %v1837_v8 }
 0x167   : > { %v795_v22 = vrot.slane %v779_v1, 7  ;;  %v797_v28 = vrot.slane %v781_v42, 7 }
 0x168   : > { %v768_v18 = vrot.slane %v752_v30, 7  ;;  %v770_v57 = vrot.slane %v754_v32, 7  ;;  %v756_v5 = vmul.f32 %v752_v30, %v1697_v20 }
 0x169   : > { %v803_v43 = vmul.f32 %v1694_v17, %v795_v22  ;;  %v805_v31 = vmul.f32 %v1709_v40, %v797_v28  ;;  %v783_v22 = vmul.f32 %v779_v1, %v1647_v36  ;;  %v1870_v28 = vadd.f32 %v733_v25, %v730_v19 }
 0x16a   : > { %v776_v45 = vmul.f32 %v1701_v59, %v768_v18  ;;  %v778_v2 = vmul.f32 %v1716_v48, %v770_v57  ;;  %v759_v57 = vadd.f32 %v755_v11, %v1820_v49  ;;  %v785_v1 = vmul.f32 %v781_v42, %v1837_v8 }
 0x16b   : > { %v807_v53 = vadd.f32 %v803_v43, %v1663_v50  ;;  %v1828_v51 = vadd.f32 %v805_v31, %v1719_v33 }
 0x16c   : > { %v780_v34 = vadd.f32 %v776_v45, %v1668_v54  ;;  %v1824_v26 = vadd.f32 %v778_v2, %v1683_v3  ;;  %v758_v2 = vmul.f32 %v754_v32, %v1854_v16  ;;  %v760_v44 = vadd.f32 %v759_v57, %v756_v5 }
 0x16d   : > { %v823_v39 = vrot.slane %v807_v53, 7  ;;  %v825_v29 = vrot.slane %v1828_v51, 7  ;;  %v811_v31 = vmul.f32 %v807_v53, %v1647_v36  ;;  %v813_v5 = vmul.f32 %v1828_v51, %v1837_v8 }
 0x16e   : > { %v796_v6 = vrot.slane %v780_v34, 7  ;;  %v798_v12 = vrot.slane %v1824_v26, 7  ;;  %v784_v13 = vmul.f32 %v780_v34, %v1697_v20 }
 0x16f   : > { %v831_v60 = vmul.f32 %v1694_v17, %v823_v39  ;;  %v833_v41 = vmul.f32 %v1709_v40, %v825_v29 }
 0x170   : > { %v804_v61 = vmul.f32 %v1701_v59, %v796_v6  ;;  %v806_v46 = vmul.f32 %v1716_v48, %v798_v12 }
 0x171   : > { %v835_v38 = vadd.f32 %v831_v60, %v1663_v50  ;;  %v1846_v9 = vadd.f32 %v833_v41, %v1719_v33  ;;  %v815_v41 = vadd.f32 %v811_v31, %v1820_v49 }
 0x172   : > { %v808_v35 = vadd.f32 %v804_v61, %v1668_v54  ;;  %v1842_v7 = vadd.f32 %v806_v46, %v1683_v3  ;;  %v787_v61 = vadd.f32 %v783_v22, %v1820_v49 }
 0x173   : > { %v851_v37 = vrot.slane %v835_v38, 7  ;;  %v853_v15 = vrot.slane %v1846_v9, 7  ;;  %v839_v53 = vmul.f32 %v835_v38, %v1647_v36  ;;  %v841_v51 = vmul.f32 %v1846_v9, %v1837_v8 }
 0x174   : > { %v824_v0 = vrot.slane %v808_v35, 7  ;;  %v826_v4 = vrot.slane %v1842_v7, 7  ;;  %v812_v32 = vmul.f32 %v808_v35, %v1697_v20  ;;  %v788_v60 = vadd.f32 %v787_v61, %v784_v13 }
 0x175   : > { %v859_v10 = vmul.f32 %v1694_v17, %v851_v37  ;;  %v861_v47 = vmul.f32 %v1709_v40, %v853_v15  ;;  %v843_v25 = vadd.f32 %v839_v53, %v1820_v49 }
 0x176   : > { %v832_v56 = vmul.f32 %v1701_v59, %v824_v0  ;;  %v834_v58 = vmul.f32 %v1716_v48, %v826_v4  ;;  %v816_v11 = vadd.f32 %v815_v41, %v812_v32  ;;  %v789_v31 = vadd.f32 %v788_v60, %v785_v1 }
 0x177   : > { %v863_v18 = vadd.f32 %v859_v10, %v1663_v50  ;;  %v865_v23 = vadd.f32 %v861_v47, %v1719_v33  ;;  %v761_v47 = vadd.f32 %v760_v44, %v757_v24 }
 0x178   : > { %v836_v55 = vadd.f32 %v832_v56, %v1668_v54  ;;  %v1864_v52 = vadd.f32 %v834_v58, %v1683_v3 }
 0x179   : > { %v879_v43 = vrot.slane %v863_v18, 7  ;;  %v881_v6 = vrot.slane %v865_v23, 7  ;;  %v867_v46 = vmul.f32 %v863_v18, %v1647_v36  ;;  %v762_v1 = vadd.f32 %v761_v47, %v758_v2 }
 0x17a   : > { %v852_v45 = vrot.slane %v836_v55, 7  ;;  %v854_v30 = vrot.slane %v1864_v52, 7  ;;  %v840_v35 = vmul.f32 %v836_v55, %v1697_v20  ;;  %v786_v55 = vmul.f32 %v1824_v26, %v1854_v16 }
 0x17b   : > { %v887_v39 = vmul.f32 %v1694_v17, %v879_v43  ;;  %v889_v34 = vmul.f32 %v1709_v40, %v881_v6  ;;  %v871_v58 = vadd.f32 %v867_v46, %v1820_v49  ;;  %v817_v26 = vadd.f32 %v816_v11, %v813_v5 }
 0x17c   : > { %v860_v27 = vmul.f32 %v1701_v59, %v852_v45  ;;  %v862_v12 = vmul.f32 %v1716_v48, %v854_v30  ;;  %v844_v57 = vadd.f32 %v843_v25, %v840_v35  ;;  %v869_v6 = vmul.f32 %v865_v23, %v1837_v8 }
 0x17d   : > { %v891_v42 = vadd.f32 %v887_v39, %v1663_v50  ;;  %v893_v0 = vadd.f32 %v889_v34, %v1719_v33  ;;  %v814_v39 = vmul.f32 %v1842_v7, %v1854_v16  ;;  %v790_v23 = vadd.f32 %v789_v31, %v786_v55  ;;  %v1210_v31 = vld [vmem:[%s1984_s5] ss:$0 sm:$0xff] }
 0x17e   : > { %v864_v29 = vadd.f32 %v860_v27, %v1668_v54  ;;  %v866_v14 = vadd.f32 %v862_v12, %v1683_v3  ;;  %v845_v61 = vadd.f32 %v844_v57, %v841_v51 }
 0x17f   : > { %v907_v37 = vrot.slane %v891_v42, 7  ;;  %v895_v56 = vmul.f32 %v891_v42, %v1647_v36  ;;  %v909_v15 = vrot.slane %v893_v0, 7  ;;  %v897_v32 = vmul.f32 %v893_v0, %v1837_v8 }
 0x180   : > { %v880_v63 = vrot.slane %v864_v29, 7  ;;  %v868_v62 = vmul.f32 %v864_v29, %v1697_v20  ;;  %v882_v4 = vrot.slane %v866_v14, 7  ;;  %v818_v53 = vadd.f32 %v817_v26, %v814_v39 }
 0x181   : > { %v915_v19 = vmul.f32 %v1694_v17, %v907_v37  ;;  %v899_v13 = vadd.f32 %v895_v56, %v1820_v49  ;;  %v917_v24 = vmul.f32 %v1709_v40, %v909_v15  ;;  %v870_v46 = vmul.f32 %v866_v14, %v1854_v16 }
 0x182   : > { %v888_v38 = vmul.f32 %v1701_v59, %v880_v63  ;;  %v890_v10 = vmul.f32 %v1716_v48, %v882_v4  ;;  %v872_v22 = vadd.f32 %v871_v58, %v868_v62  ;;  %v945_v63 = vsel %vm931_vm0, %v1870_v28, %v762_v1 }
 0x183   : > { %v919_v30 = vadd.f32 %v915_v19, %v1663_v50  ;;  %v921_v34 = vadd.f32 %v917_v24, %v1719_v33  ;;  %v946_v0 = vsel %vm933_vm1, %v945_v63, %v790_v23  ;;  %v1314_v37 = vmov 128.0  }
 0x184   : > { %v892_v18 = vadd.f32 %v888_v38, %v1668_v54  ;;  %v894_v45 = vadd.f32 %v890_v10, %v1683_v3  ;;  %v873_v29 = vadd.f32 %v872_v22, %v869_v6  ;;  %1236 = vrcp.f32 %v1314_v37 }
 0x185   : > { %v923_v50 = vmul.f32 %v919_v30, %v1647_v36  ;;  %v925_v33 = vmul.f32 %v921_v34, %v1837_v8 }
 0x186   : > { %v896_v43 = vmul.f32 %v892_v18, %v1697_v20  ;;  %v908_v17 = vrot.slane %v892_v18, 7  ;;  %v910_v27 = vrot.slane %v894_v45, 7  ;;  %v898_v60 = vmul.f32 %v894_v45, %v1854_v16 }
 0x188   : > { %v900_v44 = vadd.f32 %v899_v13, %v896_v43  ;;  %v916_v12 = vmul.f32 %v1701_v59, %v908_v17  ;;  %v918_v40 = vmul.f32 %v1716_v48, %v910_v27  ;;  %v842_v59 = vmul.f32 %v1864_v52, %v1854_v16  ;;  %v1211_v27 = vld [vmem:[%s1985_s6] ss:$0 sm:$0xff] }
 0x189   : > { %v927_v48 = vadd.f32 %v923_v50, %v1820_v49 }
 0x18a   : > { %v920_v9 = vadd.f32 %v916_v12, %v1668_v54  ;;  %v901_v36 = vadd.f32 %v900_v44, %v897_v32  ;;  %v922_v7 = vadd.f32 %v918_v40, %v1683_v3  ;;  %v846_v2 = vadd.f32 %v845_v61, %v842_v59  ;;  %v1237_v28 = vpop.eup %1236 }
 0x18b   : > { %v874_v54 = vadd.f32 %v873_v29, %v870_v46  ;;  %v957_v11 = vmul.f32 128.0, %v1237_v28  ;;  %vm961_vm7 = vweird.f32 %v1237_v28 }
 0x18c   : > { %v924_v42 = vmul.f32 %v920_v9, %v1697_v20  ;;  %v902_v52 = vadd.f32 %v901_v36, %v898_v60  ;;  %v926_v14 = vmul.f32 %v922_v7, %v1854_v16  ;;  %v947_v20 = vsel %vm935_vm2, %v946_v0, %v818_v53 }
 0x18d   : > { %v948_v49 = vsel %vm937_vm3, %v947_v20, %v846_v2  ;;  %v958_v38 = vsub.f32 1.0, %v957_v11 }
 0x18e   : > { %v928_v41 = vadd.f32 %v927_v48, %v924_v42  ;;  %v949_v62 = vsel %vm939_vm4, %v948_v49, %v874_v54 }
 0x18f   : > { %v950_v4 = vsel %vm941_vm5, %v949_v62, %v902_v52  ;;  %v959_v56 = vmul.f32 %v1237_v28, %v958_v38 }
 0x190   : > { %v929_v3 = vadd.f32 %v928_v41, %v925_v33 }
 0x191   : > { %v960_v16 = vadd.f32 %v1237_v28, %v959_v56 }
 0x192   : > { %v930_v35 = vadd.f32 %v929_v3, %v926_v14 }
 0x193   : > { %v962_v15 = vsel %vm961_vm7, %v1237_v28, %v960_v16 }
 0x194   : > { %v951_v8 = vsel %vm943_vm6, %v950_v4, %v930_v35 }
 0x195   : > { %954 = vadd.xlane.f32.xlu2 %v951_v8 }
 0x1d8   : > { %v953_v25 = vpop.xlane.xlu1 %952 }
 0x1d9   : > { %v963_v58 = vmul.f32 %v962_v15, %v953_v25 }
 0x1db   : > { %v965_v10 = vsub.f32 %v1803_v21, %v963_v58 }
 0x1dd   : > { %v967_v19 = vmul.f32 %v965_v10, %v965_v10 }
 0x1df   : > { %969 = vadd.xlane.f32.xlu0 %v967_v19 }
 0x208   : > { %v955_v47 = vpop.xlane.xlu2 %954 }
 0x209   : > { %v964_v55 = vmul.f32 %v962_v15, %v955_v47 }
 0x20b   : > { %v966_v5 = vsub.f32 %v951_v8, %v964_v55 }
 0x20d   : > { %v968_v18 = vmul.f32 %v966_v5, %v966_v5 }
 0x20f   : > { %971 = vadd.xlane.f32.xlu2 %v968_v18 }
 0x252   : > { %v970_v57 = vpop.xlane.xlu0 %969 }
 0x253   : > { %v973_v22 = vmul.f32 %v970_v57, %v962_v15 }
 0x255   : > { %v975_v45 = vadd.f32 1e-05, %v973_v22 }
 0x257   : > { %1238 = vrsqrt.f32 %v975_v45  ;;  %vm983_vm9 = vweird.f32 %v975_v45 }
 0x25d   : > { %v1239_v30 = vpop.eup %1238 }
 0x25e   : > { %v978_v43 = vmul.f32 %v1239_v30, %v975_v45  ;;  %vm984_vm8 = vweird.f32 %v1239_v30 }
 0x25f   : > { %vm985_vm10 = vmor %vm983_vm9, %vm984_vm8 }
 0x260   : > { %v979_v13 = vmul.f32 %v1239_v30, %v978_v43 }
 0x262   : > { %v980_v17 = vmul.f32 0.5, %v979_v13 }
 0x264   : > { %v981_v24 = vsub.f32 1.5, %v980_v17 }
 0x266   : > { %v982_v21 = vmul.f32 %v1239_v30, %v981_v24 }
 0x268   : > { %v986_v26 = vsel %vm985_vm10, %v1239_v30, %v982_v21 }
 0x269   : > { %v997_v51 = vmul.f32 %v986_v26, %v965_v10 }
 0x26b   : > { %v1003_v6 = vmul.f32 %v1210_v31, %v997_v51 }
 0x26d   : > { %v1009_v44 = vadd.f32 %v1211_v27, %v1003_v6 }
 0x26f   : > { %1011 = vst [vmem:[%s271_s17] sm:$0xff] %v1009_v44 }
 0x282   : > { %v972_v12 = vpop.xlane.xlu2 %971 }
 0x283   : > { %v974_v50 = vmul.f32 %v972_v12, %v962_v15 }
 0x285   : > { %v976_v39 = vadd.f32 1e-05, %v974_v50 }
 0x287   : > { %1240 = vrsqrt.f32 %v976_v39  ;;  %vm993_vm12 = vweird.f32 %v976_v39 }
 0x28d   : > { %v1241_v61 = vpop.eup %1240 }
 0x28e   : > { %v988_v32 = vmul.f32 %v1241_v61, %v976_v39  ;;  %vm994_vm11 = vweird.f32 %v1241_v61 }
 0x28f   : > { %vm995_vm13 = vmor %vm993_vm12, %vm994_vm11 }
 0x290   : > { %v989_v40 = vmul.f32 %v1241_v61, %v988_v32 }
 0x292   : > { %v990_v1 = vmul.f32 0.5, %v989_v40 }
 0x294   : > { %v991_v29 = vsub.f32 1.5, %v990_v1 }
 0x296   : > { %v992_v9 = vmul.f32 %v1241_v61, %v991_v29 }
 0x298   : > { %v996_v34 = vsel %vm995_vm13, %v1241_v61, %v992_v9 }
 0x299   : > { %v998_v23 = vmul.f32 %v996_v34, %v966_v5 }
 0x29b   : > { %v1004_v53 = vmul.f32 %v1210_v31, %v998_v23 }
 0x29d   : > { %v1010_v59 = vadd.f32 %v1211_v27, %v1004_v53 }
 0x29f   : > { %1012 = vst [vmem:[%s271_s17 + $0x8] sm:$0xff] %v1010_v59 }
 0x2a0   : > { %1269 = shalt.err (!%p1266_p3)
}
 0x2a1   : > { %s1315_s8 = smov 128   ;;  %s1316_s17 = smov 8  }
 0x2a2   : > { %1137 = dma.vmem_to_hbm [thread:$0]  (%p1395_p5), %s1027_s22, 256, %s1029_s23, %s1014_s28, %s1315_s8, %s1315_s8, %s1316_s17  }
 0x2a3 PF: > { %p1143_p4 = scmp.ge.s32.totalorder %s1304_s27, 2  ;;  %s1043_s16 = sand.u32 1, %s1292_s24  }
 0x2a4   : > { %s1044_s19 = scalar_lea.sflag [#allocation3], %s1043_s16 }
 0x2a5   : > { %p1140_p7 = pnand %p1143_p4, %p1399_p6 }
 0x2a7   : > { %p1141_p8 = pneg %p1140_p7 }
 0x2a9   : > { %1287 = dma.done.wait (%p1141_p8), %s1044_s19, 256  }
 0x2aa   : > { %1289 = vsyncadd (%p1141_p8), %s1044_s19, 4294967040  ;;  %p17_p9 = scmp.ge.s32.totalorder %s1382_s30, 4   ;;  %s1989_s24 = smov %s1296_s25 }
 0x2ab   : > { %s1990_s25 = smov %s1300_s26  ;;  %s1991_s26 = smov %s1393_s10 }
 0x2ac   : > { %s1992_s27 = smov %s1382_s30  ;;  %19 = sbr.rel (!%p17_p9) target bundleno = 3 (0x3), region = 83 }
 0x2b1   :  { %1050 = vsyncpa [#allocation3], 1 }
 0x2b2   :  { %1052 = vsyncpa [#allocation3 + $0x1], 1 }

</bundles_post_ra>
